<compile_context>
chip_gen: v7x
topology: tpu7x:2x2x1
jax: 0.10.0
libtpu: 0.0.40
codegen_flags: <defaults>
</compile_context>

<pallas_src>
import random

import jax
import jax.numpy as jnp
from jax.experimental import pallas as pl
from jax.experimental.pallas import tpu as pltpu

# ----------------------------- model sizes ---------------------------------
B = 4              # real batch size
B_PAD = 8          # padded to one full sublane group
SRC_LEN = 16       # source sequence length
MAX_LEN = 8        # target sequence length (tgt.shape[0])
EMB = 32           # embedding dim (encoder & decoder)
HID = 32           # decoder.hid_dim
VOCAB = 64         # decoder.output_dim (target vocab)
VOCAB_PAD = 128    # lane-dense logits width
SRC_VOCAB = 64     # source vocab
C_OUT = 32         # conv output channels
K = 3              # conv kernel size (padding=1 -> same length)
NEG_INF = -1e30

VMEM = pl.BlockSpec(memory_space=pltpu.MemorySpace.VMEM)
SMEM = pl.BlockSpec(memory_space=pltpu.MemorySpace.SMEM)


# --------------------------- encoder kernel --------------------------------
def conv_encoder_kernel(x_ref, wconv_ref, bconv_ref, pool_ref, wfc_ref, bfc_ref,
                        out_ref):
    # x_ref:     (B*L, K*EMB)  im2col'd, channels-last, zero-padded conv input
    # wconv_ref: (K*EMB, C_OUT)   bconv_ref: (1, C_OUT)
    # pool_ref:  (B, B*L)  mean-pool matrix (1/L on each row's own block)
    # wfc_ref:   (C_OUT, 4*HID)   bfc_ref: (1, 4*HID)
    # out_ref:   (B, 4*HID)
    conv = (jnp.dot(x_ref[...], wconv_ref[...],
                    preferred_element_type=jnp.float32) + bconv_ref[...])
    conv = jnp.maximum(conv, 0.0)                                   # ReLU
    pooled = jnp.dot(pool_ref[...], conv,
                     preferred_element_type=jnp.float32)            # (B, C_OUT)
    out_ref[...] = (jnp.dot(pooled, wfc_ref[...],
                            preferred_element_type=jnp.float32) + bfc_ref[...])


# ---------------------- fused decoder-loop kernel ---------------------------
def fused_decoder_kernel(h_init_ref, c_init_ref, tgt_oh_ref, tf_ref, dec_emb_ref,
                         w0_ref, b0_ref, w1_ref, b1_ref, wout_ref, bout_ref,
                         out_ref):
    # h_init_ref, c_init_ref: (2, B_PAD, HID)
    # tgt_oh_ref:  (MAX_LEN, B_PAD, VOCAB_PAD)  one-hot target tokens
    # tf_ref:      (MAX_LEN,) int32 in SMEM     teacher-force mask (precomputed)
    # dec_emb_ref: (VOCAB_PAD, EMB)
    # w0/w1:       (EMB+HID, 4*HID)  fused [Wih; Whh];  b0/b1: (1, 4*HID)
    # wout:        (HID, VOCAB_PAD); bout: (1, VOCAB_PAD) (pad lanes = -1e30)
    # out_ref:     (MAX_LEN, B_PAD, VOCAB_PAD)
    H = HID
    out_ref[...] = jnp.zeros_like(out_ref)       # outputs[0] stays zero

    dec_emb = dec_emb_ref[...]
    w0 = w0_ref[...]
    b0 = b0_ref[...]
    w1 = w1_ref[...]
    b1 = b1_ref[...]
    wout = wout_ref[...]
    bout = bout_ref[...]

    def lstm_cell(x, h, c, w, b):
        xh = jnp.concatenate([x, h], axis=1)     # (B_PAD, EMB+HID): one fused matmul
        g = jnp.dot(xh, w, preferred_element_type=jnp.float32) + b
        i = jax.nn.sigmoid(g[:, 0 * H:1 * H])    # PyTorch gate order i, f, g, o
        f = jax.nn.sigmoid(g[:, 1 * H:2 * H])
        gg = jnp.tanh(g[:, 2 * H:3 * H])
        o = jax.nn.sigmoid(g[:, 3 * H:4 * H])
        c_new = f * c + i * gg
        h_new = o * jnp.tanh(c_new)
        return h_new, c_new

    lane_idx = jax.lax.broadcasted_iota(jnp.int32, (B_PAD, VOCAB_PAD), 1)

    h_l0 = h_init_ref[0]
    h_l1 = h_init_ref[1]
    c_l0 = c_init_ref[0]
    c_l1 = c_init_ref[1]
    prev_oh = tgt_oh_ref[0]      # first decoder input is always tgt[0]

    # Fully unrolled time loop; weights/state stay resident on-chip all steps.
    for t in range(1, MAX_LEN):
        tf = (tf_ref[t] > 0).astype(jnp.float32)
        x_oh = tf * tgt_oh_ref[t - 1] + (1.0 - tf) * prev_oh   # teacher-force select
        x_emb = jnp.dot(x_oh, dec_emb, preferred_element_type=jnp.float32)

        h_l0, c_l0 = lstm_cell(x_emb, h_l0, c_l0, w0, b0)
        h_l1, c_l1 = lstm_cell(h_l0, h_l1, c_l1, w1, b1)

        logits = jnp.dot(h_l1, wout, preferred_element_type=jnp.float32) + bout
        out_ref[t] = logits                                     # lane-dense store

        # greedy argmax (first max index) as a one-hot, kept on-chip for next step
        m = jnp.max(logits, axis=-1, keepdims=True)
        cand = jnp.where(logits == m, lane_idx, VOCAB_PAD)
        first = jnp.min(cand, axis=-1, keepdims=True)
        prev_oh = (lane_idx == first).astype(jnp.float32)


# --------------------------- jitted forward --------------------------------
def seq2seq_conv_encoder_forward(src, tgt, tf_sel, p):
    """Mirrors Seq2SeqConvEncoder.forward (teacher-force decisions precomputed)."""
    L = SRC_LEN
    # ---- encoder input prep (embedding lookup / pad / im2col; tiny XLA ops) ----
    emb = jnp.take(p["enc_emb"], src, axis=0)          # (L, B, EMB)
    x = jnp.transpose(emb, (1, 0, 2))                  # (B, L, EMB) channels-last
    x_padded = jnp.pad(x, ((0, 0), (K // 2, K // 2), (0, 0)))     # Conv1d padding=1
    x_unf = jnp.concatenate([x_padded[:, k:k + L, :] for k in range(K)], axis=-1)
    x_unf = x_unf.reshape(B * L, K * EMB)              # im2col (B*L, 3*EMB)
    pool = jnp.repeat(jnp.eye(B, dtype=jnp.float32), L, axis=1) / L   # (B, B*L)

    enc_out = pl.pallas_call(
        conv_encoder_kernel,
        out_shape=jax.ShapeDtypeStruct((B, 4 * HID), jnp.float32),
        in_specs=[VMEM] * 6,
        out_specs=VMEM,
    )(x_unf, p["wconv"], p["bconv"], pool, p["wfc"], p["bfc"])

    # Matches enc_output[:, :2H].contiguous().view(2, B, H) (row-major interleave).
    hidden = enc_out[:, :2 * HID].reshape(2, B, HID)
    cell = enc_out[:, 2 * HID:].reshape(2, B, HID)
    h0 = jnp.pad(hidden, ((0, 0), (0, B_PAD - B), (0, 0)))
    c0 = jnp.pad(cell, ((0, 0), (0, B_PAD - B), (0, 0)))

    tgt_oh = jax.nn.one_hot(tgt, VOCAB_PAD, dtype=jnp.float32)       # (T, B, 128)
    tgt_oh = jnp.pad(tgt_oh, ((0, 0), (0, B_PAD - B), (0, 0)))       # (T, 8, 128)

    outputs_full = pl.pallas_call(
        fused_decoder_kernel,
        out_shape=jax.ShapeDtypeStruct((MAX_LEN, B_PAD, VOCAB_PAD), jnp.float32),
        in_specs=[VMEM, VMEM, VMEM, SMEM] + [VMEM] * 7,
        out_specs=VMEM,
    )(h0, c0, tgt_oh, tf_sel, p["dec_emb"],
      p["w0"], p["b0"], p["w1"], p["b1"], p["wout"], p["bout"])

    return outputs_full[:, :B, :VOCAB]                 # drop batch/lane padding


# --------------------------- parameters ------------------------------------
def init_params(key):
    ks = jax.random.split(key, 11)
    s = 0.1
    enc_emb = jax.random.normal(ks[0], (SRC_VOCAB, EMB), jnp.float32) * s
    wconv = jax.random.normal(ks[1], (K * EMB, C_OUT), jnp.float32) * s  # im2col layout
    bconv = jax.random.normal(ks[2], (1, C_OUT), jnp.float32) * s
    wfc = jax.random.normal(ks[3], (C_OUT, 4 * HID), jnp.float32) * s
    bfc = jax.random.normal(ks[4], (1, 4 * HID), jnp.float32) * s

    dec_emb = jax.random.normal(ks[5], (VOCAB, EMB), jnp.float32) * s
    dec_emb_pad = jnp.zeros((VOCAB_PAD, EMB), jnp.float32).at[:VOCAB].set(dec_emb)

    # LSTM weights pre-transposed to (in, 4*HID); [Wih; Whh] fused; b = b_ih + b_hh.
    wih0 = jax.random.normal(ks[6], (EMB, 4 * HID), jnp.float32) * s
    whh0 = jax.random.normal(ks[7], (HID, 4 * HID), jnp.float32) * s
    wih1 = jax.random.normal(ks[8], (HID, 4 * HID), jnp.float32) * s
    whh1 = jax.random.normal(ks[9], (HID, 4 * HID), jnp.float32) * s
    w0 = jnp.concatenate([wih0, whh0], axis=0)         # (EMB+HID, 4*HID)
    w1 = jnp.concatenate([wih1, whh1], axis=0)
    b0 = jnp.zeros((1, 4 * HID), jnp.float32)
    b1 = jnp.zeros((1, 4 * HID), jnp.float32)

    wout = jax.random.normal(ks[10], (HID, VOCAB), jnp.float32) * s
    wout_pad = jnp.zeros((HID, VOCAB_PAD), jnp.float32).at[:, :VOCAB].set(wout)
    # pad lanes get -inf bias so the in-kernel argmax never picks them
    bout_pad = jnp.full((1, VOCAB_PAD), NEG_INF, jnp.float32).at[:, :VOCAB].set(0.0)

    return {
        "enc_emb": enc_emb, "wconv": wconv, "bconv": bconv,
        "wfc": wfc, "bfc": bfc,
        "dec_emb": dec_emb_pad,
        "w0": w0, "b0": b0, "w1": w1, "b1": b1,
        "wout": wout_pad, "bout": bout_pad,
    }


def make_teacher_force_flags(teacher_forcing_ratio):
    # Replicates the host-side random.random() draws of the PyTorch forward;
    # flags[t] == 1 means the input of the step producing outputs[t] is tgt[t-1].
    flags = [0] * MAX_LEN
    flags[1] = 1                                            # step 1 always uses tgt[0]
    draws = [random.random() < teacher_forcing_ratio for _ in range(MAX_LEN - 1)]
    for t in range(2, MAX_LEN):
        flags[t] = 1 if draws[t - 2] else 0                 # last draw unused (as in ref)
    return jnp.asarray(flags, dtype=jnp.int32)


# ------------------------------- main ---------------------------------------
if __name__ == "__main__":
    random.seed(0)  # deterministic teacher forcing decisions
    key = jax.random.PRNGKey(0)
    kp, ksrc, ktgt = jax.random.split(key, 3)

    params = init_params(kp)
    src = jax.random.randint(ksrc, (SRC_LEN, B), 0, SRC_VOCAB, dtype=jnp.int32)
    tgt = jax.random.randint(ktgt, (MAX_LEN, B), 0, VOCAB, dtype=jnp.int32)
    tf_sel = make_teacher_force_flags(0.5)

    fwd = jax.jit(seq2seq_conv_encoder_forward)
    outputs = jax.block_until_ready(fwd(src, tgt, tf_sel, params))

    assert outputs.shape == (MAX_LEN, B, VOCAB)
    assert bool(jnp.all(outputs[0] == 0.0))   # outputs[0] never written, as in PyTorch
    assert bool(jnp.all(jnp.isfinite(outputs)))
    print("KERNEL_OK")
</pallas_src>

<mosaic_0001>
module attributes {stable_mosaic.version = 11 : i64} {
  func.func @conv_encoder_kernel(%arg0: memref<64x96xf32, #tpu.memory_space<vmem>>, %arg1: memref<96x32xf32, #tpu.memory_space<vmem>>, %arg2: memref<1x32xf32, #tpu.memory_space<vmem>>, %arg3: memref<4x64xf32, #tpu.memory_space<vmem>>, %arg4: memref<32x128xf32, #tpu.memory_space<vmem>>, %arg5: memref<1x128xf32, #tpu.memory_space<vmem>>, %arg6: memref<4x128xf32, #tpu.memory_space<vmem>>) attributes {dimension_semantics = [], scalar_prefetch = 0 : i64, scratch_operands = 0 : i64, tpu.core_type = #tpu.core_type<tc>} {
    %c0 = arith.constant 0 : index
    %c0_0 = arith.constant 0 : index
    %0 = vector.load %arg0[%c0, %c0_0] : memref<64x96xf32, #tpu.memory_space<vmem>>, vector<64x96xf32>
    %c0_1 = arith.constant 0 : index
    %c0_2 = arith.constant 0 : index
    %1 = vector.load %arg1[%c0_1, %c0_2] : memref<96x32xf32, #tpu.memory_space<vmem>>, vector<96x32xf32>
    %cst = arith.constant dense<0.000000e+00> : vector<64x32xf32>
    %2 = tpu.matmul %0, %1, %cst {dimension_numbers = #tpu.dot_dimension_numbers<[1], [0], [0], [1], [0, 0, 1, 1], [], []>} : vector<64x96xf32>, vector<96x32xf32>, vector<64x32xf32> -> vector<64x32xf32>
    %c0_3 = arith.constant 0 : index
    %c0_4 = arith.constant 0 : index
    %3 = vector.load %arg2[%c0_3, %c0_4] : memref<1x32xf32, #tpu.memory_space<vmem>>, vector<1x32xf32>
    %4 = vector.broadcast %3 : vector<1x32xf32> to vector<64x32xf32>
    %5 = arith.addf %2, %4 : vector<64x32xf32>
    %cst_5 = arith.constant 0.000000e+00 : f32
    %6 = vector.broadcast %cst_5 : f32 to vector<64x32xf32>
    %7 = arith.maximumf %5, %6 : vector<64x32xf32>
    %c0_6 = arith.constant 0 : index
    %c0_7 = arith.constant 0 : index
    %8 = vector.load %arg3[%c0_6, %c0_7] : memref<4x64xf32, #tpu.memory_space<vmem>>, vector<4x64xf32>
    %cst_8 = arith.constant dense<0.000000e+00> : vector<4x32xf32>
    %9 = tpu.matmul %8, %7, %cst_8 {dimension_numbers = #tpu.dot_dimension_numbers<[1], [0], [0], [1], [0, 0, 1, 1], [], []>} : vector<4x64xf32>, vector<64x32xf32>, vector<4x32xf32> -> vector<4x32xf32>
    %c0_9 = arith.constant 0 : index
    %c0_10 = arith.constant 0 : index
    %10 = vector.load %arg4[%c0_9, %c0_10] : memref<32x128xf32, #tpu.memory_space<vmem>>, vector<32x128xf32>
    %cst_11 = arith.constant dense<0.000000e+00> : vector<4x128xf32>
    %11 = tpu.matmul %9, %10, %cst_11 {dimension_numbers = #tpu.dot_dimension_numbers<[1], [0], [0], [1], [0, 0, 1, 1], [], []>} : vector<4x32xf32>, vector<32x128xf32>, vector<4x128xf32> -> vector<4x128xf32>
    %c0_12 = arith.constant 0 : index
    %c0_13 = arith.constant 0 : index
    %12 = vector.load %arg5[%c0_12, %c0_13] : memref<1x128xf32, #tpu.memory_space<vmem>>, vector<1x128xf32>
    %13 = vector.broadcast %12 : vector<1x128xf32> to vector<4x128xf32>
    %14 = arith.addf %11, %13 : vector<4x128xf32>
    %c0_14 = arith.constant 0 : index
    %c0_15 = arith.constant 0 : index
    %15 = vector.load %arg6[%c0_14, %c0_15] : memref<4x128xf32, #tpu.memory_space<vmem>>, vector<4x128xf32>
    tpu.vector_store %arg6[%c0_14, %c0_15], %14 {strides = array<i32>} : memref<4x128xf32, #tpu.memory_space<vmem>>, vector<4x128xf32>,
    return
  }
}

module attributes {stable_mosaic.version = 11 : i64} {
  func.func @fused_decoder_kernel(%arg0: memref<2x8x32xf32, #tpu.memory_space<vmem>>, %arg1: memref<2x8x32xf32, #tpu.memory_space<vmem>>, %arg2: memref<8x8x128xf32, #tpu.memory_space<vmem>>, %arg3: memref<8xi32, #tpu.memory_space<smem>>, %arg4: memref<128x32xf32, #tpu.memory_space<vmem>>, %arg5: memref<64x128xf32, #tpu.memory_space<vmem>>, %arg6: memref<1x128xf32, #tpu.memory_space<vmem>>, %arg7: memref<64x128xf32, #tpu.memory_space<vmem>>, %arg8: memref<1x128xf32, #tpu.memory_space<vmem>>, %arg9: memref<32x128xf32, #tpu.memory_space<vmem>>, %arg10: memref<1x128xf32, #tpu.memory_space<vmem>>, %arg11: memref<8x8x128xf32, #tpu.memory_space<vmem>>) attributes {dimension_semantics = [], scalar_prefetch = 0 : i64, scratch_operands = 0 : i64, tpu.core_type = #tpu.core_type<tc>} {
    %cst = arith.constant 0.000000e+00 : f32
    %0 = vector.broadcast %cst : f32 to vector<8x8x128xf32>
    %c0 = arith.constant 0 : index
    %c0_0 = arith.constant 0 : index
    %c0_1 = arith.constant 0 : index
    %1 = vector.load %arg11[%c0, %c0_0, %c0_1] : memref<8x8x128xf32, #tpu.memory_space<vmem>>, vector<8x8x128xf32>
    tpu.vector_store %arg11[%c0, %c0_0, %c0_1], %0 {strides = array<i32>} : memref<8x8x128xf32, #tpu.memory_space<vmem>>, vector<8x8x128xf32>,
    %c0_2 = arith.constant 0 : index
    %c0_3 = arith.constant 0 : index
    %2 = vector.load %arg4[%c0_2, %c0_3] : memref<128x32xf32, #tpu.memory_space<vmem>>, vector<128x32xf32>
    %c0_4 = arith.constant 0 : index
    %c0_5 = arith.constant 0 : index
    %3 = vector.load %arg5[%c0_4, %c0_5] : memref<64x128xf32, #tpu.memory_space<vmem>>, vector<64x128xf32>
    %c0_6 = arith.constant 0 : index
    %c0_7 = arith.constant 0 : index
    %4 = vector.load %arg6[%c0_6, %c0_7] : memref<1x128xf32, #tpu.memory_space<vmem>>, vector<1x128xf32>
    %c0_8 = arith.constant 0 : index
    %c0_9 = arith.constant 0 : index
    %5 = vector.load %arg7[%c0_8, %c0_9] : memref<64x128xf32, #tpu.memory_space<vmem>>, vector<64x128xf32>
    %c0_10 = arith.constant 0 : index
    %c0_11 = arith.constant 0 : index
    %6 = vector.load %arg8[%c0_10, %c0_11] : memref<1x128xf32, #tpu.memory_space<vmem>>, vector<1x128xf32>
    %c0_12 = arith.constant 0 : index
    %c0_13 = arith.constant 0 : index
    %7 = vector.load %arg9[%c0_12, %c0_13] : memref<32x128xf32, #tpu.memory_space<vmem>>, vector<32x128xf32>
    %c0_14 = arith.constant 0 : index
    %c0_15 = arith.constant 0 : index
    %8 = vector.load %arg10[%c0_14, %c0_15] : memref<1x128xf32, #tpu.memory_space<vmem>>, vector<1x128xf32>
    %9 = tpu.iota {dimensions = array<i32: 1>} : vector<8x128xi32>
    %c0_16 = arith.constant 0 : index
    %c0_17 = arith.constant 0 : index
    %c0_18 = arith.constant 0 : index
    %10 = vector.load %arg0[%c0_16, %c0_17, %c0_18] : memref<2x8x32xf32, #tpu.memory_space<vmem>>, vector<1x8x32xf32>
    %11 = vector.shape_cast %10 : vector<1x8x32xf32> to vector<8x32xf32>
    %c1 = arith.constant 1 : index
    %c0_19 = arith.constant 0 : index
    %c0_20 = arith.constant 0 : index
    %12 = vector.load %arg0[%c1, %c0_19, %c0_20] : memref<2x8x32xf32, #tpu.memory_space<vmem>>, vector<1x8x32xf32>
    %13 = vector.shape_cast %12 : vector<1x8x32xf32> to vector<8x32xf32>
    %c0_21 = arith.constant 0 : index
    %c0_22 = arith.constant 0 : index
    %c0_23 = arith.constant 0 : index
    %14 = vector.load %arg1[%c0_21, %c0_22, %c0_23] : memref<2x8x32xf32, #tpu.memory_space<vmem>>, vector<1x8x32xf32>
    %15 = vector.shape_cast %14 : vector<1x8x32xf32> to vector<8x32xf32>
    %c1_24 = arith.constant 1 : index
    %c0_25 = arith.constant 0 : index
    %c0_26 = arith.constant 0 : index
    %16 = vector.load %arg1[%c1_24, %c0_25, %c0_26] : memref<2x8x32xf32, #tpu.memory_space<vmem>>, vector<1x8x32xf32>
    %17 = vector.shape_cast %16 : vector<1x8x32xf32> to vector<8x32xf32>
    %c0_27 = arith.constant 0 : index
    %c0_28 = arith.constant 0 : index
    %c0_29 = arith.constant 0 : index
    %18 = vector.load %arg2[%c0_27, %c0_28, %c0_29] : memref<8x8x128xf32, #tpu.memory_space<vmem>>, vector<1x8x128xf32>
    %19 = vector.shape_cast %18 : vector<1x8x128xf32> to vector<8x128xf32>
    %c1_30 = arith.constant 1 : index
    %20 = memref.load %arg3[%c1_30] : memref<8xi32, #tpu.memory_space<smem>>
    %c0_i32 = arith.constant 0 : i32
    %21 = arith.cmpi sgt, %20, %c0_i32 : i32
    %22 = arith.extui %21 : i1 to i32
    %23 = arith.sitofp %22 : i32 to f32
    %c0_31 = arith.constant 0 : index
    %c0_32 = arith.constant 0 : index
    %c0_33 = arith.constant 0 : index
    %24 = vector.load %arg2[%c0_31, %c0_32, %c0_33] : memref<8x8x128xf32, #tpu.memory_space<vmem>>, vector<1x8x128xf32>
    %25 = vector.shape_cast %24 : vector<1x8x128xf32> to vector<8x128xf32>
    %26 = vector.broadcast %23 : f32 to vector<8x128xf32>
    %27 = arith.mulf %26, %25 : vector<8x128xf32>
    %cst_34 = arith.constant 1.000000e+00 : f32
    %28 = arith.subf %cst_34, %23 : f32
    %29 = vector.broadcast %28 : f32 to vector<8x128xf32>
    %30 = arith.mulf %29, %19 : vector<8x128xf32>
    %31 = arith.addf %27, %30 : vector<8x128xf32>
    %cst_35 = arith.constant dense<0.000000e+00> : vector<8x32xf32>
    %32 = tpu.matmul %31, %2, %cst_35 {dimension_numbers = #tpu.dot_dimension_numbers<[1], [0], [0], [1], [0, 0, 1, 1], [], []>} : vector<8x128xf32>, vector<128x32xf32>, vector<8x32xf32> -> vector<8x32xf32>
    %33 = tpu.concatenate %32, %11 in 1 : vector<8x32xf32>, vector<8x32xf32> -> vector<8x64xf32>
    %cst_36 = arith.constant dense<0.000000e+00> : vector<8x128xf32>
    %34 = tpu.matmul %33, %3, %cst_36 {dimension_numbers = #tpu.dot_dimension_numbers<[1], [0], [0], [1], [0, 0, 1, 1], [], []>} : vector<8x64xf32>, vector<64x128xf32>, vector<8x128xf32> -> vector<8x128xf32>
    %35 = vector.broadcast %4 : vector<1x128xf32> to vector<8x128xf32>
    %36 = arith.addf %34, %35 : vector<8x128xf32>
    %37 = vector.extract_strided_slice %36 {offsets = [0, 0], sizes = [8, 32], strides = [1, 1]} : vector<8x128xf32> to vector<8x32xf32>
    %38 = arith.negf %37 : vector<8x32xf32>
    %39 = math.exp %38 : vector<8x32xf32>
    %cst_37 = arith.constant 1.000000e+00 : f32
    %40 = vector.broadcast %cst_37 : f32 to vector<8x32xf32>
    %41 = arith.addf %40, %39 : vector<8x32xf32>
    %42 = arith.divf %40, %41 : vector<8x32xf32>
    %43 = vector.extract_strided_slice %36 {offsets = [0, 32], sizes = [8, 32], strides = [1, 1]} : vector<8x128xf32> to vector<8x32xf32>
    %44 = arith.negf %43 : vector<8x32xf32>
    %45 = math.exp %44 : vector<8x32xf32>
    %cst_38 = arith.constant 1.000000e+00 : f32
    %46 = vector.broadcast %cst_38 : f32 to vector<8x32xf32>
    %47 = arith.addf %46, %45 : vector<8x32xf32>
    %48 = arith.divf %46, %47 : vector<8x32xf32>
    %49 = vector.extract_strided_slice %36 {offsets = [0, 64], sizes = [8, 32], strides = [1, 1]} : vector<8x128xf32> to vector<8x32xf32>
    %50 = math.tanh %49 : vector<8x32xf32>
    %51 = vector.extract_strided_slice %36 {offsets = [0, 96], sizes = [8, 32], strides = [1, 1]} : vector<8x128xf32> to vector<8x32xf32>
    %52 = arith.negf %51 : vector<8x32xf32>
    %53 = math.exp %52 : vector<8x32xf32>
    %cst_39 = arith.constant 1.000000e+00 : f32
    %54 = vector.broadcast %cst_39 : f32 to vector<8x32xf32>
    %55 = arith.addf %54, %53 : vector<8x32xf32>
    %56 = arith.divf %54, %55 : vector<8x32xf32>
    %57 = arith.mulf %48, %15 : vector<8x32xf32>
    %58 = arith.mulf %42, %50 : vector<8x32xf32>
    %59 = arith.addf %57, %58 : vector<8x32xf32>
    %60 = math.tanh %59 : vector<8x32xf32>
    %61 = arith.mulf %56, %60 : vector<8x32xf32>
    %62 = tpu.concatenate %61, %13 in 1 : vector<8x32xf32>, vector<8x32xf32> -> vector<8x64xf32>
    %cst_40 = arith.constant dense<0.000000e+00> : vector<8x128xf32>
    %63 = tpu.matmul %62, %5, %cst_40 {dimension_numbers = #tpu.dot_dimension_numbers<[1], [0], [0], [1], [0, 0, 1, 1], [], []>} : vector<8x64xf32>, vector<64x128xf32>, vector<8x128xf32> -> vector<8x128xf32>
    %64 = vector.broadcast %6 : vector<1x128xf32> to vector<8x128xf32>
    %65 = arith.addf %63, %64 : vector<8x128xf32>
    %66 = vector.extract_strided_slice %65 {offsets = [0, 0], sizes = [8, 32], strides = [1, 1]} : vector<8x128xf32> to vector<8x32xf32>
    %67 = arith.negf %66 : vector<8x32xf32>
    %68 = math.exp %67 : vector<8x32xf32>
    %cst_41 = arith.constant 1.000000e+00 : f32
    %69 = vector.broadcast %cst_41 : f32 to vector<8x32xf32>
    %70 = arith.addf %69, %68 : vector<8x32xf32>
    %71 = arith.divf %69, %70 : vector<8x32xf32>
    %72 = vector.extract_strided_slice %65 {offsets = [0, 32], sizes = [8, 32], strides = [1, 1]} : vector<8x128xf32> to vector<8x32xf32>
    %73 = arith.negf %72 : vector<8x32xf32>
    %74 = math.exp %73 : vector<8x32xf32>
    %cst_42 = arith.constant 1.000000e+00 : f32
    %75 = vector.broadcast %cst_42 : f32 to vector<8x32xf32>
    %76 = arith.addf %75, %74 : vector<8x32xf32>
    %77 = arith.divf %75, %76 : vector<8x32xf32>
    %78 = vector.extract_strided_slice %65 {offsets = [0, 64], sizes = [8, 32], strides = [1, 1]} : vector<8x128xf32> to vector<8x32xf32>
    %79 = math.tanh %78 : vector<8x32xf32>
    %80 = vector.extract_strided_slice %65 {offsets = [0, 96], sizes = [8, 32], strides = [1, 1]} : vector<8x128xf32> to vector<8x32xf32>
    %81 = arith.negf %80 : vector<8x32xf32>
    %82 = math.exp %81 : vector<8x32xf32>
    %cst_43 = arith.constant 1.000000e+00 : f32
    %83 = vector.broadcast %cst_43 : f32 to vector<8x32xf32>
    %84 = arith.addf %83, %82 : vector<8x32xf32>
    %85 = arith.divf %83, %84 : vector<8x32xf32>
    %86 = arith.mulf %77, %17 : vector<8x32xf32>
    %87 = arith.mulf %71, %79 : vector<8x32xf32>
    %88 = arith.addf %86, %87 : vector<8x32xf32>
    %89 = math.tanh %88 : vector<8x32xf32>
    %90 = arith.mulf %85, %89 : vector<8x32xf32>
    %cst_44 = arith.constant dense<0.000000e+00> : vector<8x128xf32>
    %91 = tpu.matmul %90, %7, %cst_44 {dimension_numbers = #tpu.dot_dimension_numbers<[1], [0], [0], [1], [0, 0, 1, 1], [], []>} : vector<8x32xf32>, vector<32x128xf32>, vector<8x128xf32> -> vector<8x128xf32>
    %92 = vector.broadcast %8 : vector<1x128xf32> to vector<8x128xf32>
    %93 = arith.addf %91, %92 : vector<8x128xf32>
    %c1_45 = arith.constant 1 : index
    %c0_46 = arith.constant 0 : index
    %c0_47 = arith.constant 0 : index
    %94 = vector.load %arg11[%c1_45, %c0_46, %c0_47] : memref<8x8x128xf32, #tpu.memory_space<vmem>>, vector<1x8x128xf32>
    %95 = vector.shape_cast %94 : vector<1x8x128xf32> to vector<8x128xf32>
    %96 = vector.shape_cast %93 : vector<8x128xf32> to vector<1x8x128xf32>
    tpu.vector_store %arg11[%c1_45, %c0_46, %c0_47], %96 {strides = array<i32>} : memref<8x8x128xf32, #tpu.memory_space<vmem>>, vector<1x8x128xf32>,
    %cst_48 = arith.constant dense<0xFF800000> : vector<8xf32>
    %97 = vector.multi_reduction <maximumf>, %93, %cst_48 [1] : vector<8x128xf32> to vector<8xf32>
    %98 = vector.shape_cast %97 : vector<8xf32> to vector<8x1xf32>
    %99 = vector.broadcast %98 : vector<8x1xf32> to vector<8x128xf32>
    %100 = arith.cmpf oeq, %93, %99 : vector<8x128xf32>
    %c128_i32 = arith.constant 128 : i32
    %101 = vector.broadcast %c128_i32 : i32 to vector<8x128xi32>
    %102 = arith.select %100, %9, %101 : vector<8x128xi1>, vector<8x128xi32>
    %cst_49 = arith.constant dense<2147483647> : vector<8xi32>
    %103 = vector.multi_reduction <minsi>, %102, %cst_49 [1] : vector<8x128xi32> to vector<8xi32>
    %104 = vector.shape_cast %103 : vector<8xi32> to vector<8x1xi32>
    %105 = vector.broadcast %104 : vector<8x1xi32> to vector<8x128xi32>
    %106 = arith.cmpi eq, %9, %105 : vector<8x128xi32>
    %107 = arith.extui %106 : vector<8x128xi1> to vector<8x128xi32>
    %108 = arith.sitofp %107 : vector<8x128xi32> to vector<8x128xf32>
    %c2 = arith.constant 2 : index
    %109 = memref.load %arg3[%c2] : memref<8xi32, #tpu.memory_space<smem>>
    %c0_i32_50 = arith.constant 0 : i32
    %110 = arith.cmpi sgt, %109, %c0_i32_50 : i32
    %111 = arith.extui %110 : i1 to i32
    %112 = arith.sitofp %111 : i32 to f32
    %c1_51 = arith.constant 1 : index
    %c0_52 = arith.constant 0 : index
    %c0_53 = arith.constant 0 : index
    %113 = vector.load %arg2[%c1_51, %c0_52, %c0_53] : memref<8x8x128xf32, #tpu.memory_space<vmem>>, vector<1x8x128xf32>
    %114 = vector.shape_cast %113 : vector<1x8x128xf32> to vector<8x128xf32>
    %115 = vector.broadcast %112 : f32 to vector<8x128xf32>
    %116 = arith.mulf %115, %114 : vector<8x128xf32>
    %cst_54 = arith.constant 1.000000e+00 : f32
    %117 = arith.subf %cst_54, %112 : f32
    %118 = vector.broadcast %117 : f32 to vector<8x128xf32>
    %119 = arith.mulf %118, %108 : vector<8x128xf32>
    %120 = arith.addf %116, %119 : vector<8x128xf32>
    %cst_55 = arith.constant dense<0.000000e+00> : vector<8x32xf32>
    %121 = tpu.matmul %120, %2, %cst_55 {dimension_numbers = #tpu.dot_dimension_numbers<[1], [0], [0], [1], [0, 0, 1, 1], [], []>} : vector<8x128xf32>, vector<128x32xf32>, vector<8x32xf32> -> vector<8x32xf32>
    %122 = tpu.concatenate %121, %61 in 1 : vector<8x32xf32>, vector<8x32xf32> -> vector<8x64xf32>
    %cst_56 = arith.constant dense<0.000000e+00> : vector<8x128xf32>
    %123 = tpu.matmul %122, %3, %cst_56 {dimension_numbers = #tpu.dot_dimension_numbers<[1], [0], [0], [1], [0, 0, 1, 1], [], []>} : vector<8x64xf32>, vector<64x128xf32>, vector<8x128xf32> -> vector<8x128xf32>
    %124 = vector.broadcast %4 : vector<1x128xf32> to vector<8x128xf32>
    %125 = arith.addf %123, %124 : vector<8x128xf32>
    %126 = vector.extract_strided_slice %125 {offsets = [0, 0], sizes = [8, 32], strides = [1, 1]} : vector<8x128xf32> to vector<8x32xf32>
    %127 = arith.negf %126 : vector<8x32xf32>
    %128 = math.exp %127 : vector<8x32xf32>
    %cst_57 = arith.constant 1.000000e+00 : f32
    %129 = vector.broadcast %cst_57 : f32 to vector<8x32xf32>
    %130 = arith.addf %129, %128 : vector<8x32xf32>
    %131 = arith.divf %129, %130 : vector<8x32xf32>
    %132 = vector.extract_strided_slice %125 {offsets = [0, 32], sizes = [8, 32], strides = [1, 1]} : vector<8x128xf32> to vector<8x32xf32>
    %133 = arith.negf %132 : vector<8x32xf32>
    %134 = math.exp %133 : vector<8x32xf32>
    %cst_58 = arith.constant 1.000000e+00 : f32
    %135 = vector.broadcast %cst_58 : f32 to vector<8x32xf32>
    %136 = arith.addf %135, %134 : vector<8x32xf32>
    %137 = arith.divf %135, %136 : vector<8x32xf32>
    %138 = vector.extract_strided_slice %125 {offsets = [0, 64], sizes = [8, 32], strides = [1, 1]} : vector<8x128xf32> to vector<8x32xf32>
    %139 = math.tanh %138 : vector<8x32xf32>
    %140 = vector.extract_strided_slice %125 {offsets = [0, 96], sizes = [8, 32], strides = [1, 1]} : vector<8x128xf32> to vector<8x32xf32>
    %141 = arith.negf %140 : vector<8x32xf32>
    %142 = math.exp %141 : vector<8x32xf32>
    %cst_59 = arith.constant 1.000000e+00 : f32
    %143 = vector.broadcast %cst_59 : f32 to vector<8x32xf32>
    %144 = arith.addf %143, %142 : vector<8x32xf32>
    %145 = arith.divf %143, %144 : vector<8x32xf32>
    %146 = arith.mulf %137, %59 : vector<8x32xf32>
    %147 = arith.mulf %131, %139 : vector<8x32xf32>
    %148 = arith.addf %146, %147 : vector<8x32xf32>
    %149 = math.tanh %148 : vector<8x32xf32>
    %150 = arith.mulf %145, %149 : vector<8x32xf32>
    %151 = tpu.concatenate %150, %90 in 1 : vector<8x32xf32>, vector<8x32xf32> -> vector<8x64xf32>
    %cst_60 = arith.constant dense<0.000000e+00> : vector<8x128xf32>
    %152 = tpu.matmul %151, %5, %cst_60 {dimension_numbers = #tpu.dot_dimension_numbers<[1], [0], [0], [1], [0, 0, 1, 1], [], []>} : vector<8x64xf32>, vector<64x128xf32>, vector<8x128xf32> -> vector<8x128xf32>
    %153 = vector.broadcast %6 : vector<1x128xf32> to vector<8x128xf32>
    %154 = arith.addf %152, %153 : vector<8x128xf32>
    %155 = vector.extract_strided_slice %154 {offsets = [0, 0], sizes = [8, 32], strides = [1, 1]} : vector<8x128xf32> to vector<8x32xf32>
    %156 = arith.negf %155 : vector<8x32xf32>
    %157 = math.exp %156 : vector<8x32xf32>
    %cst_61 = arith.constant 1.000000e+00 : f32
    %158 = vector.broadcast %cst_61 : f32 to vector<8x32xf32>
    %159 = arith.addf %158, %157 : vector<8x32xf32>
    %160 = arith.divf %158, %159 : vector<8x32xf32>
    %161 = vector.extract_strided_slice %154 {offsets = [0, 32], sizes = [8, 32], strides = [1, 1]} : vector<8x128xf32> to vector<8x32xf32>
    %162 = arith.negf %161 : vector<8x32xf32>
    %163 = math.exp %162 : vector<8x32xf32>
    %cst_62 = arith.constant 1.000000e+00 : f32
    %164 = vector.broadcast %cst_62 : f32 to vector<8x32xf32>
    %165 = arith.addf %164, %163 : vector<8x32xf32>
    %166 = arith.divf %164, %165 : vector<8x32xf32>
    %167 = vector.extract_strided_slice %154 {offsets = [0, 64], sizes = [8, 32], strides = [1, 1]} : vector<8x128xf32> to vector<8x32xf32>
    %168 = math.tanh %167 : vector<8x32xf32>
    %169 = vector.extract_strided_slice %154 {offsets = [0, 96], sizes = [8, 32], strides = [1, 1]} : vector<8x128xf32> to vector<8x32xf32>
    %170 = arith.negf %169 : vector<8x32xf32>
    %171 = math.exp %170 : vector<8x32xf32>
    %cst_63 = arith.constant 1.000000e+00 : f32
    %172 = vector.broadcast %cst_63 : f32 to vector<8x32xf32>
    %173 = arith.addf %172, %171 : vector<8x32xf32>
    %174 = arith.divf %172, %173 : vector<8x32xf32>
    %175 = arith.mulf %166, %88 : vector<8x32xf32>
    %176 = arith.mulf %160, %168 : vector<8x32xf32>
    %177 = arith.addf %175, %176 : vector<8x32xf32>
    %178 = math.tanh %177 : vector<8x32xf32>
    %179 = arith.mulf %174, %178 : vector<8x32xf32>
    %cst_64 = arith.constant dense<0.000000e+00> : vector<8x128xf32>
    %180 = tpu.matmul %179, %7, %cst_64 {dimension_numbers = #tpu.dot_dimension_numbers<[1], [0], [0], [1], [0, 0, 1, 1], [], []>} : vector<8x32xf32>, vector<32x128xf32>, vector<8x128xf32> -> vector<8x128xf32>
    %181 = vector.broadcast %8 : vector<1x128xf32> to vector<8x128xf32>
    %182 = arith.addf %180, %181 : vector<8x128xf32>
    %c2_65 = arith.constant 2 : index
    %c0_66 = arith.constant 0 : index
    %c0_67 = arith.constant 0 : index
    %183 = vector.load %arg11[%c2_65, %c0_66, %c0_67] : memref<8x8x128xf32, #tpu.memory_space<vmem>>, vector<1x8x128xf32>
    %184 = vector.shape_cast %183 : vector<1x8x128xf32> to vector<8x128xf32>
    %185 = vector.shape_cast %182 : vector<8x128xf32> to vector<1x8x128xf32>
    tpu.vector_store %arg11[%c2_65, %c0_66, %c0_67], %185 {strides = array<i32>} : memref<8x8x128xf32, #tpu.memory_space<vmem>>, vector<1x8x128xf32>,
    %cst_68 = arith.constant dense<0xFF800000> : vector<8xf32>
    %186 = vector.multi_reduction <maximumf>, %182, %cst_68 [1] : vector<8x128xf32> to vector<8xf32>
    %187 = vector.shape_cast %186 : vector<8xf32> to vector<8x1xf32>
    %188 = vector.broadcast %187 : vector<8x1xf32> to vector<8x128xf32>
    %189 = arith.cmpf oeq, %182, %188 : vector<8x128xf32>
    %c128_i32_69 = arith.constant 128 : i32
    %190 = vector.broadcast %c128_i32_69 : i32 to vector<8x128xi32>
    %191 = arith.select %189, %9, %190 : vector<8x128xi1>, vector<8x128xi32>
    %cst_70 = arith.constant dense<2147483647> : vector<8xi32>
    %192 = vector.multi_reduction <minsi>, %191, %cst_70 [1] : vector<8x128xi32> to vector<8xi32>
    %193 = vector.shape_cast %192 : vector<8xi32> to vector<8x1xi32>
    %194 = vector.broadcast %193 : vector<8x1xi32> to vector<8x128xi32>
    %195 = arith.cmpi eq, %9, %194 : vector<8x128xi32>
    %196 = arith.extui %195 : vector<8x128xi1> to vector<8x128xi32>
    %197 = arith.sitofp %196 : vector<8x128xi32> to vector<8x128xf32>
    %c3 = arith.constant 3 : index
    %198 = memref.load %arg3[%c3] : memref<8xi32, #tpu.memory_space<smem>>
    %c0_i32_71 = arith.constant 0 : i32
    %199 = arith.cmpi sgt, %198, %c0_i32_71 : i32
    %200 = arith.extui %199 : i1 to i32
    %201 = arith.sitofp %200 : i32 to f32
    %c2_72 = arith.constant 2 : index
    %c0_73 = arith.constant 0 : index
    %c0_74 = arith.constant 0 : index
    %202 = vector.load %arg2[%c2_72, %c0_73, %c0_74] : memref<8x8x128xf32, #tpu.memory_space<vmem>>, vector<1x8x128xf32>
    %203 = vector.shape_cast %202 : vector<1x8x128xf32> to vector<8x128xf32>
    %204 = vector.broadcast %201 : f32 to vector<8x128xf32>
    %205 = arith.mulf %204, %203 : vector<8x128xf32>
    %cst_75 = arith.constant 1.000000e+00 : f32
    %206 = arith.subf %cst_75, %201 : f32
    %207 = vector.broadcast %206 : f32 to vector<8x128xf32>
    %208 = arith.mulf %207, %197 : vector<8x128xf32>
    %209 = arith.addf %205, %208 : vector<8x128xf32>
    %cst_76 = arith.constant dense<0.000000e+00> : vector<8x32xf32>
    %210 = tpu.matmul %209, %2, %cst_76 {dimension_numbers = #tpu.dot_dimension_numbers<[1], [0], [0], [1], [0, 0, 1, 1], [], []>} : vector<8x128xf32>, vector<128x32xf32>, vector<8x32xf32> -> vector<8x32xf32>
    %211 = tpu.concatenate %210, %150 in 1 : vector<8x32xf32>, vector<8x32xf32> -> vector<8x64xf32>
    %cst_77 = arith.constant dense<0.000000e+00> : vector<8x128xf32>
    %212 = tpu.matmul %211, %3, %cst_77 {dimension_numbers = #tpu.dot_dimension_numbers<[1], [0], [0], [1], [0, 0, 1, 1], [], []>} : vector<8x64xf32>, vector<64x128xf32>, vector<8x128xf32> -> vector<8x128xf32>
    %213 = vector.broadcast %4 : vector<1x128xf32> to vector<8x128xf32>
    %214 = arith.addf %212, %213 : vector<8x128xf32>
    %215 = vector.extract_strided_slice %214 {offsets = [0, 0], sizes = [8, 32], strides = [1, 1]} : vector<8x128xf32> to vector<8x32xf32>
    %216 = arith.negf %215 : vector<8x32xf32>
    %217 = math.exp %216 : vector<8x32xf32>
    %cst_78 = arith.constant 1.000000e+00 : f32
    %218 = vector.broadcast %cst_78 : f32 to vector<8x32xf32>
    %219 = arith.addf %218, %217 : vector<8x32xf32>
    %220 = arith.divf %218, %219 : vector<8x32xf32>
    %221 = vector.extract_strided_slice %214 {offsets = [0, 32], sizes = [8, 32], strides = [1, 1]} : vector<8x128xf32> to vector<8x32xf32>
    %222 = arith.negf %221 : vector<8x32xf32>
    %223 = math.exp %222 : vector<8x32xf32>
    %cst_79 = arith.constant 1.000000e+00 : f32
    %224 = vector.broadcast %cst_79 : f32 to vector<8x32xf32>
    %225 = arith.addf %224, %223 : vector<8x32xf32>
    %226 = arith.divf %224, %225 : vector<8x32xf32>
    %227 = vector.extract_strided_slice %214 {offsets = [0, 64], sizes = [8, 32], strides = [1, 1]} : vector<8x128xf32> to vector<8x32xf32>
    %228 = math.tanh %227 : vector<8x32xf32>
    %229 = vector.extract_strided_slice %214 {offsets = [0, 96], sizes = [8, 32], strides = [1, 1]} : vector<8x128xf32> to vector<8x32xf32>
    %230 = arith.negf %229 : vector<8x32xf32>
    %231 = math.exp %230 : vector<8x32xf32>
    %cst_80 = arith.constant 1.000000e+00 : f32
    %232 = vector.broadcast %cst_80 : f32 to vector<8x32xf32>
    %233 = arith.addf %232, %231 : vector<8x32xf32>
    %234 = arith.divf %232, %233 : vector<8x32xf32>
    %235 = arith.mulf %226, %148 : vector<8x32xf32>
    %236 = arith.mulf %220, %228 : vector<8x32xf32>
    %237 = arith.addf %235, %236 : vector<8x32xf32>
    %238 = math.tanh %237 : vector<8x32xf32>
    %239 = arith.mulf %234, %238 : vector<8x32xf32>
    %240 = tpu.concatenate %239, %179 in 1 : vector<8x32xf32>, vector<8x32xf32> -> vector<8x64xf32>
    %cst_81 = arith.constant dense<0.000000e+00> : vector<8x128xf32>
    %241 = tpu.matmul %240, %5, %cst_81 {dimension_numbers = #tpu.dot_dimension_numbers<[1], [0], [0], [1], [0, 0, 1, 1], [], []>} : vector<8x64xf32>, vector<64x128xf32>, vector<8x128xf32> -> vector<8x128xf32>
    %242 = vector.broadcast %6 : vector<1x128xf32> to vector<8x128xf32>
    %243 = arith.addf %241, %242 : vector<8x128xf32>
    %244 = vector.extract_strided_slice %243 {offsets = [0, 0], sizes = [8, 32], strides = [1, 1]} : vector<8x128xf32> to vector<8x32xf32>
    %245 = arith.negf %244 : vector<8x32xf32>
    %246 = math.exp %245 : vector<8x32xf32>
    %cst_82 = arith.constant 1.000000e+00 : f32
    %247 = vector.broadcast %cst_82 : f32 to vector<8x32xf32>
    %248 = arith.addf %247, %246 : vector<8x32xf32>
    %249 = arith.divf %247, %248 : vector<8x32xf32>
    %250 = vector.extract_strided_slice %243 {offsets = [0, 32], sizes = [8, 32], strides = [1, 1]} : vector<8x128xf32> to vector<8x32xf32>
    %251 = arith.negf %250 : vector<8x32xf32>
    %252 = math.exp %251 : vector<8x32xf32>
    %cst_83 = arith.constant 1.000000e+00 : f32
    %253 = vector.broadcast %cst_83 : f32 to vector<8x32xf32>
    %254 = arith.addf %253, %252 : vector<8x32xf32>
    %255 = arith.divf %253, %254 : vector<8x32xf32>
    %256 = vector.extract_strided_slice %243 {offsets = [0, 64], sizes = [8, 32], strides = [1, 1]} : vector<8x128xf32> to vector<8x32xf32>
    %257 = math.tanh %256 : vector<8x32xf32>
    %258 = vector.extract_strided_slice %243 {offsets = [0, 96], sizes = [8, 32], strides = [1, 1]} : vector<8x128xf32> to vector<8x32xf32>
    %259 = arith.negf %258 : vector<8x32xf32>
    %260 = math.exp %259 : vector<8x32xf32>
    %cst_84 = arith.constant 1.000000e+00 : f32
    %261 = vector.broadcast %cst_84 : f32 to vector<8x32xf32>
    %262 = arith.addf %261, %260 : vector<8x32xf32>
    %263 = arith.divf %261, %262 : vector<8x32xf32>
    %264 = arith.mulf %255, %177 : vector<8x32xf32>
    %265 = arith.mulf %249, %257 : vector<8x32xf32>
    %266 = arith.addf %264, %265 : vector<8x32xf32>
    %267 = math.tanh %266 : vector<8x32xf32>
    %268 = arith.mulf %263, %267 : vector<8x32xf32>
    %cst_85 = arith.constant dense<0.000000e+00> : vector<8x128xf32>
    %269 = tpu.matmul %268, %7, %cst_85 {dimension_numbers = #tpu.dot_dimension_numbers<[1], [0], [0], [1], [0, 0, 1, 1], [], []>} : vector<8x32xf32>, vector<32x128xf32>, vector<8x128xf32> -> vector<8x128xf32>
    %270 = vector.broadcast %8 : vector<1x128xf32> to vector<8x128xf32>
    %271 = arith.addf %269, %270 : vector<8x128xf32>
    %c3_86 = arith.constant 3 : index
    %c0_87 = arith.constant 0 : index
    %c0_88 = arith.constant 0 : index
    %272 = vector.load %arg11[%c3_86, %c0_87, %c0_88] : memref<8x8x128xf32, #tpu.memory_space<vmem>>, vector<1x8x128xf32>
    %273 = vector.shape_cast %272 : vector<1x8x128xf32> to vector<8x128xf32>
    %274 = vector.shape_cast %271 : vector<8x128xf32> to vector<1x8x128xf32>
    tpu.vector_store %arg11[%c3_86, %c0_87, %c0_88], %274 {strides = array<i32>} : memref<8x8x128xf32, #tpu.memory_space<vmem>>, vector<1x8x128xf32>,
    %cst_89 = arith.constant dense<0xFF800000> : vector<8xf32>
    %275 = vector.multi_reduction <maximumf>, %271, %cst_89 [1] : vector<8x128xf32> to vector<8xf32>
    %276 = vector.shape_cast %275 : vector<8xf32> to vector<8x1xf32>
    %277 = vector.broadcast %276 : vector<8x1xf32> to vector<8x128xf32>
    %278 = arith.cmpf oeq, %271, %277 : vector<8x128xf32>
    %c128_i32_90 = arith.constant 128 : i32
    %279 = vector.broadcast %c128_i32_90 : i32 to vector<8x128xi32>
    %280 = arith.select %278, %9, %279 : vector<8x128xi1>, vector<8x128xi32>
    %cst_91 = arith.constant dense<2147483647> : vector<8xi32>
    %281 = vector.multi_reduction <minsi>, %280, %cst_91 [1] : vector<8x128xi32> to vector<8xi32>
    %282 = vector.shape_cast %281 : vector<8xi32> to vector<8x1xi32>
    %283 = vector.broadcast %282 : vector<8x1xi32> to vector<8x128xi32>
    %284 = arith.cmpi eq, %9, %283 : vector<8x128xi32>
    %285 = arith.extui %284 : vector<8x128xi1> to vector<8x128xi32>
    %286 = arith.sitofp %285 : vector<8x128xi32> to vector<8x128xf32>
    %c4 = arith.constant 4 : index
    %287 = memref.load %arg3[%c4] : memref<8xi32, #tpu.memory_space<smem>>
    %c0_i32_92 = arith.constant 0 : i32
    %288 = arith.cmpi sgt, %287, %c0_i32_92 : i32
    %289 = arith.extui %288 : i1 to i32
    %290 = arith.sitofp %289 : i32 to f32
    %c3_93 = arith.constant 3 : index
    %c0_94 = arith.constant 0 : index
    %c0_95 = arith.constant 0 : index
    %291 = vector.load %arg2[%c3_93, %c0_94, %c0_95] : memref<8x8x128xf32, #tpu.memory_space<vmem>>, vector<1x8x128xf32>
    %292 = vector.shape_cast %291 : vector<1x8x128xf32> to vector<8x128xf32>
    %293 = vector.broadcast %290 : f32 to vector<8x128xf32>
    %294 = arith.mulf %293, %292 : vector<8x128xf32>
    %cst_96 = arith.constant 1.000000e+00 : f32
    %295 = arith.subf %cst_96, %290 : f32
    %296 = vector.broadcast %295 : f32 to vector<8x128xf32>
    %297 = arith.mulf %296, %286 : vector<8x128xf32>
    %298 = arith.addf %294, %297 : vector<8x128xf32>
    %cst_97 = arith.constant dense<0.000000e+00> : vector<8x32xf32>
    %299 = tpu.matmul %298, %2, %cst_97 {dimension_numbers = #tpu.dot_dimension_numbers<[1], [0], [0], [1], [0, 0, 1, 1], [], []>} : vector<8x128xf32>, vector<128x32xf32>, vector<8x32xf32> -> vector<8x32xf32>
    %300 = tpu.concatenate %299, %239 in 1 : vector<8x32xf32>, vector<8x32xf32> -> vector<8x64xf32>
    %cst_98 = arith.constant dense<0.000000e+00> : vector<8x128xf32>
    %301 = tpu.matmul %300, %3, %cst_98 {dimension_numbers = #tpu.dot_dimension_numbers<[1], [0], [0], [1], [0, 0, 1, 1], [], []>} : vector<8x64xf32>, vector<64x128xf32>, vector<8x128xf32> -> vector<8x128xf32>
    %302 = vector.broadcast %4 : vector<1x128xf32> to vector<8x128xf32>
    %303 = arith.addf %301, %302 : vector<8x128xf32>
    %304 = vector.extract_strided_slice %303 {offsets = [0, 0], sizes = [8, 32], strides = [1, 1]} : vector<8x128xf32> to vector<8x32xf32>
    %305 = arith.negf %304 : vector<8x32xf32>
    %306 = math.exp %305 : vector<8x32xf32>
    %cst_99 = arith.constant 1.000000e+00 : f32
    %307 = vector.broadcast %cst_99 : f32 to vector<8x32xf32>
    %308 = arith.addf %307, %306 : vector<8x32xf32>
    %309 = arith.divf %307, %308 : vector<8x32xf32>
    %310 = vector.extract_strided_slice %303 {offsets = [0, 32], sizes = [8, 32], strides = [1, 1]} : vector<8x128xf32> to vector<8x32xf32>
    %311 = arith.negf %310 : vector<8x32xf32>
    %312 = math.exp %311 : vector<8x32xf32>
    %cst_100 = arith.constant 1.000000e+00 : f32
    %313 = vector.broadcast %cst_100 : f32 to vector<8x32xf32>
    %314 = arith.addf %313, %312 : vector<8x32xf32>
    %315 = arith.divf %313, %314 : vector<8x32xf32>
    %316 = vector.extract_strided_slice %303 {offsets = [0, 64], sizes = [8, 32], strides = [1, 1]} : vector<8x128xf32> to vector<8x32xf32>
    %317 = math.tanh %316 : vector<8x32xf32>
    %318 = vector.extract_strided_slice %303 {offsets = [0, 96], sizes = [8, 32], strides = [1, 1]} : vector<8x128xf32> to vector<8x32xf32>
    %319 = arith.negf %318 : vector<8x32xf32>
    %320 = math.exp %319 : vector<8x32xf32>
    %cst_101 = arith.constant 1.000000e+00 : f32
    %321 = vector.broadcast %cst_101 : f32 to vector<8x32xf32>
    %322 = arith.addf %321, %320 : vector<8x32xf32>
    %323 = arith.divf %321, %322 : vector<8x32xf32>
    %324 = arith.mulf %315, %237 : vector<8x32xf32>
    %325 = arith.mulf %309, %317 : vector<8x32xf32>
    %326 = arith.addf %324, %325 : vector<8x32xf32>
    %327 = math.tanh %326 : vector<8x32xf32>
    %328 = arith.mulf %323, %327 : vector<8x32xf32>
    %329 = tpu.concatenate %328, %268 in 1 : vector<8x32xf32>, vector<8x32xf32> -> vector<8x64xf32>
    %cst_102 = arith.constant dense<0.000000e+00> : vector<8x128xf32>
    %330 = tpu.matmul %329, %5, %cst_102 {dimension_numbers = #tpu.dot_dimension_numbers<[1], [0], [0], [1], [0, 0, 1, 1], [], []>} : vector<8x64xf32>, vector<64x128xf32>, vector<8x128xf32> -> vector<8x128xf32>
    %331 = vector.broadcast %6 : vector<1x128xf32> to vector<8x128xf32>
    %332 = arith.addf %330, %331 : vector<8x128xf32>
    %333 = vector.extract_strided_slice %332 {offsets = [0, 0], sizes = [8, 32], strides = [1, 1]} : vector<8x128xf32> to vector<8x32xf32>
    %334 = arith.negf %333 : vector<8x32xf32>
    %335 = math.exp %334 : vector<8x32xf32>
    %cst_103 = arith.constant 1.000000e+00 : f32
    %336 = vector.broadcast %cst_103 : f32 to vector<8x32xf32>
    %337 = arith.addf %336, %335 : vector<8x32xf32>
    %338 = arith.divf %336, %337 : vector<8x32xf32>
    %339 = vector.extract_strided_slice %332 {offsets = [0, 32], sizes = [8, 32], strides = [1, 1]} : vector<8x128xf32> to vector<8x32xf32>
    %340 = arith.negf %339 : vector<8x32xf32>
    %341 = math.exp %340 : vector<8x32xf32>
    %cst_104 = arith.constant 1.000000e+00 : f32
    %342 = vector.broadcast %cst_104 : f32 to vector<8x32xf32>
    %343 = arith.addf %342, %341 : vector<8x32xf32>
    %344 = arith.divf %342, %343 : vector<8x32xf32>
    %345 = vector.extract_strided_slice %332 {offsets = [0, 64], sizes = [8, 32], strides = [1, 1]} : vector<8x128xf32> to vector<8x32xf32>
    %346 = math.tanh %345 : vector<8x32xf32>
    %347 = vector.extract_strided_slice %332 {offsets = [0, 96], sizes = [8, 32], strides = [1, 1]} : vector<8x128xf32> to vector<8x32xf32>
    %348 = arith.negf %347 : vector<8x32xf32>
    %349 = math.exp %348 : vector<8x32xf32>
    %cst_105 = arith.constant 1.000000e+00 : f32
    %350 = vector.broadcast %cst_105 : f32 to vector<8x32xf32>
    %351 = arith.addf %350, %349 : vector<8x32xf32>
    %352 = arith.divf %350, %351 : vector<8x32xf32>
    %353 = arith.mulf %344, %266 : vector<8x32xf32>
    %354 = arith.mulf %338, %346 : vector<8x32xf32>
    %355 = arith.addf %353, %354 : vector<8x32xf32>
    %356 = math.tanh %355 : vector<8x32xf32>
    %357 = arith.mulf %352, %356 : vector<8x32xf32>
    %cst_106 = arith.constant dense<0.000000e+00> : vector<8x128xf32>
    %358 = tpu.matmul %357, %7, %cst_106 {dimension_numbers = #tpu.dot_dimension_numbers<[1], [0], [0], [1], [0, 0, 1, 1], [], []>} : vector<8x32xf32>, vector<32x128xf32>, vector<8x128xf32> -> vector<8x128xf32>
    %359 = vector.broadcast %8 : vector<1x128xf32> to vector<8x128xf32>
    %360 = arith.addf %358, %359 : vector<8x128xf32>
    %c4_107 = arith.constant 4 : index
    %c0_108 = arith.constant 0 : index
    %c0_109 = arith.constant 0 : index
    %361 = vector.load %arg11[%c4_107, %c0_108, %c0_109] : memref<8x8x128xf32, #tpu.memory_space<vmem>>, vector<1x8x128xf32>
    %362 = vector.shape_cast %361 : vector<1x8x128xf32> to vector<8x128xf32>
    %363 = vector.shape_cast %360 : vector<8x128xf32> to vector<1x8x128xf32>
    tpu.vector_store %arg11[%c4_107, %c0_108, %c0_109], %363 {strides = array<i32>} : memref<8x8x128xf32, #tpu.memory_space<vmem>>, vector<1x8x128xf32>,
    %cst_110 = arith.constant dense<0xFF800000> : vector<8xf32>
    %364 = vector.multi_reduction <maximumf>, %360, %cst_110 [1] : vector<8x128xf32> to vector<8xf32>
    %365 = vector.shape_cast %364 : vector<8xf32> to vector<8x1xf32>
    %366 = vector.broadcast %365 : vector<8x1xf32> to vector<8x128xf32>
    %367 = arith.cmpf oeq, %360, %366 : vector<8x128xf32>
    %c128_i32_111 = arith.constant 128 : i32
    %368 = vector.broadcast %c128_i32_111 : i32 to vector<8x128xi32>
    %369 = arith.select %367, %9, %368 : vector<8x128xi1>, vector<8x128xi32>
    %cst_112 = arith.constant dense<2147483647> : vector<8xi32>
    %370 = vector.multi_reduction <minsi>, %369, %cst_112 [1] : vector<8x128xi32> to vector<8xi32>
    %371 = vector.shape_cast %370 : vector<8xi32> to vector<8x1xi32>
    %372 = vector.broadcast %371 : vector<8x1xi32> to vector<8x128xi32>
    %373 = arith.cmpi eq, %9, %372 : vector<8x128xi32>
    %374 = arith.extui %373 : vector<8x128xi1> to vector<8x128xi32>
    %375 = arith.sitofp %374 : vector<8x128xi32> to vector<8x128xf32>
    %c5 = arith.constant 5 : index
    %376 = memref.load %arg3[%c5] : memref<8xi32, #tpu.memory_space<smem>>
    %c0_i32_113 = arith.constant 0 : i32
    %377 = arith.cmpi sgt, %376, %c0_i32_113 : i32
    %378 = arith.extui %377 : i1 to i32
    %379 = arith.sitofp %378 : i32 to f32
    %c4_114 = arith.constant 4 : index
    %c0_115 = arith.constant 0 : index
    %c0_116 = arith.constant 0 : index
    %380 = vector.load %arg2[%c4_114, %c0_115, %c0_116] : memref<8x8x128xf32, #tpu.memory_space<vmem>>, vector<1x8x128xf32>
    %381 = vector.shape_cast %380 : vector<1x8x128xf32> to vector<8x128xf32>
    %382 = vector.broadcast %379 : f32 to vector<8x128xf32>
    %383 = arith.mulf %382, %381 : vector<8x128xf32>
    %cst_117 = arith.constant 1.000000e+00 : f32
    %384 = arith.subf %cst_117, %379 : f32
    %385 = vector.broadcast %384 : f32 to vector<8x128xf32>
    %386 = arith.mulf %385, %375 : vector<8x128xf32>
    %387 = arith.addf %383, %386 : vector<8x128xf32>
    %cst_118 = arith.constant dense<0.000000e+00> : vector<8x32xf32>
    %388 = tpu.matmul %387, %2, %cst_118 {dimension_numbers = #tpu.dot_dimension_numbers<[1], [0], [0], [1], [0, 0, 1, 1], [], []>} : vector<8x128xf32>, vector<128x32xf32>, vector<8x32xf32> -> vector<8x32xf32>
    %389 = tpu.concatenate %388, %328 in 1 : vector<8x32xf32>, vector<8x32xf32> -> vector<8x64xf32>
    %cst_119 = arith.constant dense<0.000000e+00> : vector<8x128xf32>
    %390 = tpu.matmul %389, %3, %cst_119 {dimension_numbers = #tpu.dot_dimension_numbers<[1], [0], [0], [1], [0, 0, 1, 1], [], []>} : vector<8x64xf32>, vector<64x128xf32>, vector<8x128xf32> -> vector<8x128xf32>
    %391 = vector.broadcast %4 : vector<1x128xf32> to vector<8x128xf32>
    %392 = arith.addf %390, %391 : vector<8x128xf32>
    %393 = vector.extract_strided_slice %392 {offsets = [0, 0], sizes = [8, 32], strides = [1, 1]} : vector<8x128xf32> to vector<8x32xf32>
    %394 = arith.negf %393 : vector<8x32xf32>
    %395 = math.exp %394 : vector<8x32xf32>
    %cst_120 = arith.constant 1.000000e+00 : f32
    %396 = vector.broadcast %cst_120 : f32 to vector<8x32xf32>
    %397 = arith.addf %396, %395 : vector<8x32xf32>
    %398 = arith.divf %396, %397 : vector<8x32xf32>
    %399 = vector.extract_strided_slice %392 {offsets = [0, 32], sizes = [8, 32], strides = [1, 1]} : vector<8x128xf32> to vector<8x32xf32>
    %400 = arith.negf %399 : vector<8x32xf32>
    %401 = math.exp %400 : vector<8x32xf32>
    %cst_121 = arith.constant 1.000000e+00 : f32
    %402 = vector.broadcast %cst_121 : f32 to vector<8x32xf32>
    %403 = arith.addf %402, %401 : vector<8x32xf32>
    %404 = arith.divf %402, %403 : vector<8x32xf32>
    %405 = vector.extract_strided_slice %392 {offsets = [0, 64], sizes = [8, 32], strides = [1, 1]} : vector<8x128xf32> to vector<8x32xf32>
    %406 = math.tanh %405 : vector<8x32xf32>
    %407 = vector.extract_strided_slice %392 {offsets = [0, 96], sizes = [8, 32], strides = [1, 1]} : vector<8x128xf32> to vector<8x32xf32>
    %408 = arith.negf %407 : vector<8x32xf32>
    %409 = math.exp %408 : vector<8x32xf32>
    %cst_122 = arith.constant 1.000000e+00 : f32
    %410 = vector.broadcast %cst_122 : f32 to vector<8x32xf32>
    %411 = arith.addf %410, %409 : vector<8x32xf32>
    %412 = arith.divf %410, %411 : vector<8x32xf32>
    %413 = arith.mulf %404, %326 : vector<8x32xf32>
    %414 = arith.mulf %398, %406 : vector<8x32xf32>
    %415 = arith.addf %413, %414 : vector<8x32xf32>
    %416 = math.tanh %415 : vector<8x32xf32>
    %417 = arith.mulf %412, %416 : vector<8x32xf32>
    %418 = tpu.concatenate %417, %357 in 1 : vector<8x32xf32>, vector<8x32xf32> -> vector<8x64xf32>
    %cst_123 = arith.constant dense<0.000000e+00> : vector<8x128xf32>
    %419 = tpu.matmul %418, %5, %cst_123 {dimension_numbers = #tpu.dot_dimension_numbers<[1], [0], [0], [1], [0, 0, 1, 1], [], []>} : vector<8x64xf32>, vector<64x128xf32>, vector<8x128xf32> -> vector<8x128xf32>
    %420 = vector.broadcast %6 : vector<1x128xf32> to vector<8x128xf32>
    %421 = arith.addf %419, %420 : vector<8x128xf32>
    %422 = vector.extract_strided_slice %421 {offsets = [0, 0], sizes = [8, 32], strides = [1, 1]} : vector<8x128xf32> to vector<8x32xf32>
    %423 = arith.negf %422 : vector<8x32xf32>
    %424 = math.exp %423 : vector<8x32xf32>
    %cst_124 = arith.constant 1.000000e+00 : f32
    %425 = vector.broadcast %cst_124 : f32 to vector<8x32xf32>
    %426 = arith.addf %425, %424 : vector<8x32xf32>
    %427 = arith.divf %425, %426 : vector<8x32xf32>
    %428 = vector.extract_strided_slice %421 {offsets = [0, 32], sizes = [8, 32], strides = [1, 1]} : vector<8x128xf32> to vector<8x32xf32>
    %429 = arith.negf %428 : vector<8x32xf32>
    %430 = math.exp %429 : vector<8x32xf32>
    %cst_125 = arith.constant 1.000000e+00 : f32
    %431 = vector.broadcast %cst_125 : f32 to vector<8x32xf32>
    %432 = arith.addf %431, %430 : vector<8x32xf32>
    %433 = arith.divf %431, %432 : vector<8x32xf32>
    %434 = vector.extract_strided_slice %421 {offsets = [0, 64], sizes = [8, 32], strides = [1, 1]} : vector<8x128xf32> to vector<8x32xf32>
    %435 = math.tanh %434 : vector<8x32xf32>
    %436 = vector.extract_strided_slice %421 {offsets = [0, 96], sizes = [8, 32], strides = [1, 1]} : vector<8x128xf32> to vector<8x32xf32>
    %437 = arith.negf %436 : vector<8x32xf32>
    %438 = math.exp %437 : vector<8x32xf32>
    %cst_126 = arith.constant 1.000000e+00 : f32
    %439 = vector.broadcast %cst_126 : f32 to vector<8x32xf32>
    %440 = arith.addf %439, %438 : vector<8x32xf32>
    %441 = arith.divf %439, %440 : vector<8x32xf32>
    %442 = arith.mulf %433, %355 : vector<8x32xf32>
    %443 = arith.mulf %427, %435 : vector<8x32xf32>
    %444 = arith.addf %442, %443 : vector<8x32xf32>
    %445 = math.tanh %444 : vector<8x32xf32>
    %446 = arith.mulf %441, %445 : vector<8x32xf32>
    %cst_127 = arith.constant dense<0.000000e+00> : vector<8x128xf32>
    %447 = tpu.matmul %446, %7, %cst_127 {dimension_numbers = #tpu.dot_dimension_numbers<[1], [0], [0], [1], [0, 0, 1, 1], [], []>} : vector<8x32xf32>, vector<32x128xf32>, vector<8x128xf32> -> vector<8x128xf32>
    %448 = vector.broadcast %8 : vector<1x128xf32> to vector<8x128xf32>
    %449 = arith.addf %447, %448 : vector<8x128xf32>
    %c5_128 = arith.constant 5 : index
    %c0_129 = arith.constant 0 : index
    %c0_130 = arith.constant 0 : index
    %450 = vector.load %arg11[%c5_128, %c0_129, %c0_130] : memref<8x8x128xf32, #tpu.memory_space<vmem>>, vector<1x8x128xf32>
    %451 = vector.shape_cast %450 : vector<1x8x128xf32> to vector<8x128xf32>
    %452 = vector.shape_cast %449 : vector<8x128xf32> to vector<1x8x128xf32>
    tpu.vector_store %arg11[%c5_128, %c0_129, %c0_130], %452 {strides = array<i32>} : memref<8x8x128xf32, #tpu.memory_space<vmem>>, vector<1x8x128xf32>,
    %cst_131 = arith.constant dense<0xFF800000> : vector<8xf32>
    %453 = vector.multi_reduction <maximumf>, %449, %cst_131 [1] : vector<8x128xf32> to vector<8xf32>
    %454 = vector.shape_cast %453 : vector<8xf32> to vector<8x1xf32>
    %455 = vector.broadcast %454 : vector<8x1xf32> to vector<8x128xf32>
    %456 = arith.cmpf oeq, %449, %455 : vector<8x128xf32>
    %c128_i32_132 = arith.constant 128 : i32
    %457 = vector.broadcast %c128_i32_132 : i32 to vector<8x128xi32>
    %458 = arith.select %456, %9, %457 : vector<8x128xi1>, vector<8x128xi32>
    %cst_133 = arith.constant dense<2147483647> : vector<8xi32>
    %459 = vector.multi_reduction <minsi>, %458, %cst_133 [1] : vector<8x128xi32> to vector<8xi32>
    %460 = vector.shape_cast %459 : vector<8xi32> to vector<8x1xi32>
    %461 = vector.broadcast %460 : vector<8x1xi32> to vector<8x128xi32>
    %462 = arith.cmpi eq, %9, %461 : vector<8x128xi32>
    %463 = arith.extui %462 : vector<8x128xi1> to vector<8x128xi32>
    %464 = arith.sitofp %463 : vector<8x128xi32> to vector<8x128xf32>
    %c6 = arith.constant 6 : index
    %465 = memref.load %arg3[%c6] : memref<8xi32, #tpu.memory_space<smem>>
    %c0_i32_134 = arith.constant 0 : i32
    %466 = arith.cmpi sgt, %465, %c0_i32_134 : i32
    %467 = arith.extui %466 : i1 to i32
    %468 = arith.sitofp %467 : i32 to f32
    %c5_135 = arith.constant 5 : index
    %c0_136 = arith.constant 0 : index
    %c0_137 = arith.constant 0 : index
    %469 = vector.load %arg2[%c5_135, %c0_136, %c0_137] : memref<8x8x128xf32, #tpu.memory_space<vmem>>, vector<1x8x128xf32>
    %470 = vector.shape_cast %469 : vector<1x8x128xf32> to vector<8x128xf32>
    %471 = vector.broadcast %468 : f32 to vector<8x128xf32>
    %472 = arith.mulf %471, %470 : vector<8x128xf32>
    %cst_138 = arith.constant 1.000000e+00 : f32
    %473 = arith.subf %cst_138, %468 : f32
    %474 = vector.broadcast %473 : f32 to vector<8x128xf32>
    %475 = arith.mulf %474, %464 : vector<8x128xf32>
    %476 = arith.addf %472, %475 : vector<8x128xf32>
    %cst_139 = arith.constant dense<0.000000e+00> : vector<8x32xf32>
    %477 = tpu.matmul %476, %2, %cst_139 {dimension_numbers = #tpu.dot_dimension_numbers<[1], [0], [0], [1], [0, 0, 1, 1], [], []>} : vector<8x128xf32>, vector<128x32xf32>, vector<8x32xf32> -> vector<8x32xf32>
    %478 = tpu.concatenate %477, %417 in 1 : vector<8x32xf32>, vector<8x32xf32> -> vector<8x64xf32>
    %cst_140 = arith.constant dense<0.000000e+00> : vector<8x128xf32>
    %479 = tpu.matmul %478, %3, %cst_140 {dimension_numbers = #tpu.dot_dimension_numbers<[1], [0], [0], [1], [0, 0, 1, 1], [], []>} : vector<8x64xf32>, vector<64x128xf32>, vector<8x128xf32> -> vector<8x128xf32>
    %480 = vector.broadcast %4 : vector<1x128xf32> to vector<8x128xf32>
    %481 = arith.addf %479, %480 : vector<8x128xf32>
    %482 = vector.extract_strided_slice %481 {offsets = [0, 0], sizes = [8, 32], strides = [1, 1]} : vector<8x128xf32> to vector<8x32xf32>
    %483 = arith.negf %482 : vector<8x32xf32>
    %484 = math.exp %483 : vector<8x32xf32>
    %cst_141 = arith.constant 1.000000e+00 : f32
    %485 = vector.broadcast %cst_141 : f32 to vector<8x32xf32>
    %486 = arith.addf %485, %484 : vector<8x32xf32>
    %487 = arith.divf %485, %486 : vector<8x32xf32>
    %488 = vector.extract_strided_slice %481 {offsets = [0, 32], sizes = [8, 32], strides = [1, 1]} : vector<8x128xf32> to vector<8x32xf32>
    %489 = arith.negf %488 : vector<8x32xf32>
    %490 = math.exp %489 : vector<8x32xf32>
    %cst_142 = arith.constant 1.000000e+00 : f32
    %491 = vector.broadcast %cst_142 : f32 to vector<8x32xf32>
    %492 = arith.addf %491, %490 : vector<8x32xf32>
    %493 = arith.divf %491, %492 : vector<8x32xf32>
    %494 = vector.extract_strided_slice %481 {offsets = [0, 64], sizes = [8, 32], strides = [1, 1]} : vector<8x128xf32> to vector<8x32xf32>
    %495 = math.tanh %494 : vector<8x32xf32>
    %496 = vector.extract_strided_slice %481 {offsets = [0, 96], sizes = [8, 32], strides = [1, 1]} : vector<8x128xf32> to vector<8x32xf32>
    %497 = arith.negf %496 : vector<8x32xf32>
    %498 = math.exp %497 : vector<8x32xf32>
    %cst_143 = arith.constant 1.000000e+00 : f32
    %499 = vector.broadcast %cst_143 : f32 to vector<8x32xf32>
    %500 = arith.addf %499, %498 : vector<8x32xf32>
    %501 = arith.divf %499, %500 : vector<8x32xf32>
    %502 = arith.mulf %493, %415 : vector<8x32xf32>
    %503 = arith.mulf %487, %495 : vector<8x32xf32>
    %504 = arith.addf %502, %503 : vector<8x32xf32>
    %505 = math.tanh %504 : vector<8x32xf32>
    %506 = arith.mulf %501, %505 : vector<8x32xf32>
    %507 = tpu.concatenate %506, %446 in 1 : vector<8x32xf32>, vector<8x32xf32> -> vector<8x64xf32>
    %cst_144 = arith.constant dense<0.000000e+00> : vector<8x128xf32>
    %508 = tpu.matmul %507, %5, %cst_144 {dimension_numbers = #tpu.dot_dimension_numbers<[1], [0], [0], [1], [0, 0, 1, 1], [], []>} : vector<8x64xf32>, vector<64x128xf32>, vector<8x128xf32> -> vector<8x128xf32>
    %509 = vector.broadcast %6 : vector<1x128xf32> to vector<8x128xf32>
    %510 = arith.addf %508, %509 : vector<8x128xf32>
    %511 = vector.extract_strided_slice %510 {offsets = [0, 0], sizes = [8, 32], strides = [1, 1]} : vector<8x128xf32> to vector<8x32xf32>
    %512 = arith.negf %511 : vector<8x32xf32>
    %513 = math.exp %512 : vector<8x32xf32>
    %cst_145 = arith.constant 1.000000e+00 : f32
    %514 = vector.broadcast %cst_145 : f32 to vector<8x32xf32>
    %515 = arith.addf %514, %513 : vector<8x32xf32>
    %516 = arith.divf %514, %515 : vector<8x32xf32>
    %517 = vector.extract_strided_slice %510 {offsets = [0, 32], sizes = [8, 32], strides = [1, 1]} : vector<8x128xf32> to vector<8x32xf32>
    %518 = arith.negf %517 : vector<8x32xf32>
    %519 = math.exp %518 : vector<8x32xf32>
    %cst_146 = arith.constant 1.000000e+00 : f32
    %520 = vector.broadcast %cst_146 : f32 to vector<8x32xf32>
    %521 = arith.addf %520, %519 : vector<8x32xf32>
    %522 = arith.divf %520, %521 : vector<8x32xf32>
    %523 = vector.extract_strided_slice %510 {offsets = [0, 64], sizes = [8, 32], strides = [1, 1]} : vector<8x128xf32> to vector<8x32xf32>
    %524 = math.tanh %523 : vector<8x32xf32>
    %525 = vector.extract_strided_slice %510 {offsets = [0, 96], sizes = [8, 32], strides = [1, 1]} : vector<8x128xf32> to vector<8x32xf32>
    %526 = arith.negf %525 : vector<8x32xf32>
    %527 = math.exp %526 : vector<8x32xf32>
    %cst_147 = arith.constant 1.000000e+00 : f32
    %528 = vector.broadcast %cst_147 : f32 to vector<8x32xf32>
    %529 = arith.addf %528, %527 : vector<8x32xf32>
    %530 = arith.divf %528, %529 : vector<8x32xf32>
    %531 = arith.mulf %522, %444 : vector<8x32xf32>
    %532 = arith.mulf %516, %524 : vector<8x32xf32>
    %533 = arith.addf %531, %532 : vector<8x32xf32>
    %534 = math.tanh %533 : vector<8x32xf32>
    %535 = arith.mulf %530, %534 : vector<8x32xf32>
    %cst_148 = arith.constant dense<0.000000e+00> : vector<8x128xf32>
    %536 = tpu.matmul %535, %7, %cst_148 {dimension_numbers = #tpu.dot_dimension_numbers<[1], [0], [0], [1], [0, 0, 1, 1], [], []>} : vector<8x32xf32>, vector<32x128xf32>, vector<8x128xf32> -> vector<8x128xf32>
    %537 = vector.broadcast %8 : vector<1x128xf32> to vector<8x128xf32>
    %538 = arith.addf %536, %537 : vector<8x128xf32>
    %c6_149 = arith.constant 6 : index
    %c0_150 = arith.constant 0 : index
    %c0_151 = arith.constant 0 : index
    %539 = vector.load %arg11[%c6_149, %c0_150, %c0_151] : memref<8x8x128xf32, #tpu.memory_space<vmem>>, vector<1x8x128xf32>
    %540 = vector.shape_cast %539 : vector<1x8x128xf32> to vector<8x128xf32>
    %541 = vector.shape_cast %538 : vector<8x128xf32> to vector<1x8x128xf32>
    tpu.vector_store %arg11[%c6_149, %c0_150, %c0_151], %541 {strides = array<i32>} : memref<8x8x128xf32, #tpu.memory_space<vmem>>, vector<1x8x128xf32>,
    %cst_152 = arith.constant dense<0xFF800000> : vector<8xf32>
    %542 = vector.multi_reduction <maximumf>, %538, %cst_152 [1] : vector<8x128xf32> to vector<8xf32>
    %543 = vector.shape_cast %542 : vector<8xf32> to vector<8x1xf32>
    %544 = vector.broadcast %543 : vector<8x1xf32> to vector<8x128xf32>
    %545 = arith.cmpf oeq, %538, %544 : vector<8x128xf32>
    %c128_i32_153 = arith.constant 128 : i32
    %546 = vector.broadcast %c128_i32_153 : i32 to vector<8x128xi32>
    %547 = arith.select %545, %9, %546 : vector<8x128xi1>, vector<8x128xi32>
    %cst_154 = arith.constant dense<2147483647> : vector<8xi32>
    %548 = vector.multi_reduction <minsi>, %547, %cst_154 [1] : vector<8x128xi32> to vector<8xi32>
    %549 = vector.shape_cast %548 : vector<8xi32> to vector<8x1xi32>
    %550 = vector.broadcast %549 : vector<8x1xi32> to vector<8x128xi32>
    %551 = arith.cmpi eq, %9, %550 : vector<8x128xi32>
    %552 = arith.extui %551 : vector<8x128xi1> to vector<8x128xi32>
    %553 = arith.sitofp %552 : vector<8x128xi32> to vector<8x128xf32>
    %c7 = arith.constant 7 : index
    %554 = memref.load %arg3[%c7] : memref<8xi32, #tpu.memory_space<smem>>
    %c0_i32_155 = arith.constant 0 : i32
    %555 = arith.cmpi sgt, %554, %c0_i32_155 : i32
    %556 = arith.extui %555 : i1 to i32
    %557 = arith.sitofp %556 : i32 to f32
    %c6_156 = arith.constant 6 : index
    %c0_157 = arith.constant 0 : index
    %c0_158 = arith.constant 0 : index
    %558 = vector.load %arg2[%c6_156, %c0_157, %c0_158] : memref<8x8x128xf32, #tpu.memory_space<vmem>>, vector<1x8x128xf32>
    %559 = vector.shape_cast %558 : vector<1x8x128xf32> to vector<8x128xf32>
    %560 = vector.broadcast %557 : f32 to vector<8x128xf32>
    %561 = arith.mulf %560, %559 : vector<8x128xf32>
    %cst_159 = arith.constant 1.000000e+00 : f32
    %562 = arith.subf %cst_159, %557 : f32
    %563 = vector.broadcast %562 : f32 to vector<8x128xf32>
    %564 = arith.mulf %563, %553 : vector<8x128xf32>
    %565 = arith.addf %561, %564 : vector<8x128xf32>
    %cst_160 = arith.constant dense<0.000000e+00> : vector<8x32xf32>
    %566 = tpu.matmul %565, %2, %cst_160 {dimension_numbers = #tpu.dot_dimension_numbers<[1], [0], [0], [1], [0, 0, 1, 1], [], []>} : vector<8x128xf32>, vector<128x32xf32>, vector<8x32xf32> -> vector<8x32xf32>
    %567 = tpu.concatenate %566, %506 in 1 : vector<8x32xf32>, vector<8x32xf32> -> vector<8x64xf32>
    %cst_161 = arith.constant dense<0.000000e+00> : vector<8x128xf32>
    %568 = tpu.matmul %567, %3, %cst_161 {dimension_numbers = #tpu.dot_dimension_numbers<[1], [0], [0], [1], [0, 0, 1, 1], [], []>} : vector<8x64xf32>, vector<64x128xf32>, vector<8x128xf32> -> vector<8x128xf32>
    %569 = vector.broadcast %4 : vector<1x128xf32> to vector<8x128xf32>
    %570 = arith.addf %568, %569 : vector<8x128xf32>
    %571 = vector.extract_strided_slice %570 {offsets = [0, 0], sizes = [8, 32], strides = [1, 1]} : vector<8x128xf32> to vector<8x32xf32>
    %572 = arith.negf %571 : vector<8x32xf32>
    %573 = math.exp %572 : vector<8x32xf32>
    %cst_162 = arith.constant 1.000000e+00 : f32
    %574 = vector.broadcast %cst_162 : f32 to vector<8x32xf32>
    %575 = arith.addf %574, %573 : vector<8x32xf32>
    %576 = arith.divf %574, %575 : vector<8x32xf32>
    %577 = vector.extract_strided_slice %570 {offsets = [0, 32], sizes = [8, 32], strides = [1, 1]} : vector<8x128xf32> to vector<8x32xf32>
    %578 = arith.negf %577 : vector<8x32xf32>
    %579 = math.exp %578 : vector<8x32xf32>
    %cst_163 = arith.constant 1.000000e+00 : f32
    %580 = vector.broadcast %cst_163 : f32 to vector<8x32xf32>
    %581 = arith.addf %580, %579 : vector<8x32xf32>
    %582 = arith.divf %580, %581 : vector<8x32xf32>
    %583 = vector.extract_strided_slice %570 {offsets = [0, 64], sizes = [8, 32], strides = [1, 1]} : vector<8x128xf32> to vector<8x32xf32>
    %584 = math.tanh %583 : vector<8x32xf32>
    %585 = vector.extract_strided_slice %570 {offsets = [0, 96], sizes = [8, 32], strides = [1, 1]} : vector<8x128xf32> to vector<8x32xf32>
    %586 = arith.negf %585 : vector<8x32xf32>
    %587 = math.exp %586 : vector<8x32xf32>
    %cst_164 = arith.constant 1.000000e+00 : f32
    %588 = vector.broadcast %cst_164 : f32 to vector<8x32xf32>
    %589 = arith.addf %588, %587 : vector<8x32xf32>
    %590 = arith.divf %588, %589 : vector<8x32xf32>
    %591 = arith.mulf %582, %504 : vector<8x32xf32>
    %592 = arith.mulf %576, %584 : vector<8x32xf32>
    %593 = arith.addf %591, %592 : vector<8x32xf32>
    %594 = math.tanh %593 : vector<8x32xf32>
    %595 = arith.mulf %590, %594 : vector<8x32xf32>
    %596 = tpu.concatenate %595, %535 in 1 : vector<8x32xf32>, vector<8x32xf32> -> vector<8x64xf32>
    %cst_165 = arith.constant dense<0.000000e+00> : vector<8x128xf32>
    %597 = tpu.matmul %596, %5, %cst_165 {dimension_numbers = #tpu.dot_dimension_numbers<[1], [0], [0], [1], [0, 0, 1, 1], [], []>} : vector<8x64xf32>, vector<64x128xf32>, vector<8x128xf32> -> vector<8x128xf32>
    %598 = vector.broadcast %6 : vector<1x128xf32> to vector<8x128xf32>
    %599 = arith.addf %597, %598 : vector<8x128xf32>
    %600 = vector.extract_strided_slice %599 {offsets = [0, 0], sizes = [8, 32], strides = [1, 1]} : vector<8x128xf32> to vector<8x32xf32>
    %601 = arith.negf %600 : vector<8x32xf32>
    %602 = math.exp %601 : vector<8x32xf32>
    %cst_166 = arith.constant 1.000000e+00 : f32
    %603 = vector.broadcast %cst_166 : f32 to vector<8x32xf32>
    %604 = arith.addf %603, %602 : vector<8x32xf32>
    %605 = arith.divf %603, %604 : vector<8x32xf32>
    %606 = vector.extract_strided_slice %599 {offsets = [0, 32], sizes = [8, 32], strides = [1, 1]} : vector<8x128xf32> to vector<8x32xf32>
    %607 = arith.negf %606 : vector<8x32xf32>
    %608 = math.exp %607 : vector<8x32xf32>
    %cst_167 = arith.constant 1.000000e+00 : f32
    %609 = vector.broadcast %cst_167 : f32 to vector<8x32xf32>
    %610 = arith.addf %609, %608 : vector<8x32xf32>
    %611 = arith.divf %609, %610 : vector<8x32xf32>
    %612 = vector.extract_strided_slice %599 {offsets = [0, 64], sizes = [8, 32], strides = [1, 1]} : vector<8x128xf32> to vector<8x32xf32>
    %613 = math.tanh %612 : vector<8x32xf32>
    %614 = vector.extract_strided_slice %599 {offsets = [0, 96], sizes = [8, 32], strides = [1, 1]} : vector<8x128xf32> to vector<8x32xf32>
    %615 = arith.negf %614 : vector<8x32xf32>
    %616 = math.exp %615 : vector<8x32xf32>
    %cst_168 = arith.constant 1.000000e+00 : f32
    %617 = vector.broadcast %cst_168 : f32 to vector<8x32xf32>
    %618 = arith.addf %617, %616 : vector<8x32xf32>
    %619 = arith.divf %617, %618 : vector<8x32xf32>
    %620 = arith.mulf %611, %533 : vector<8x32xf32>
    %621 = arith.mulf %605, %613 : vector<8x32xf32>
    %622 = arith.addf %620, %621 : vector<8x32xf32>
    %623 = math.tanh %622 : vector<8x32xf32>
    %624 = arith.mulf %619, %623 : vector<8x32xf32>
    %cst_169 = arith.constant dense<0.000000e+00> : vector<8x128xf32>
    %625 = tpu.matmul %624, %7, %cst_169 {dimension_numbers = #tpu.dot_dimension_numbers<[1], [0], [0], [1], [0, 0, 1, 1], [], []>} : vector<8x32xf32>, vector<32x128xf32>, vector<8x128xf32> -> vector<8x128xf32>
    %626 = vector.broadcast %8 : vector<1x128xf32> to vector<8x128xf32>
    %627 = arith.addf %625, %626 : vector<8x128xf32>
    %c7_170 = arith.constant 7 : index
    %c0_171 = arith.constant 0 : index
    %c0_172 = arith.constant 0 : index
    %628 = vector.load %arg11[%c7_170, %c0_171, %c0_172] : memref<8x8x128xf32, #tpu.memory_space<vmem>>, vector<1x8x128xf32>
    %629 = vector.shape_cast %628 : vector<1x8x128xf32> to vector<8x128xf32>
    %630 = vector.shape_cast %627 : vector<8x128xf32> to vector<1x8x128xf32>
    tpu.vector_store %arg11[%c7_170, %c0_171, %c0_172], %630 {strides = array<i32>} : memref<8x8x128xf32, #tpu.memory_space<vmem>>, vector<1x8x128xf32>,
    return
  }
}

</mosaic_0001>

<bundles_post_ra>
// kernel: seq2seq_conv_encoder_forward.2
= control target key start
LH: loop header
LB: loop body
LE: loop exit
PB: predicated region body
PF: predicated region fallthrough
CT: control target
= control target key end

     0   :  { %vm50_vm0 = vcmask 785408   ;;  %v510_v26 = vmov 0.0|0.0   ;;  %vm511_vm1 = vmmov 0   ;;  %v512_v27 = vmov 0.0   ;;  %s642_s1 = inlined_call_operand.vmem [shape: f32[96,32], index: 1, kind: input, shape index: {}]   ;;  %s643_s0 = inlined_call_operand.vmem [shape: f32[64,96], index: 0, kind: input, shape index: {}]   ;;  %s644_s2 = inlined_call_operand.vmem [shape: f32[1,32], index: 2, kind: input, shape index: {}]   ;;  %s645_s4 = inlined_call_operand.vmem [shape: f32[32,128], index: 4, kind: input, shape index: {}]   ;;  %s646_s3 = inlined_call_operand.vmem [shape: f32[4,64], index: 3, kind: input, shape index: {}]   ;;  %s647_s5 = inlined_call_operand.vmem [shape: f32[1,128], index: 5, kind: input, shape index: {}]   ;;  %s648_s6 = inlined_call_operand.vmem [shape: f32[4,128], index: 6, kind: output, shape index: {}]  }
   0x1   :  { %v31_v0 = vld [vmem:[%s642_s1] sm:$0xff]  ;;  %v32_v1 = vld [vmem:[%s642_s1 + $0x8] sm:$0xff]  ;;  %v33_v2 = vld [vmem:[%s642_s1 + $0x10] sm:$0xff]  ;;  %489 = vmatprep.subr.bf16.mxu1 %v510_v26  ;;  %451 = vmatprep.mubr.msk.f32.mxu1 %vm511_vm1, %v512_v27  ;;  %vm189_vm2 = vcmask 523264   ;;  %vm274_vm3 = vcmask 261120  }
   0x2   :  { %v465_v3 = vpack.c.bf16 %v32_v1, %v31_v0  ;;  %v34_v4 = vld [vmem:[%s642_s1 + $0x18] sm:$0xff]  ;;  %v35_v6 = vld [vmem:[%s642_s1 + $0x20] sm:$0xff]  ;;  %v36_v7 = vld [vmem:[%s642_s1 + $0x28] sm:$0xff] }
   0x3   :  { %v469_v5 = vpack.c.bf16 %v34_v4, %v33_v2  ;;  %v23_v8 = vld [vmem:[%s643_s0] sm:$0xff]  ;;  %v473_v9 = vpack.c.bf16 %v36_v7, %v35_v6  ;;  %v37_v10 = vld [vmem:[%s642_s1 + $0x30] sm:$0xff]  ;;  %v38_v11 = vld [vmem:[%s642_s1 + $0x38] sm:$0xff] }
   0x4   :  { %466 = vmatprep.subr.bf16.mxu0 %v465_v3  ;;  %423 = vmatprep.mubr.msk.f32.mxu0 %vm50_vm0, %v23_v8  ;;  %v477_v12 = vpack.c.bf16 %v38_v11, %v37_v10  ;;  %v39_v13 = vld [vmem:[%s642_s1 + $0x40] sm:$0xff]  ;;  %v40_v14 = vld [vmem:[%s642_s1 + $0x48] sm:$0xff]  ;;  %v41_v16 = vld [vmem:[%s642_s1 + $0x50] sm:$0xff] }
   0x5   :  { %468 = vmatpush3.bf16.msra.mxu0 %v465_v3  ;;  %v481_v15 = vpack.c.bf16 %v40_v14, %v39_v13  ;;  %v42_v17 = vld [vmem:[%s642_s1 + $0x58] sm:$0xff]  ;;  %v24_v19 = vld [vmem:[%s643_s0 + $0x8] sm:$0xff]  ;;  %v25_v20 = vld [vmem:[%s643_s0 + $0x10] sm:$0xff] }
   0x6   :  { %470 = vmatprep.subr.bf16.mxu0 %v469_v5  ;;  %v485_v18 = vpack.c.bf16 %v42_v17, %v41_v16  ;;  %v26_v21 = vld [vmem:[%s643_s0 + $0x18] sm:$0xff]  ;;  %v27_v22 = vld [vmem:[%s643_s0 + $0x20] sm:$0xff]  ;;  %v28_v23 = vld [vmem:[%s643_s0 + $0x28] sm:$0xff] }
   0x7   :  { %v29_v24 = vld [vmem:[%s643_s0 + $0x30] sm:$0xff]  ;;  %v30_v25 = vld [vmem:[%s643_s0 + $0x38] sm:$0xff]  ;;  %v353_v28 = vld [vmem:[%s644_s2] ss:$0 sm:$0xff] }
   0x8   :  { %v263_v56 = vld [vmem:[%s645_s4] sm:$0xff]  ;;  %v264_v57 = vld [vmem:[%s645_s4 + $0x8] sm:$0xff]  ;;  %v265_v61 = vld [vmem:[%s645_s4 + $0x10] sm:$0xff] }
   0x9   :  { %472 = vmatpush3.bf16.msra.mxu0 %v469_v5  ;;  %v188_v59 = vld [vmem:[%s646_s3] sm:$0xf]  ;;  %v502_v60 = vpack.c.bf16 %v264_v57, %v263_v56  ;;  %v266_v62 = vld [vmem:[%s645_s4 + $0x18] sm:$0xff] }
   0xa   :  { %474 = vmatprep.subr.bf16.mxu0 %v473_v9  ;;  %v505_v63 = vpack.c.bf16 %v266_v62, %v265_v61  ;;  %v363_v2 = vld [vmem:[%s647_s5] ss:$0 sm:$0xff] }
   0xd   :  { %476 = vmatpush3.bf16.msra.mxu0 %v473_v9 }
   0xe   :  { %478 = vmatprep.subr.bf16.mxu0 %v477_v12 }
  0x11   :  { %480 = vmatpush3.bf16.msra.mxu0 %v477_v12 }
  0x12   :  { %482 = vmatprep.subr.bf16.mxu0 %v481_v15 }
  0x15   :  { %484 = vmatpush3.bf16.msra.mxu0 %v481_v15 }
  0x16   :  { %486 = vmatprep.subr.bf16.mxu0 %v485_v18 }
  0x19   :  { %488 = vmatpush3.bf16.msra.mxu0 %v485_v18 }
  0x1c   :  { %424 = vmatmul.mubr.msk.f32.vlgmr.msra.gmra.mrb[0].mxu0 %vm50_vm0, %v24_v19 }
  0x1d   :  { %426 = vmatprep.mubr.msk.f32.mxu0 %vm50_vm0, %v25_v20 }
  0x20   :  { %427 = vmatmul.mubr.msk.f32.gmra.mrb[2].mxu0 %vm50_vm0, %v26_v21 }
  0x21   :  { %429 = vmatprep.mubr.msk.f32.mxu0 %vm50_vm0, %v27_v22 }
  0x24   :  { %430 = vmatmul.mubr.msk.f32.gmra.mrb[4].mxu0 %vm50_vm0, %v28_v23 }
  0x25   :  { %432 = vmatprep.mubr.msk.f32.mxu0 %vm50_vm0, %v29_v24 }
  0x28   :  { %433 = vmatmul.mubr.msk.f32.gmra.mrb[6].mxu0 %vm50_vm0, %v30_v25 }
  0xef   :  { %v425_v29 = vpop.f32.mrb[0].mxu0 }
  0xf0   :  { %v147_v30 = vadd.f32 %v425_v29, %v353_v28  ;;  %v141_v31 = vpop.f32.mrb[1].mxu0 }
  0xf1   :  { %v142_v32 = vadd.f32 %v353_v28, %v141_v31 }
  0xf2   :  { %v181_v33 = vmax.f32 %v147_v30, 0.0 }
  0xf3   :  { %v180_v34 = vmax.f32 %v142_v32, 0.0  ;;  %v428_v35 = vpop.f32.mrb[2].mxu0 }
  0xf4   :  { %v157_v36 = vadd.f32 %v428_v35, %v353_v28  ;;  %v151_v37 = vpop.f32.mrb[3].mxu0 }
  0xf5   :  { %v152_v38 = vadd.f32 %v353_v28, %v151_v37  ;;  %v490_v39 = vpack.c.bf16 %v181_v33, %v180_v34 }
  0xf6   :  { %v183_v40 = vmax.f32 %v157_v36, 0.0 }
  0xf7   :  { %v182_v41 = vmax.f32 %v152_v38, 0.0  ;;  %v431_v42 = vpop.f32.mrb[4].mxu0  ;;  %491 = vmatpush3.bf16.msra.mxu1 %v490_v39 }
  0xf8   :  { %v167_v43 = vadd.f32 %v431_v42, %v353_v28  ;;  %v161_v44 = vpop.f32.mrb[5].mxu0  ;;  %492 = vmatprep.subr.bf16.mxu1 %v510_v26 }
  0xf9   :  { %v493_v45 = vpack.c.bf16 %v183_v40, %v182_v41  ;;  %v162_v46 = vadd.f32 %v353_v28, %v161_v44 }
  0xfa   :  { %v185_v47 = vmax.f32 %v167_v43, 0.0 }
  0xfb   :  { %v184_v48 = vmax.f32 %v162_v46, 0.0  ;;  %v434_v49 = vpop.f32.mrb[6].mxu0  ;;  %494 = vmatpush3.bf16.msra.mxu1 %v493_v45 }
  0xfc   :  { %v177_v50 = vadd.f32 %v434_v49, %v353_v28  ;;  %v171_v51 = vpop.f32.mrb[7].mxu0  ;;  %495 = vmatprep.subr.bf16.mxu1 %v510_v26 }
  0xfd   :  { %v496_v52 = vpack.c.bf16 %v185_v47, %v184_v48  ;;  %v172_v53 = vadd.f32 %v353_v28, %v171_v51 }
  0xfe   :  { %v187_v54 = vmax.f32 %v177_v50, 0.0 }
  0xff   :  { %v186_v55 = vmax.f32 %v172_v53, 0.0  ;;  %497 = vmatpush3.bf16.msra.mxu1 %v496_v52 }
 0x100   :  { %498 = vmatprep.subr.bf16.mxu1 %v510_v26 }
 0x101   :  { %v499_v58 = vpack.c.bf16 %v187_v54, %v186_v55 }
 0x103   :  { %500 = vmatpush3.bf16.msra.mxu1 %v499_v58 }
 0x104   :  { %501 = vmatprep.subr.bf16.mxu1 %v510_v26 }
 0x106   :  { %452 = vmatmul.mubr.msk.f32.vlgmr.msra.gmra.mrb[0].mxu1 %vm189_vm2, %v188_v59 }
 0x107   :  { %503 = vmatpush3.bf16.msra.mxu1 %v502_v60  ;;  %462 = vmatprep.mubr.msk.f32.mxu1 %vm511_vm1, %v512_v27 }
 0x108   :  { %504 = vmatprep.subr.bf16.mxu1 %v510_v26 }
 0x10b   :  { %506 = vmatpush3.bf16.msra.mxu1 %v505_v63 }
 0x1d9   :  { %v259_v0 = vpop.f32.mrb[0].mxu1 }
 0x1da   :  { %v453_v1 = vpop.f32.mrb[1].mxu1  ;;  %463 = vmatmul.mubr.msk.f32.vlgmr.msra.gmra.mrb[2].mxu1 %vm274_vm3, %v259_v0 }
 0x2ad   :  { %v344_v3 = vpop.f32.mrb[2].mxu1 }
 0x2ae   :  { %v345_v4 = vadd.f32 %v363_v2, %v344_v3  ;;  %v464_v5 = vpop.f32.mrb[3].mxu1 }
 0x2b0   :  { %348 = vst [vmem:[%s648_s6] sm:$0xf] %v345_v4 }

// kernel: seq2seq_conv_encoder_forward.3
= control target key start
LH: loop header
LB: loop body
LE: loop exit
PB: predicated region body
PF: predicated region fallthrough
CT: control target
= control target key end

     0   :  { %16 = vsyncpa [#allocation3], 0  ;;  %s5118_s0 = inlined_call_operand.vmem [shape: f32[2,8,32], index: 0, kind: input, shape index: {}]   ;;  %s5119_s1 = inlined_call_operand.vmem [shape: f32[2,8,32], index: 1, kind: input, shape index: {}]   ;;  %s5120_s2 = inlined_call_operand.vmem [shape: f32[8,8,128], index: 2, kind: input, shape index: {}]   ;;  %s5121_s3 = inlined_call_operand.vmem [shape: s32[8], index: 3, kind: input, shape index: {}]   ;;  %s5122_s4 = inlined_call_operand.vmem [shape: f32[128,32], index: 4, kind: input, shape index: {}]   ;;  %s5123_s5 = inlined_call_operand.vmem [shape: f32[64,128], index: 5, kind: input, shape index: {}]   ;;  %s5124_s6 = inlined_call_operand.vmem [shape: f32[1,128], index: 6, kind: input, shape index: {}]   ;;  %s5125_s7 = inlined_call_operand.vmem [shape: f32[64,128], index: 7, kind: input, shape index: {}]   ;;  %s5126_s8 = inlined_call_operand.vmem [shape: f32[1,128], index: 8, kind: input, shape index: {}]   ;;  %s5127_s9 = inlined_call_operand.vmem [shape: f32[32,128], index: 9, kind: input, shape index: {}]   ;;  %s5128_s10 = inlined_call_operand.vmem [shape: f32[1,128], index: 10, kind: input, shape index: {}]   ;;  %s5129_s11 = inlined_call_operand.vmem [shape: f32[8,8,128], index: 11, kind: output, shape index: {}]  }
   0x1   :  { %s29_s19 = sshll.u32 %s5121_s3, 4  ;;  %s30_s19 = int_to_ptr.vmem [resolvable:$true] %s29_s19 }
   0x2   :  { %s4255_s20 = scalar_lea.vmem %s30_s19, 16  ;;  %p4260_p1 = scmp.lt.s32.totalorder %s30_s19, %s30_s19 }
   0x3   :  { %p4256_p0 = scmp.ne.s32.totalorder %s30_s19, %s4255_s20  ;;  %p4261_p2 = scmp.lt.s32.totalorder %s4255_s20, %s4255_s20 }
   0x5   :  { %p4262_p3 = por %p4261_p2, %p4260_p1 }
   0x7   :  { %p4263_p4 = pnand %p4262_p3, %p4256_p0 }
   0x9   :  { %4266 = shalt.err (!%p4263_p4)
}
   0xa   :  { %s4269_s21 = smov [#allocation2]  }
   0xb   :  { %32 = dma.vmem_to_smem %s30_s19, 16, %s4269_s21, [#allocation3]  }
   0xc   :  { %4267 = dma.done.wait [#allocation3], 16  }
   0xd   :  { %4268 = vsyncadd [#allocation3], 4294967280 }
   0xe   :  { %50 = sfence }
   0xf   :  { %v59_v0 = vld [vmem:[%s5122_s4] sm:$0xff]  ;;  %v60_v1 = vld [vmem:[%s5122_s4 + $0x8] sm:$0xff]  ;;  %v61_v2 = vld [vmem:[%s5122_s4 + $0x10] sm:$0xff]  ;;  %v4270_v3 = vmov 0.0|0.0   ;;  %v4271_v6 = vmov 0.0   ;;  %vm4272_vm0 = vmmov 0  }
  0x10   :  { %3755 = vmatprep.subr.bf16.mxu0 %v4270_v3  ;;  %v4348_v4 = vpack.c.bf16 %v60_v1, %v59_v0  ;;  %v62_v5 = vld [vmem:[%s5122_s4 + $0x18] sm:$0xff]  ;;  %51 = vst [vmem:[%s5129_s11] sm:$0xff] %v4271_v6  ;;  %3199 = vmatprep.mubr.msk.f32.mxu0 %vm4272_vm0, %v4271_v6  ;;  %s2823_s12 = sld [smem:[#allocation2 + $0x1]]  ;;  %v63_v8 = vld [vmem:[%s5122_s4 + $0x20] sm:$0xff]  ;;  %v64_v9 = vld [vmem:[%s5122_s4 + $0x28] sm:$0xff]  ;;  %s4273_s19 = smov 32   ;;  %vm191_vm1 = vcmask 261120  }
  0x11   :  { %3779 = vmatprep.subr.bf16.mxu1 %v4270_v3  ;;  %3218 = vmatprep.mubr.msk.f32.mxu1 %vm4272_vm0, %v4271_v6  ;;  %v4363_v7 = vpack.c.bf16 %v62_v5, %v61_v2  ;;  %v100_v10 = vld [vmem:[%s5118_s0] sm:$0xff]  ;;  %v76_v12 = vld [vmem:[%s5123_s5 + $0x8] sm:$0xff]  ;;  %v77_v13 = vld [vmem:[%s5123_s5 + $0x10] sm:$0xff]  ;;  %v4386_v14 = vpack.c.bf16 %v64_v9, %v63_v8  ;;  %vm199_vm2 = vcmask 523264   ;;  %s4274_s25 = smov 64   ;;  %s2834_s15 = sld [smem:[#allocation2 + $0x2]] }
  0x12   :  { %3757 = vmatpush3.bf16.msra.mxu0 %v4348_v4  ;;  %188 = vrot.lane.b32.xlu0 %v100_v10, %s4273_s19  ;;  %v75_v11 = vld [vmem:[%s5123_s5] sm:$0xff]  ;;  %v78_v16 = vld [vmem:[%s5123_s5 + $0x18] sm:$0xff]  ;;  %v65_v17 = vld [vmem:[%s5122_s4 + $0x30] sm:$0xff]  ;;  %s2852_s28 = sld [smem:[#allocation2 + $0x4]] }
  0x13   :  { %3758 = vmatprep.subr.bf16.mxu0 %v4270_v3  ;;  %v4388_v15 = vpack.c.bf16 %v76_v12, %v75_v11  ;;  %v66_v18 = vld [vmem:[%s5122_s4 + $0x38] sm:$0xff]  ;;  %v4401_v19 = vpack.c.bf16 %v78_v16, %v77_v13  ;;  %v79_v20 = vld [vmem:[%s5123_s5 + $0x20] sm:$0xff]  ;;  %v80_v21 = vld [vmem:[%s5123_s5 + $0x28] sm:$0xff] }
  0x14   :  { %v4411_v22 = vpack.c.bf16 %v66_v18, %v65_v17  ;;  %v67_v23 = vld [vmem:[%s5122_s4 + $0x40] sm:$0xff]  ;;  %v68_v24 = vld [vmem:[%s5122_s4 + $0x48] sm:$0xff]  ;;  %v4423_v25 = vpack.c.bf16 %v80_v21, %v79_v20  ;;  %v81_v26 = vld [vmem:[%s5123_s5 + $0x30] sm:$0xff] }
  0x15   :  { %3781 = vmatpush3.bf16.msra.mxu1 %v4388_v15  ;;  %v82_v27 = vld [vmem:[%s5123_s5 + $0x38] sm:$0xff]  ;;  %v4433_v28 = vpack.c.bf16 %v68_v24, %v67_v23  ;;  %v69_v29 = vld [vmem:[%s5122_s4 + $0x50] sm:$0xff]  ;;  %v71_v33 = vld [vmem:[%s5122_s4 + $0x60] sm:$0xff] }
  0x16   :  { %3760 = vmatpush3.bf16.msra.mxu0 %v4363_v7  ;;  %p108_p5 = scmp.gt.s32.totalorder %s2823_s12, 0  ;;  %3782 = vmatprep.subr.bf16.mxu1 %v4270_v3  ;;  %v70_v30 = vld [vmem:[%s5122_s4 + $0x58] sm:$0xff]  ;;  %v4444_v31 = vpack.c.bf16 %v82_v27, %v81_v26  ;;  %v72_v34 = vld [vmem:[%s5122_s4 + $0x68] sm:$0xff]  ;;  %v106_v36 = vld [vmem:[%s5120_s2] sm:$0xff]  ;;  %s2879_s12 = sld [smem:[#allocation2 + $0x7]] }
  0x17   :  { %3761 = vmatprep.subr.bf16.mxu0 %v4270_v3  ;;  %v4448_v32 = vpack.c.bf16 %v70_v30, %v69_v29  ;;  %v4460_v35 = vpack.c.bf16 %v72_v34, %v71_v33  ;;  %v73_v39 = vld [vmem:[%s5122_s4 + $0x70] sm:$0xff]  ;;  %v74_v40 = vld [vmem:[%s5122_s4 + $0x78] sm:$0xff]  ;;  %v103_v45 = vld [vmem:[%s5119_s1] sm:$0xff]  ;;  %p522_p6 = scmp.gt.s32.totalorder %s2834_s15, 0 }
  0x18   :  { %s4413_s16 = scalar_select %p108_p5, 1, 0  ;;  %v4473_v43 = vpack.c.bf16 %v74_v40, %v73_v39  ;;  %281 = vrot.lane.b32.xlu1 %v103_v45, %s4273_s19  ;;  %v4491_v50 = vld [vmem:[%s5124_s6] ss:$0 sm:$0xff]  ;;  %v85_v2 = vld [vmem:[%s5125_s7 + $0x8] sm:$0xff]  ;;  %v86_v5 = vld [vmem:[%s5125_s7 + $0x10] sm:$0xff] }
  0x19   :  { %3784 = vmatpush3.bf16.msra.mxu1 %v4401_v19  ;;  %v84_v1 = vld [vmem:[%s5125_s7] sm:$0xff]  ;;  %v87_v9 = vld [vmem:[%s5125_s7 + $0x18] sm:$0xff]  ;;  %v89_v12 = vld [vmem:[%s5125_s7 + $0x28] sm:$0xff]  ;;  %p1294_p8 = scmp.gt.s32.totalorder %s2852_s28, 0 }
  0x1a   :  { %3763 = vmatpush3.bf16.msra.mxu0 %v4386_v14  ;;  %3785 = vmatprep.subr.bf16.mxu1 %v4270_v3  ;;  %s110_s3 = scvt.s32.f32 %s4413_s16  ;;  %v4508_v8 = vpack.c.bf16 %v85_v2, %v84_v1  ;;  %v4514_v10 = vpack.c.bf16 %v87_v9, %v86_v5  ;;  %v88_v11 = vld [vmem:[%s5125_s7 + $0x20] sm:$0xff]  ;;  %v90_v16 = vld [vmem:[%s5125_s7 + $0x30] sm:$0xff]  ;;  %v91_v17 = vld [vmem:[%s5125_s7 + $0x38] sm:$0xff]  ;;  %v98_v2 = vlaneseq  ;;  %s2843_s7 = sld [smem:[#allocation2 + $0x3]] }
  0x1b   :  { %3764 = vmatprep.subr.bf16.mxu0 %v4270_v3  ;;  %v4524_v13 = vpack.c.bf16 %v89_v12, %v88_v11  ;;  %v4535_v20 = vpack.c.bf16 %v91_v17, %v90_v16  ;;  %v2821_v21 = vld [vmem:[%s5118_s0 + $0x8] sm:$0xff]  ;;  %v4575_v33 = vld [vmem:[%s5126_s8] ss:$0 sm:$0xff]  ;;  %s523_s16 = scalar_select %p522_p6, 1, 0 }
  0x1c   :  { %s113_s5 = ssub.f32 1.0, %s110_s3  ;;  %v111_v37 = vstv %s110_s3  ;;  %v2822_v23 = vld [vmem:[%s5119_s1 + $0x8] sm:$0xff]  ;;  %v4628_v5 = vand.u32 127, %v98_v2  ;;  %p2452_p11 = scmp.gt.s32.totalorder %s2879_s12, 0 }
  0x1d   :  { %3787 = vmatpush3.bf16.msra.mxu1 %v4423_v25  ;;  %v112_v41 = vmul.f32 %v111_v37, %v106_v36  ;;  %s524_s17 = scvt.s32.f32 %s523_s16 }
  0x1e   :  { %3766 = vmatpush3.bf16.msra.mxu0 %v4411_v22  ;;  %3788 = vmatprep.subr.bf16.mxu1 %v4270_v3  ;;  %v114_v38 = vstv %s113_s5  ;;  %s1295_s29 = scalar_select %p1294_p8, 1, 0 }
  0x1f   :  { %3767 = vmatprep.subr.bf16.mxu0 %v4270_v3  ;;  %v115_v42 = vmul.f32 %v114_v38, %v106_v36  ;;  %s529_s18 = ssub.f32 1.0, %s524_s17 }
  0x20   :  { %p908_p7 = scmp.gt.s32.totalorder %s2843_s7, 0  ;;  %s1296_s5 = scvt.s32.f32 %s1295_s29 }
  0x21   :  { %3790 = vmatpush3.bf16.msra.mxu1 %v4444_v31  ;;  %v116_v44 = vadd.f32 %v115_v42, %v112_v41  ;;  %s2453_s13 = scalar_select %p2452_p11, 1, 0 }
  0x22   :  { %3769 = vmatpush3.bf16.msra.mxu0 %v4433_v28  ;;  %3791 = vmatprep.subr.bf16.mxu1 %v4270_v3  ;;  %s909_s4 = scalar_select %p908_p7, 1, 0 }
  0x23   :  { %3770 = vmatprep.subr.bf16.mxu0 %v4270_v3  ;;  %s1301_s30 = ssub.f32 1.0, %s1296_s5  ;;  %s2454_s14 = scvt.s32.f32 %s2453_s13 }
  0x24   :  { %s910_s0 = scvt.s32.f32 %s909_s4 }
  0x25   :  { %s2459_s15 = ssub.f32 1.0, %s2454_s14 }
  0x26   :  { %3772 = vmatpush3.bf16.msra.mxu0 %v4448_v32  ;;  %s915_s1 = ssub.f32 1.0, %s910_s0 }
  0x27   :  { %3773 = vmatprep.subr.bf16.mxu0 %v4270_v3 }
  0x2a   :  { %3775 = vmatpush3.bf16.msra.mxu0 %v4460_v35 }
  0x2b   :  { %3776 = vmatprep.subr.bf16.mxu0 %v4270_v3 }
  0x2e   :  { %3778 = vmatpush3.bf16.msra.mxu0 %v4473_v43 }
  0x2f   :  { %3803 = vmatprep.subr.bf16.mxu0 %v4270_v3 }
  0x31   :  { %3200 = vmatmul.mubr.f32.vlgmr.msra.gmra.mrb[0].mxu0 %v116_v44 }
  0x32   :  { %3248 = vmatprep.mubr.msk.f32.mxu0 %vm4272_vm0, %v4271_v6 }
  0x84   :  { %v189_v46 = vpop.permute.xlu0 %188 }
  0x8a   :  { %v282_v61 = vpop.permute.xlu1 %281 }
 0x104   :  { %v183_v47 = vpop.f32.mrb[0].mxu0 }
 0x105   :  { %v192_v48 = vsel %vm191_vm1, %v183_v47, %v189_v46  ;;  %v3201_v49 = vpop.f32.mrb[1].mxu0 }
 0x106   :  { %3219 = vmatmul.mubr.msk.f32.vlgmr.msra.gmra.mrb[0].mxu1 %vm199_vm2, %v192_v48 }
 0x107   :  { %3237 = vmatprep.mubr.msk.f32.mxu1 %vm4272_vm0, %v4271_v6  ;;  %3793 = vmatpush3.bf16.msra.mxu1 %v4508_v8 }
 0x108   :  { %3794 = vmatprep.subr.bf16.mxu1 %v4270_v3 }
 0x10b   :  { %3796 = vmatpush3.bf16.msra.mxu1 %v4514_v10 }
 0x10c   :  { %3797 = vmatprep.subr.bf16.mxu1 %v4270_v3 }
 0x10f   :  { %3799 = vmatpush3.bf16.msra.mxu1 %v4524_v13 }
 0x110   :  { %3800 = vmatprep.subr.bf16.mxu1 %v4270_v3 }
 0x113   :  { %3802 = vmatpush3.bf16.msra.mxu1 %v4535_v20 }
 0x114   :  { %3809 = vmatprep.subr.bf16.mxu1 %v4270_v3 }
 0x1d9   :  { %v269_v51 = vpop.f32.mrb[0].mxu1 }
 0x1da   :  { %v270_v52 = vadd.f32 %v4491_v50, %v269_v51  ;;  %v3220_v53 = vpop.f32.mrb[1].mxu1  ;;  %v93_v51 = vld [vmem:[%s5127_s9] sm:$0xff] }
 0x1db   :  { %v95_v53 = vld [vmem:[%s5127_s9 + $0x10] sm:$0xff] }
 0x1dc   :  { %4139 = vtanh.f32 %v270_v52  ;;  %v2826_v55 = vmul.f32 -1.442695, %v270_v52  ;;  %v94_v52 = vld [vmem:[%s5127_s9 + $0x8] sm:$0xff] }
 0x1de   :  { %4141 = vpow2.f32 %v2826_v55  ;;  %v96_v55 = vld [vmem:[%s5127_s9 + $0x18] sm:$0xff] }
 0x1e6   :  { %v4140_v54 = vpop.eup %4139 }
 0x1e7   :  { %286 = vrot.lane.b32.xlu0 %v4140_v54, %s4274_s25  ;;  %v4592_v54 = vpack.c.bf16 %v94_v52, %v93_v51 }
 0x1e8   :  { %v4142_v56 = vpop.eup %4141 }
 0x1e9   :  { %v276_v57 = vadd.f32 1.0, %v4142_v56  ;;  %3805 = vmatpush3.bf16.msra.mxu0 %v4592_v54  ;;  %v4598_v56 = vpack.c.bf16 %v96_v55, %v95_v53 }
 0x1ea   :  { %3806 = vmatprep.subr.bf16.mxu0 %v4270_v3 }
 0x1eb   :  { %4143 = vrcp.f32 %v276_v57 }
 0x1ed   :  { %3808 = vmatpush3.bf16.msra.mxu0 %v4598_v56 }
 0x1ee   :  { %3833 = vmatprep.subr.bf16.mxu0 %v4270_v3 }
 0x1f5   :  { %v4144_v58 = vpop.eup %4143 }
 0x1f6   :  { %v284_v62 = vmul.f32 %v4144_v58, %v282_v61  ;;  %v4622_v61 = vld [vmem:[%s5128_s10] ss:$0 sm:$0xff] }
 0x259   :  { %v287_v59 = vpop.permute.xlu0 %286 }
 0x25a   :  { %v289_v60 = vmul.f32 %v4144_v58, %v287_v59 }
 0x25c   :  { %291 = vrot.lane.b32.xlu1 %v289_v60, %s4273_s19 }
 0x2ce   :  { %v292_v63 = vpop.permute.xlu1 %291 }
 0x2cf   :  { %v4496_v0 = vadd.f32 %v292_v63, %v284_v62 }
 0x2d1   :  { %4145 = vtanh.f32 %v4496_v0 }
 0x2db   :  { %v4146_v18 = vpop.eup %4145 }
 0x2dc   :  { %297 = vrot.lane.b32.xlu0 %v4146_v18, %s4274_s25 }
 0x2e0   :  { %306 = vrot.lane.b32.xlu0 %v2821_v21, %s4273_s19 }
 0x2e4   :  { %397 = vrot.lane.b32.xlu0 %v2822_v23, %s4273_s19 }
 0x34e   :  { %v298_v24 = vpop.permute.xlu0 %297 }
 0x34f   :  { %v4548_v26 = vmul.f32 %v4144_v58, %v298_v24 }
 0x351   :  { %302 = vrot.lane.b32.xlu1 %v4548_v26, %s4273_s19 }
 0x352   :  { %v307_v27 = vpop.permute.xlu0 %306 }
 0x356   :  { %v398_v46 = vpop.permute.xlu0 %397 }
 0x3c3   :  { %v303_v29 = vpop.permute.xlu1 %302 }
 0x3c4   :  { %v309_v30 = vsel %vm191_vm1, %v303_v29, %v307_v27 }
 0x3c5   :  { %3238 = vmatmul.mubr.msk.f32.vlgmr.msra.gmra.mrb[2].mxu1 %vm199_vm2, %v309_v30 }
 0x3c6   :  { %3811 = vmatpush3.bf16.msra.mxu1 %v4348_v4  ;;  %3283 = vmatprep.mubr.msk.f32.mxu1 %vm4272_vm0, %v4271_v6 }
 0x3c7   :  { %3812 = vmatprep.subr.bf16.mxu1 %v4270_v3 }
 0x3ca   :  { %3814 = vmatpush3.bf16.msra.mxu1 %v4363_v7 }
 0x3cb   :  { %3815 = vmatprep.subr.bf16.mxu1 %v4270_v3 }
 0x3ce   :  { %3817 = vmatpush3.bf16.msra.mxu1 %v4386_v14 }
 0x3cf   :  { %3818 = vmatprep.subr.bf16.mxu1 %v4270_v3 }
 0x3d2   :  { %3820 = vmatpush3.bf16.msra.mxu1 %v4411_v22 }
 0x3d3   :  { %3821 = vmatprep.subr.bf16.mxu1 %v4270_v3 }
 0x3d6   :  { %3823 = vmatpush3.bf16.msra.mxu1 %v4433_v28 }
 0x3d7   :  { %3824 = vmatprep.subr.bf16.mxu1 %v4270_v3 }
 0x3da   :  { %3826 = vmatpush3.bf16.msra.mxu1 %v4448_v32 }
 0x3db   :  { %3827 = vmatprep.subr.bf16.mxu1 %v4270_v3 }
 0x3de   :  { %3829 = vmatpush3.bf16.msra.mxu1 %v4460_v35 }
 0x3df   :  { %3830 = vmatprep.subr.bf16.mxu1 %v4270_v3 }
 0x3e2   :  { %3832 = vmatpush3.bf16.msra.mxu1 %v4473_v43 }
 0x3e3   :  { %3857 = vmatprep.subr.bf16.mxu1 %v4270_v3 }
 0x498   :  { %v385_v34 = vpop.f32.mrb[2].mxu1 }
 0x499   :  { %v386_v36 = vadd.f32 %v4575_v33, %v385_v34  ;;  %v3239_v37 = vpop.f32.mrb[3].mxu1  ;;  %v2835_v34 = vld [vmem:[%s5120_s2 + $0x8] sm:$0xff] }
 0x49b   :  { %4147 = vtanh.f32 %v386_v36  ;;  %v2829_v39 = vmul.f32 -1.442695, %v386_v36  ;;  %v527_v36 = vstv %s524_s17  ;;  %s2861_s17 = sld [smem:[#allocation2 + $0x5]] }
 0x49d   :  { %4149 = vpow2.f32 %v2829_v39  ;;  %v528_v39 = vmul.f32 %v2835_v34, %v527_v36 }
 0x4a1   :  { %p1680_p9 = scmp.gt.s32.totalorder %s2861_s17, 0 }
 0x4a5   :  { %v4148_v38 = vpop.eup %4147 }
 0x4a6   :  { %402 = vrot.lane.b32.xlu1 %v4148_v38, %s4274_s25  ;;  %v530_v38 = vstv %s529_s18  ;;  %s1681_s18 = scalar_select %p1680_p9, 1, 0 }
 0x4a7   :  { %v4150_v40 = vpop.eup %4149 }
 0x4a8   :  { %v392_v41 = vadd.f32 1.0, %v4150_v40  ;;  %s1682_s20 = scvt.s32.f32 %s1681_s18 }
 0x4aa   :  { %4151 = vrcp.f32 %v392_v41  ;;  %s1687_s21 = ssub.f32 1.0, %s1682_s20 }
 0x4b4   :  { %v4152_v42 = vpop.eup %4151 }
 0x4b5   :  { %v400_v47 = vmul.f32 %v4152_v42, %v398_v46 }
 0x518   :  { %v403_v44 = vpop.permute.xlu1 %402 }
 0x519   :  { %v405_v45 = vmul.f32 %v4152_v42, %v403_v44 }
 0x51b   :  { %407 = vrot.lane.b32.xlu1 %v405_v45, %s4273_s19 }
 0x58d   :  { %v408_v48 = vpop.permute.xlu1 %407 }
 0x58e   :  { %v4580_v49 = vadd.f32 %v408_v48, %v400_v47 }
 0x590   :  { %4153 = vtanh.f32 %v4580_v49 }
 0x59a   :  { %v4154_v57 = vpop.eup %4153 }
 0x59b   :  { %413 = vrot.lane.b32.xlu0 %v4154_v57, %s4274_s25 }
 0x60d   :  { %v414_v58 = vpop.permute.xlu0 %413 }
 0x60e   :  { %v4604_v59 = vmul.f32 %v4152_v42, %v414_v58 }
 0x610   :  { %424 = vrot.lane.b32.xlu1 %v4604_v59, %s4273_s19 }
 0x682   :  { %v425_v60 = vpop.permute.xlu1 %424 }
 0x683   :  { %3249 = vmatmul.mubr.msk.f32.vlgmr.msra.gmra.mrb[2].mxu0 %vm191_vm1, %v425_v60 }
 0x684   :  { %3835 = vmatpush3.bf16.msra.mxu0 %v4388_v15  ;;  %3302 = vmatprep.mubr.msk.f32.mxu0 %vm4272_vm0, %v4271_v6 }
 0x685   :  { %3836 = vmatprep.subr.bf16.mxu0 %v4270_v3 }
 0x688   :  { %3838 = vmatpush3.bf16.msra.mxu0 %v4401_v19 }
 0x689   :  { %3839 = vmatprep.subr.bf16.mxu0 %v4270_v3 }
 0x68c   :  { %3841 = vmatpush3.bf16.msra.mxu0 %v4423_v25 }
 0x68d   :  { %3842 = vmatprep.subr.bf16.mxu0 %v4270_v3 }
 0x690   :  { %3844 = vmatpush3.bf16.msra.mxu0 %v4444_v31 }
 0x691   :  { %3845 = vmatprep.subr.bf16.mxu0 %v4270_v3 }
 0x756   :  { %v494_v62 = vpop.f32.mrb[2].mxu0 }
 0x757   :  { %v495_v63 = vadd.f32 %v4622_v61, %v494_v62  ;;  %v3250_v1 = vpop.f32.mrb[3].mxu0 }
 0x759   :  { %2832 = vst [vmem:[%s5129_s11 + $0x8] sm:$0xff] %v495_v63  ;;  %500 = vmax.xlane.f32.xlu0 %v495_v63 }
 0x7e6   :  { %v501_v9 = vpop.xlane.xlu0 %500 }
 0x7e7   :  { %vm502_vm3 = vcmp.eq.f32.partialorder %v495_v63, %v501_v9 }
 0x7e8   :  { %v503_v11 = vsel %vm502_vm3, %v4628_v5, 128 }
 0x7e9   :  { %v505_v12 = vshra.s32 %v503_v11, 16  ;;  %v504_v17 = vand.u32 65535, %v503_v11 }
 0x7eb   :  { %v507_v16 = vcvt.s32.f32 %v505_v12  ;;  %v506_v21 = vcvt.s32.f32 %v504_v17 }
 0x7ed   :  { %508 = vmin.xlane.f32.xlu1 %v507_v16 }
 0x87a   :  { %v509_v18 = vpop.xlane.xlu1 %508 }
 0x87b   :  { %vm510_vm4 = vcmp.eq.f32.partialorder %v507_v16, %v509_v18  ;;  %v515_v24 = vcvt.f32.s32 %v509_v18 }
 0x87c   :  { %v511_v23 = vsel %vm510_vm4, %v506_v21, inf }
 0x87d   :  { %512 = vmin.xlane.f32.xlu0 %v511_v23  ;;  %v516_v29 = vshll.u32 %v515_v24, 16 }
 0x893   :  { %603 = vrot.lane.b32.xlu0 %v4548_v26, %s4274_s25 }
 0x90a   :  { %v513_v27 = vpop.xlane.xlu0 %512 }
 0x90b   :  { %v514_v30 = vcvt.f32.s32 %v513_v27 }
 0x90d   :  { %v517_v37 = vadd.s32 %v516_v29, %v514_v30 }
 0x90e   :  { %v604_v42 = vpop.permute.xlu0 %603 }
 0x90f   :  { %vm518_vm5 = vcmp.eq.s32.totalorder %v4628_v5, %v517_v37 }
 0x910   :  { %v2833_v26 = vsel %vm518_vm5, 1.0, %v4271_v6 }
 0x911   :  { %v531_v40 = vmul.f32 %v2833_v26, %v530_v38 }
 0x913   :  { %v532_v41 = vadd.f32 %v531_v40, %v528_v39 }
 0x915   :  { %3284 = vmatmul.mubr.f32.vlgmr.msra.gmra.mrb[4].mxu1 %v532_v41 }
 0x916   :  { %3859 = vmatpush3.bf16.msra.mxu1 %v4592_v54  ;;  %3332 = vmatprep.mubr.msk.f32.mxu1 %vm4272_vm0, %v4271_v6 }
 0x917   :  { %3860 = vmatprep.subr.bf16.mxu1 %v4270_v3 }
 0x91a   :  { %3862 = vmatpush3.bf16.msra.mxu1 %v4598_v56 }
 0x91b   :  { %3887 = vmatprep.subr.bf16.mxu1 %v4270_v3 }
 0x9e8   :  { %v599_v44 = vpop.f32.mrb[4].mxu1 }
 0x9e9   :  { %v606_v45 = vsel %vm191_vm1, %v599_v44, %v604_v42  ;;  %v3285_v46 = vpop.f32.mrb[5].mxu1 }
 0x9ea   :  { %3303 = vmatmul.mubr.msk.f32.vlgmr.msra.gmra.mrb[4].mxu0 %vm199_vm2, %v606_v45 }
 0x9eb   :  { %3847 = vmatpush3.bf16.msra.mxu0 %v4508_v8  ;;  %3321 = vmatprep.mubr.msk.f32.mxu0 %vm4272_vm0, %v4271_v6 }
 0x9ec   :  { %3848 = vmatprep.subr.bf16.mxu0 %v4270_v3 }
 0x9ef   :  { %3850 = vmatpush3.bf16.msra.mxu0 %v4514_v10 }
 0x9f0   :  { %3851 = vmatprep.subr.bf16.mxu0 %v4270_v3 }
 0x9f3   :  { %3853 = vmatpush3.bf16.msra.mxu0 %v4524_v13 }
 0x9f4   :  { %3854 = vmatprep.subr.bf16.mxu0 %v4270_v3 }
 0x9f7   :  { %3856 = vmatpush3.bf16.msra.mxu0 %v4535_v20 }
 0x9f8   :  { %3863 = vmatprep.subr.bf16.mxu0 %v4270_v3 }
 0xabd   :  { %v676_v47 = vpop.f32.mrb[4].mxu0 }
 0xabe   :  { %v677_v48 = vadd.f32 %v4491_v50, %v676_v47  ;;  %v3304_v51 = vpop.f32.mrb[5].mxu0 }
 0xac0   :  { %4155 = vtanh.f32 %v677_v48  ;;  %v2837_v53 = vmul.f32 -1.442695, %v677_v48 }
 0xac2   :  { %4157 = vpow2.f32 %v2837_v53 }
 0xaca   :  { %v4156_v52 = vpop.eup %4155 }
 0xacb   :  { %689 = vrot.lane.b32.xlu1 %v4156_v52, %s4274_s25 }
 0xacc   :  { %v4158_v55 = vpop.eup %4157 }
 0xacd   :  { %v683_v57 = vadd.f32 1.0, %v4158_v55 }
 0xacf   :  { %4159 = vrcp.f32 %v683_v57 }
 0xad9   :  { %v4160_v58 = vpop.eup %4159 }
 0xada   :  { %v687_v63 = vmul.f32 %v4160_v58, %v4496_v0 }
 0xb3d   :  { %v690_v60 = vpop.permute.xlu1 %689 }
 0xb3e   :  { %v692_v62 = vmul.f32 %v4160_v58, %v690_v60 }
 0xb40   :  { %694 = vrot.lane.b32.xlu1 %v692_v62, %s4273_s19 }
 0xbb2   :  { %v695_v1 = vpop.permute.xlu1 %694 }
 0xbb3   :  { %v4660_v2 = vadd.f32 %v695_v1, %v687_v63  ;;  %v2844_v1 = vld [vmem:[%s5120_s2 + $0x10] sm:$0xff] }
 0xbb5   :  { %4161 = vtanh.f32 %v4660_v2 }
 0xbbf   :  { %v4162_v9 = vpop.eup %4161 }
 0xbc0   :  { %700 = vrot.lane.b32.xlu0 %v4162_v9, %s4274_s25  ;;  %v913_v9 = vstv %s910_s0 }
 0xbc4   :  { %708 = vrot.lane.b32.xlu0 %v4604_v59, %s4274_s25 }
 0xc32   :  { %v701_v11 = vpop.permute.xlu0 %700 }
 0xc33   :  { %v703_v12 = vmul.f32 %v4160_v58, %v701_v11 }
 0xc35   :  { %705 = vrot.lane.b32.xlu1 %v703_v12, %s4273_s19 }
 0xc36   :  { %v709_v16 = vpop.permute.xlu0 %708 }
 0xca7   :  { %v706_v17 = vpop.permute.xlu1 %705 }
 0xca8   :  { %v711_v18 = vsel %vm191_vm1, %v706_v17, %v709_v16  ;;  %v914_v16 = vmul.f32 %v2844_v1, %v913_v9 }
 0xca9   :  { %3322 = vmatmul.mubr.msk.f32.vlgmr.msra.gmra.mrb[6].mxu0 %vm199_vm2, %v711_v18 }
 0xcaa   :  { %3865 = vmatpush3.bf16.msra.mxu0 %v4348_v4  ;;  %3367 = vmatprep.mubr.msk.f32.mxu0 %vm4272_vm0, %v4271_v6 }
 0xcab   :  { %3866 = vmatprep.subr.bf16.mxu0 %v4270_v3 }
 0xcae   :  { %3868 = vmatpush3.bf16.msra.mxu0 %v4363_v7 }
 0xcaf   :  { %3869 = vmatprep.subr.bf16.mxu0 %v4270_v3 }
 0xcb2   :  { %3871 = vmatpush3.bf16.msra.mxu0 %v4386_v14 }
 0xcb3   :  { %3872 = vmatprep.subr.bf16.mxu0 %v4270_v3 }
 0xcb6   :  { %3874 = vmatpush3.bf16.msra.mxu0 %v4411_v22 }
 0xcb7   :  { %3875 = vmatprep.subr.bf16.mxu0 %v4270_v3 }
 0xcba   :  { %3877 = vmatpush3.bf16.msra.mxu0 %v4433_v28 }
 0xcbb   :  { %3878 = vmatprep.subr.bf16.mxu0 %v4270_v3 }
 0xcbe   :  { %3880 = vmatpush3.bf16.msra.mxu0 %v4448_v32 }
 0xcbf   :  { %3881 = vmatprep.subr.bf16.mxu0 %v4270_v3 }
 0xcc2   :  { %3883 = vmatpush3.bf16.msra.mxu0 %v4460_v35 }
 0xcc3   :  { %3884 = vmatprep.subr.bf16.mxu0 %v4270_v3 }
 0xcc6   :  { %3886 = vmatpush3.bf16.msra.mxu0 %v4473_v43 }
 0xcc7   :  { %3911 = vmatprep.subr.bf16.mxu0 %v4270_v3 }
 0xd7c   :  { %v781_v0 = vpop.f32.mrb[6].mxu0 }
 0xd7d   :  { %v782_v59 = vadd.f32 %v4575_v33, %v781_v0  ;;  %v3323_v21 = vpop.f32.mrb[7].mxu0 }
 0xd7f   :  { %4163 = vtanh.f32 %v782_v59  ;;  %v2839_v24 = vmul.f32 -1.442695, %v782_v59 }
 0xd81   :  { %4165 = vpow2.f32 %v2839_v24 }
 0xd89   :  { %v4164_v23 = vpop.eup %4163 }
 0xd8a   :  { %794 = vrot.lane.b32.xlu1 %v4164_v23, %s4274_s25 }
 0xd8b   :  { %v4166_v27 = vpop.eup %4165 }
 0xd8c   :  { %v788_v29 = vadd.f32 1.0, %v4166_v27 }
 0xd8e   :  { %4167 = vrcp.f32 %v788_v29 }
 0xd98   :  { %v4168_v30 = vpop.eup %4167 }
 0xd99   :  { %v792_v37 = vmul.f32 %v4168_v30, %v4580_v49 }
 0xdfc   :  { %v795_v34 = vpop.permute.xlu1 %794 }
 0xdfd   :  { %v797_v36 = vmul.f32 %v4168_v30, %v795_v34 }
 0xdff   :  { %799 = vrot.lane.b32.xlu0 %v797_v36, %s4273_s19 }
 0xe71   :  { %v800_v38 = vpop.permute.xlu0 %799 }
 0xe72   :  { %v4691_v39 = vadd.f32 %v800_v38, %v792_v37 }
 0xe74   :  { %4169 = vtanh.f32 %v4691_v39 }
 0xe7e   :  { %v4170_v26 = vpop.eup %4169 }
 0xe7f   :  { %805 = vrot.lane.b32.xlu1 %v4170_v26, %s4274_s25 }
 0xef1   :  { %v806_v40 = vpop.permute.xlu1 %805 }
 0xef2   :  { %v4695_v41 = vmul.f32 %v4168_v30, %v806_v40 }
 0xef4   :  { %810 = vrot.lane.b32.xlu0 %v4695_v41, %s4273_s19 }
 0xf66   :  { %v811_v42 = vpop.permute.xlu0 %810 }
 0xf67   :  { %3333 = vmatmul.mubr.msk.f32.vlgmr.msra.gmra.mrb[6].mxu1 %vm191_vm1, %v811_v42 }
 0xf68   :  { %3889 = vmatpush3.bf16.msra.mxu1 %v4388_v15  ;;  %3386 = vmatprep.mubr.msk.f32.mxu1 %vm4272_vm0, %v4271_v6 }
 0xf69   :  { %3890 = vmatprep.subr.bf16.mxu1 %v4270_v3 }
 0xf6c   :  { %3892 = vmatpush3.bf16.msra.mxu1 %v4401_v19 }
 0xf6d   :  { %3893 = vmatprep.subr.bf16.mxu1 %v4270_v3 }
 0xf70   :  { %3895 = vmatpush3.bf16.msra.mxu1 %v4423_v25 }
 0xf71   :  { %3896 = vmatprep.subr.bf16.mxu1 %v4270_v3 }
 0xf74   :  { %3898 = vmatpush3.bf16.msra.mxu1 %v4444_v31 }
 0xf75   :  { %3899 = vmatprep.subr.bf16.mxu1 %v4270_v3 }
0x103a   :  { %v880_v49 = vpop.f32.mrb[6].mxu1 }
0x103b   :  { %v881_v44 = vadd.f32 %v4622_v61, %v880_v49  ;;  %v3334_v45 = vpop.f32.mrb[7].mxu1 }
0x103d   :  { %2841 = vst [vmem:[%s5129_s11 + $0x10] sm:$0xff] %v881_v44  ;;  %886 = vmax.xlane.f32.xlu1 %v881_v44 }
0x104e   :  { %989 = vrot.lane.b32.xlu1 %v703_v12, %s4274_s25  ;;  %v916_v12 = vstv %s915_s1 }
0x10ca   :  { %v887_v46 = vpop.xlane.xlu1 %886 }
0x10cb   :  { %vm888_vm6 = vcmp.eq.f32.partialorder %v881_v44, %v887_v46 }
0x10cc   :  { %v889_v47 = vsel %vm888_vm6, %v4628_v5, 128 }
0x10cd   :  { %v891_v48 = vshra.s32 %v889_v47, 16  ;;  %v890_v52 = vand.u32 65535, %v889_v47 }
0x10ce   :  { %v990_v59 = vpop.permute.xlu1 %989 }
0x10cf   :  { %v893_v51 = vcvt.s32.f32 %v891_v48  ;;  %v892_v55 = vcvt.s32.f32 %v890_v52 }
0x10d1   :  { %894 = vmin.xlane.f32.xlu0 %v893_v51 }
0x115e   :  { %v895_v53 = vpop.xlane.xlu0 %894 }
0x115f   :  { %vm896_vm7 = vcmp.eq.f32.partialorder %v893_v51, %v895_v53  ;;  %v901_v58 = vcvt.f32.s32 %v895_v53 }
0x1160   :  { %v897_v57 = vsel %vm896_vm7, %v892_v55, inf }
0x1161   :  { %898 = vmin.xlane.f32.xlu0 %v897_v57  ;;  %v902_v62 = vshll.u32 %v901_v58, 16 }
0x11ee   :  { %v899_v60 = vpop.xlane.xlu0 %898 }
0x11ef   :  { %v900_v63 = vcvt.f32.s32 %v899_v60 }
0x11f1   :  { %v903_v11 = vadd.s32 %v902_v62, %v900_v63 }
0x11f3   :  { %vm904_vm8 = vcmp.eq.s32.totalorder %v4628_v5, %v903_v11 }
0x11f4   :  { %v2842_v17 = vsel %vm904_vm8, 1.0, %v4271_v6 }
0x11f5   :  { %v917_v18 = vmul.f32 %v2842_v17, %v916_v12 }
0x11f7   :  { %v918_v0 = vadd.f32 %v917_v18, %v914_v16 }
0x11f9   :  { %3368 = vmatmul.mubr.f32.vlgmr.msra.gmra.mrb[8].mxu0 %v918_v0 }
0x11fa   :  { %3913 = vmatpush3.bf16.msra.mxu0 %v4592_v54  ;;  %3416 = vmatprep.mubr.msk.f32.mxu0 %vm4272_vm0, %v4271_v6 }
0x11fb   :  { %3914 = vmatprep.subr.bf16.mxu0 %v4270_v3 }
0x11fe   :  { %3916 = vmatpush3.bf16.msra.mxu0 %v4598_v56 }
0x11ff   :  { %3941 = vmatprep.subr.bf16.mxu0 %v4270_v3 }
0x12cc   :  { %v985_v21 = vpop.f32.mrb[8].mxu0 }
0x12cd   :  { %v992_v23 = vsel %vm191_vm1, %v985_v21, %v990_v59  ;;  %v3369_v24 = vpop.f32.mrb[9].mxu0 }
0x12ce   :  { %3387 = vmatmul.mubr.msk.f32.vlgmr.msra.gmra.mrb[8].mxu1 %vm199_vm2, %v992_v23 }
0x12cf   :  { %3901 = vmatpush3.bf16.msra.mxu1 %v4508_v8  ;;  %3405 = vmatprep.mubr.msk.f32.mxu1 %vm4272_vm0, %v4271_v6 }
0x12d0   :  { %3902 = vmatprep.subr.bf16.mxu1 %v4270_v3 }
0x12d3   :  { %3904 = vmatpush3.bf16.msra.mxu1 %v4514_v10 }
0x12d4   :  { %3905 = vmatprep.subr.bf16.mxu1 %v4270_v3 }
0x12d7   :  { %3907 = vmatpush3.bf16.msra.mxu1 %v4524_v13 }
0x12d8   :  { %3908 = vmatprep.subr.bf16.mxu1 %v4270_v3 }
0x12db   :  { %3910 = vmatpush3.bf16.msra.mxu1 %v4535_v20 }
0x12dc   :  { %3917 = vmatprep.subr.bf16.mxu1 %v4270_v3 }
0x13a1   :  { %v1062_v27 = vpop.f32.mrb[8].mxu1 }
0x13a2   :  { %v1063_v29 = vadd.f32 %v4491_v50, %v1062_v27  ;;  %v3388_v30 = vpop.f32.mrb[9].mxu1 }
0x13a4   :  { %4171 = vtanh.f32 %v1063_v29  ;;  %v2846_v36 = vmul.f32 -1.442695, %v1063_v29 }
0x13a6   :  { %4173 = vpow2.f32 %v2846_v36 }
0x13ae   :  { %v4172_v34 = vpop.eup %4171 }
0x13af   :  { %1075 = vrot.lane.b32.xlu0 %v4172_v34, %s4274_s25 }
0x13b0   :  { %v4174_v37 = vpop.eup %4173 }
0x13b1   :  { %v1069_v38 = vadd.f32 1.0, %v4174_v37 }
0x13b3   :  { %4175 = vrcp.f32 %v1069_v38 }
0x13bd   :  { %v4176_v26 = vpop.eup %4175 }
0x13be   :  { %v1073_v49 = vmul.f32 %v4176_v26, %v4660_v2 }
0x1421   :  { %v1076_v40 = vpop.permute.xlu0 %1075 }
0x1422   :  { %v1078_v42 = vmul.f32 %v4176_v26, %v1076_v40 }
0x1424   :  { %1080 = vrot.lane.b32.xlu1 %v1078_v42, %s4273_s19 }
0x1496   :  { %v1081_v44 = vpop.permute.xlu1 %1080 }
0x1497   :  { %v4743_v45 = vadd.f32 %v1081_v44, %v1073_v49  ;;  %v2853_v49 = vld [vmem:[%s5120_s2 + $0x18] sm:$0xff]  ;;  %v1299_v44 = vstv %s1296_s5 }
0x1499   :  { %4177 = vtanh.f32 %v4743_v45 }
0x14a3   :  { %v4178_v46 = vpop.eup %4177 }
0x14a4   :  { %1086 = vrot.lane.b32.xlu1 %v4178_v46, %s4274_s25 }
0x14a8   :  { %1094 = vrot.lane.b32.xlu1 %v4695_v41, %s4274_s25 }
0x1516   :  { %v1087_v47 = vpop.permute.xlu1 %1086 }
0x1517   :  { %v4749_v48 = vmul.f32 %v4176_v26, %v1087_v47  ;;  %v1302_v47 = vstv %s1301_s30 }
0x1519   :  { %1091 = vrot.lane.b32.xlu0 %v4749_v48, %s4273_s19 }
0x151a   :  { %v1095_v51 = vpop.permute.xlu1 %1094 }
0x158b   :  { %v1092_v52 = vpop.permute.xlu0 %1091 }
0x158c   :  { %v1097_v2 = vsel %vm191_vm1, %v1092_v52, %v1095_v51  ;;  %v1300_v51 = vmul.f32 %v2853_v49, %v1299_v44 }
0x158d   :  { %3406 = vmatmul.mubr.msk.f32.vlgmr.msra.gmra.mrb[10].mxu1 %vm199_vm2, %v1097_v2 }
0x158e   :  { %3919 = vmatpush3.bf16.msra.mxu1 %v4348_v4  ;;  %3451 = vmatprep.mubr.msk.f32.mxu1 %vm4272_vm0, %v4271_v6 }
0x158f   :  { %3920 = vmatprep.subr.bf16.mxu1 %v4270_v3 }
0x1592   :  { %3922 = vmatpush3.bf16.msra.mxu1 %v4363_v7 }
0x1593   :  { %3923 = vmatprep.subr.bf16.mxu1 %v4270_v3 }
0x1596   :  { %3925 = vmatpush3.bf16.msra.mxu1 %v4386_v14 }
0x1597   :  { %3926 = vmatprep.subr.bf16.mxu1 %v4270_v3 }
0x159a   :  { %3928 = vmatpush3.bf16.msra.mxu1 %v4411_v22 }
0x159b   :  { %3929 = vmatprep.subr.bf16.mxu1 %v4270_v3 }
0x159e   :  { %3931 = vmatpush3.bf16.msra.mxu1 %v4433_v28 }
0x159f   :  { %3932 = vmatprep.subr.bf16.mxu1 %v4270_v3 }
0x15a2   :  { %3934 = vmatpush3.bf16.msra.mxu1 %v4448_v32 }
0x15a3   :  { %3935 = vmatprep.subr.bf16.mxu1 %v4270_v3 }
0x15a6   :  { %3937 = vmatpush3.bf16.msra.mxu1 %v4460_v35 }
0x15a7   :  { %3938 = vmatprep.subr.bf16.mxu1 %v4270_v3 }
0x15aa   :  { %3940 = vmatpush3.bf16.msra.mxu1 %v4473_v43 }
0x15ab   :  { %3965 = vmatprep.subr.bf16.mxu1 %v4270_v3 }
0x1660   :  { %v1167_v41 = vpop.f32.mrb[10].mxu1 }
0x1661   :  { %v1168_v53 = vadd.f32 %v4575_v33, %v1167_v41  ;;  %v3407_v55 = vpop.f32.mrb[11].mxu1 }
0x1663   :  { %4179 = vtanh.f32 %v1168_v53  ;;  %v2848_v58 = vmul.f32 -1.442695, %v1168_v53 }
0x1665   :  { %4181 = vpow2.f32 %v2848_v58 }
0x166d   :  { %v4180_v57 = vpop.eup %4179 }
0x166e   :  { %1180 = vrot.lane.b32.xlu0 %v4180_v57, %s4274_s25 }
0x166f   :  { %v4182_v60 = vpop.eup %4181 }
0x1670   :  { %v1174_v62 = vadd.f32 1.0, %v4182_v60 }
0x1672   :  { %4183 = vrcp.f32 %v1174_v62 }
0x167c   :  { %v4184_v63 = vpop.eup %4183 }
0x167d   :  { %v1178_v11 = vmul.f32 %v4184_v63, %v4691_v39 }
0x16e0   :  { %v1181_v1 = vpop.permute.xlu0 %1180 }
0x16e1   :  { %v1183_v9 = vmul.f32 %v4184_v63, %v1181_v1 }
0x16e3   :  { %1185 = vrot.lane.b32.xlu1 %v1183_v9, %s4273_s19 }
0x1755   :  { %v1186_v12 = vpop.permute.xlu1 %1185 }
0x1756   :  { %v4777_v16 = vadd.f32 %v1186_v12, %v1178_v11 }
0x1758   :  { %4185 = vtanh.f32 %v4777_v16 }
0x1762   :  { %v4186_v17 = vpop.eup %4185 }
0x1763   :  { %1191 = vrot.lane.b32.xlu0 %v4186_v17, %s4274_s25 }
0x17d5   :  { %v1192_v18 = vpop.permute.xlu0 %1191 }
0x17d6   :  { %v4781_v0 = vmul.f32 %v4184_v63, %v1192_v18 }
0x17d8   :  { %1196 = vrot.lane.b32.xlu1 %v4781_v0, %s4273_s19 }
0x184a   :  { %v1197_v59 = vpop.permute.xlu1 %1196 }
0x184b   :  { %3417 = vmatmul.mubr.msk.f32.vlgmr.msra.gmra.mrb[10].mxu0 %vm191_vm1, %v1197_v59 }
0x184c   :  { %3943 = vmatpush3.bf16.msra.mxu0 %v4388_v15  ;;  %3470 = vmatprep.mubr.msk.f32.mxu0 %vm4272_vm0, %v4271_v6 }
0x184d   :  { %3944 = vmatprep.subr.bf16.mxu0 %v4270_v3 }
0x1850   :  { %3946 = vmatpush3.bf16.msra.mxu0 %v4401_v19 }
0x1851   :  { %3947 = vmatprep.subr.bf16.mxu0 %v4270_v3 }
0x1854   :  { %3949 = vmatpush3.bf16.msra.mxu0 %v4423_v25 }
0x1855   :  { %3950 = vmatprep.subr.bf16.mxu0 %v4270_v3 }
0x1858   :  { %3952 = vmatpush3.bf16.msra.mxu0 %v4444_v31 }
0x1859   :  { %3953 = vmatprep.subr.bf16.mxu0 %v4270_v3 }
0x191e   :  { %v1266_v39 = vpop.f32.mrb[10].mxu0 }
0x191f   :  { %v1267_v21 = vadd.f32 %v4622_v61, %v1266_v39  ;;  %v3418_v23 = vpop.f32.mrb[11].mxu0 }
0x1921   :  { %2850 = vst [vmem:[%s5129_s11 + $0x18] sm:$0xff] %v1267_v21  ;;  %1272 = vmax.xlane.f32.xlu0 %v1267_v21 }
0x19ae   :  { %v1273_v6 = vpop.xlane.xlu0 %1272 }
0x19af   :  { %vm1274_vm9 = vcmp.eq.f32.partialorder %v1267_v21, %v1273_v6 }
0x19b0   :  { %v1275_v24 = vsel %vm1274_vm9, %v4628_v5, 128 }
0x19b1   :  { %v1277_v27 = vshra.s32 %v1275_v24, 16  ;;  %v1276_v30 = vand.u32 65535, %v1275_v24 }
0x19b3   :  { %v1279_v29 = vcvt.s32.f32 %v1277_v27  ;;  %v1278_v36 = vcvt.s32.f32 %v1276_v30 }
0x19b5   :  { %1280 = vmin.xlane.f32.xlu1 %v1279_v29 }
0x1a42   :  { %v1281_v34 = vpop.xlane.xlu1 %1280 }
0x1a43   :  { %vm1282_vm10 = vcmp.eq.f32.partialorder %v1279_v29, %v1281_v34  ;;  %v1287_v38 = vcvt.f32.s32 %v1281_v34 }
0x1a44   :  { %v1283_v37 = vsel %vm1282_vm10, %v1278_v36, inf }
0x1a45   :  { %1284 = vmin.xlane.f32.xlu0 %v1283_v37  ;;  %v1288_v40 = vshll.u32 %v1287_v38, 16 }
0x1a5b   :  { %1375 = vrot.lane.b32.xlu0 %v4749_v48, %s4274_s25  ;;  %v4810_v48 = vld [vmem:[%s5129_s11] sm:$0xff] }
0x1ad2   :  { %v1285_v26 = vpop.xlane.xlu0 %1284 }
0x1ad3   :  { %v1286_v42 = vcvt.f32.s32 %v1285_v26 }
0x1ad5   :  { %v1289_v46 = vadd.s32 %v1288_v40, %v1286_v42 }
0x1ad6   :  { %v1376_v53 = vpop.permute.xlu0 %1375 }
0x1ad7   :  { %vm1290_vm11 = vcmp.eq.s32.totalorder %v4628_v5, %v1289_v46 }
0x1ad8   :  { %v2851_v52 = vsel %vm1290_vm11, 1.0, %v4810_v48 }
0x1ad9   :  { %v1303_v2 = vmul.f32 %v2851_v52, %v1302_v47 }
0x1adb   :  { %v1304_v41 = vadd.f32 %v1303_v2, %v1300_v51 }
0x1add   :  { %3452 = vmatmul.mubr.f32.vlgmr.msra.gmra.mrb[12].mxu1 %v1304_v41 }
0x1ade   :  { %3967 = vmatpush3.bf16.msra.mxu1 %v4592_v54  ;;  %3500 = vmatprep.mubr.msk.f32.mxu1 %vm4272_vm0, %v4810_v48 }
0x1adf   :  { %3968 = vmatprep.subr.bf16.mxu1 %v4270_v3 }
0x1ae2   :  { %3970 = vmatpush3.bf16.msra.mxu1 %v4598_v56 }
0x1ae3   :  { %3995 = vmatprep.subr.bf16.mxu1 %v4270_v3 }
0x1bb0   :  { %v1371_v55 = vpop.f32.mrb[12].mxu1 }
0x1bb1   :  { %v1378_v57 = vsel %vm191_vm1, %v1371_v55, %v1376_v53  ;;  %v3453_v58 = vpop.f32.mrb[13].mxu1 }
0x1bb2   :  { %3471 = vmatmul.mubr.msk.f32.vlgmr.msra.gmra.mrb[12].mxu0 %vm199_vm2, %v1378_v57 }
0x1bb3   :  { %3955 = vmatpush3.bf16.msra.mxu0 %v4508_v8  ;;  %3489 = vmatprep.mubr.msk.f32.mxu0 %vm4272_vm0, %v4810_v48 }
0x1bb4   :  { %3956 = vmatprep.subr.bf16.mxu0 %v4270_v3 }
0x1bb7   :  { %3958 = vmatpush3.bf16.msra.mxu0 %v4514_v10 }
0x1bb8   :  { %3959 = vmatprep.subr.bf16.mxu0 %v4270_v3 }
0x1bbb   :  { %3961 = vmatpush3.bf16.msra.mxu0 %v4524_v13 }
0x1bbc   :  { %3962 = vmatprep.subr.bf16.mxu0 %v4270_v3 }
0x1bbf   :  { %3964 = vmatpush3.bf16.msra.mxu0 %v4535_v20 }
0x1bc0   :  { %3971 = vmatprep.subr.bf16.mxu0 %v4270_v3 }
0x1c85   :  { %v1448_v60 = vpop.f32.mrb[12].mxu0 }
0x1c86   :  { %v1449_v62 = vadd.f32 %v4491_v50, %v1448_v60  ;;  %v3472_v63 = vpop.f32.mrb[13].mxu0 }
0x1c88   :  { %4187 = vtanh.f32 %v1449_v62  ;;  %v2855_v9 = vmul.f32 -1.442695, %v1449_v62 }
0x1c8a   :  { %4189 = vpow2.f32 %v2855_v9 }
0x1c92   :  { %v4188_v1 = vpop.eup %4187 }
0x1c93   :  { %1461 = vrot.lane.b32.xlu1 %v4188_v1, %s4274_s25 }
0x1c94   :  { %v4190_v11 = vpop.eup %4189 }
0x1c95   :  { %v1455_v12 = vadd.f32 1.0, %v4190_v11 }
0x1c97   :  { %4191 = vrcp.f32 %v1455_v12 }
0x1ca1   :  { %v4192_v17 = vpop.eup %4191 }
0x1ca2   :  { %v1459_v39 = vmul.f32 %v4192_v17, %v4743_v45 }
0x1d05   :  { %v1462_v18 = vpop.permute.xlu1 %1461 }
0x1d06   :  { %v1464_v59 = vmul.f32 %v4192_v17, %v1462_v18  ;;  %v2862_v18 = vld [vmem:[%s5120_s2 + $0x20] sm:$0xff] }
0x1d08   :  { %1466 = vrot.lane.b32.xlu1 %v1464_v59, %s4273_s19  ;;  %v1685_v59 = vstv %s1682_s20 }
0x1d7a   :  { %v1467_v21 = vpop.permute.xlu1 %1466 }
0x1d7b   :  { %v4835_v23 = vadd.f32 %v1467_v21, %v1459_v39  ;;  %v1688_v21 = vstv %s1687_s21 }
0x1d7d   :  { %4193 = vtanh.f32 %v4835_v23 }
0x1d87   :  { %v4194_v50 = vpop.eup %4193 }
0x1d88   :  { %1472 = vrot.lane.b32.xlu0 %v4194_v50, %s4274_s25  ;;  %v1686_v50 = vmul.f32 %v2862_v18, %v1685_v59 }
0x1d8c   :  { %1480 = vrot.lane.b32.xlu0 %v4781_v0, %s4274_s25 }
0x1dfa   :  { %v1473_v6 = vpop.permute.xlu0 %1472 }
0x1dfb   :  { %v1475_v24 = vmul.f32 %v4192_v17, %v1473_v6 }
0x1dfd   :  { %1477 = vrot.lane.b32.xlu1 %v1475_v24, %s4273_s19 }
0x1dfe   :  { %v1481_v27 = vpop.permute.xlu0 %1480 }
0x1e6f   :  { %v1478_v29 = vpop.permute.xlu1 %1477 }
0x1e70   :  { %v1483_v30 = vsel %vm191_vm1, %v1478_v29, %v1481_v27 }
0x1e71   :  { %3490 = vmatmul.mubr.msk.f32.vlgmr.msra.gmra.mrb[14].mxu0 %vm199_vm2, %v1483_v30 }
0x1e72   :  { %3973 = vmatpush3.bf16.msra.mxu0 %v4348_v4  ;;  %3535 = vmatprep.mubr.msk.f32.mxu0 %vm4272_vm0, %v4810_v48 }
0x1e73   :  { %3974 = vmatprep.subr.bf16.mxu0 %v4270_v3 }
0x1e76   :  { %3976 = vmatpush3.bf16.msra.mxu0 %v4363_v7 }
0x1e77   :  { %3977 = vmatprep.subr.bf16.mxu0 %v4270_v3 }
0x1e7a   :  { %3979 = vmatpush3.bf16.msra.mxu0 %v4386_v14 }
0x1e7b   :  { %3980 = vmatprep.subr.bf16.mxu0 %v4270_v3 }
0x1e7e   :  { %3982 = vmatpush3.bf16.msra.mxu0 %v4411_v22 }
0x1e7f   :  { %3983 = vmatprep.subr.bf16.mxu0 %v4270_v3 }
0x1e82   :  { %3985 = vmatpush3.bf16.msra.mxu0 %v4433_v28 }
0x1e83   :  { %3986 = vmatprep.subr.bf16.mxu0 %v4270_v3 }
0x1e86   :  { %3988 = vmatpush3.bf16.msra.mxu0 %v4448_v32 }
0x1e87   :  { %3989 = vmatprep.subr.bf16.mxu0 %v4270_v3 }
0x1e8a   :  { %3991 = vmatpush3.bf16.msra.mxu0 %v4460_v35 }
0x1e8b   :  { %3992 = vmatprep.subr.bf16.mxu0 %v4270_v3 }
0x1e8e   :  { %3994 = vmatpush3.bf16.msra.mxu0 %v4473_v43 }
0x1e8f   :  { %4019 = vmatprep.subr.bf16.mxu0 %v4270_v3 }
0x1f44   :  { %v1553_v45 = vpop.f32.mrb[14].mxu0 }
0x1f45   :  { %v1554_v0 = vadd.f32 %v4575_v33, %v1553_v45  ;;  %v3491_v34 = vpop.f32.mrb[15].mxu0 }
0x1f47   :  { %4195 = vtanh.f32 %v1554_v0  ;;  %v2857_v37 = vmul.f32 -1.442695, %v1554_v0 }
0x1f49   :  { %4197 = vpow2.f32 %v2857_v37 }
0x1f51   :  { %v4196_v36 = vpop.eup %4195 }
0x1f52   :  { %1566 = vrot.lane.b32.xlu1 %v4196_v36, %s4274_s25  ;;  %v4917_v36 = vld [vmem:[%s5124_s6] ss:$0 sm:$0xff] }
0x1f53   :  { %v4198_v38 = vpop.eup %4197 }
0x1f54   :  { %v1560_v26 = vadd.f32 1.0, %v4198_v38 }
0x1f56   :  { %4199 = vrcp.f32 %v1560_v26 }
0x1f60   :  { %v4200_v40 = vpop.eup %4199 }
0x1f61   :  { %v1564_v44 = vmul.f32 %v4200_v40, %v4777_v16 }
0x1fc4   :  { %v1567_v42 = vpop.permute.xlu1 %1566 }
0x1fc5   :  { %v1569_v49 = vmul.f32 %v4200_v40, %v1567_v42 }
0x1fc7   :  { %1571 = vrot.lane.b32.xlu0 %v1569_v49, %s4273_s19 }
0x2039   :  { %v1572_v46 = vpop.permute.xlu0 %1571 }
0x203a   :  { %v4866_v47 = vadd.f32 %v1572_v46, %v1564_v44 }
0x203c   :  { %4201 = vtanh.f32 %v4866_v47 }
0x2046   :  { %v4202_v33 = vpop.eup %4201 }
0x2047   :  { %1577 = vrot.lane.b32.xlu1 %v4202_v33, %s4274_s25 }
0x20b9   :  { %v1578_v51 = vpop.permute.xlu1 %1577 }
0x20ba   :  { %v4870_v52 = vmul.f32 %v4200_v40, %v1578_v51 }
0x20bc   :  { %1582 = vrot.lane.b32.xlu0 %v4870_v52, %s4273_s19 }
0x212e   :  { %v1583_v2 = vpop.permute.xlu0 %1582 }
0x212f   :  { %3501 = vmatmul.mubr.msk.f32.vlgmr.msra.gmra.mrb[14].mxu1 %vm191_vm1, %v1583_v2 }
0x2130   :  { %3997 = vmatpush3.bf16.msra.mxu1 %v4388_v15  ;;  %3554 = vmatprep.mubr.msk.f32.mxu1 %vm4272_vm0, %v4810_v48 }
0x2131   :  { %3998 = vmatprep.subr.bf16.mxu1 %v4270_v3 }
0x2134   :  { %4000 = vmatpush3.bf16.msra.mxu1 %v4401_v19 }
0x2135   :  { %4001 = vmatprep.subr.bf16.mxu1 %v4270_v3 }
0x2138   :  { %4003 = vmatpush3.bf16.msra.mxu1 %v4423_v25 }
0x2139   :  { %4004 = vmatprep.subr.bf16.mxu1 %v4270_v3 }
0x213c   :  { %4006 = vmatpush3.bf16.msra.mxu1 %v4444_v31 }
0x213d   :  { %4007 = vmatprep.subr.bf16.mxu1 %v4270_v3 }
0x2202   :  { %v1652_v16 = vpop.f32.mrb[14].mxu1 }
0x2203   :  { %v1653_v41 = vadd.f32 %v4622_v61, %v1652_v16  ;;  %v3502_v53 = vpop.f32.mrb[15].mxu1 }
0x2205   :  { %2859 = vst [vmem:[%s5129_s11 + $0x20] sm:$0xff] %v1653_v41  ;;  %1658 = vmax.xlane.f32.xlu1 %v1653_v41 }
0x2216   :  { %1761 = vrot.lane.b32.xlu1 %v1475_v24, %s4274_s25 }
0x2292   :  { %v1659_v55 = vpop.xlane.xlu1 %1658 }
0x2293   :  { %vm1660_vm12 = vcmp.eq.f32.partialorder %v1653_v41, %v1659_v55 }
0x2294   :  { %v1661_v57 = vsel %vm1660_vm12, %v4628_v5, 128 }
0x2295   :  { %v1663_v58 = vshra.s32 %v1661_v57, 16  ;;  %v1662_v62 = vand.u32 65535, %v1661_v57 }
0x2296   :  { %v1762_v29 = vpop.permute.xlu1 %1761 }
0x2297   :  { %v1665_v60 = vcvt.s32.f32 %v1663_v58  ;;  %v1664_v1 = vcvt.s32.f32 %v1662_v62 }
0x2299   :  { %1666 = vmin.xlane.f32.xlu0 %v1665_v60 }
0x2326   :  { %v1667_v63 = vpop.xlane.xlu0 %1666 }
0x2327   :  { %vm1668_vm13 = vcmp.eq.f32.partialorder %v1665_v60, %v1667_v63  ;;  %v1673_v9 = vcvt.f32.s32 %v1667_v63  ;;  %v4956_v60 = vld [vmem:[%s5126_s8] ss:$0 sm:$0xff] }
0x2328   :  { %v1669_v61 = vsel %vm1668_vm13, %v1664_v1, inf }
0x2329   :  { %1670 = vmin.xlane.f32.xlu0 %v1669_v61  ;;  %v1674_v12 = vshll.u32 %v1673_v9, 16 }
0x23b6   :  { %v1671_v11 = vpop.xlane.xlu0 %1670 }
0x23b7   :  { %v1672_v17 = vcvt.f32.s32 %v1671_v11 }
0x23b9   :  { %v1675_v39 = vadd.s32 %v1674_v12, %v1672_v17 }
0x23bb   :  { %vm1676_vm14 = vcmp.eq.s32.totalorder %v4628_v5, %v1675_v39 }
0x23bc   :  { %v2860_v6 = vsel %vm1676_vm14, 1.0, %v4810_v48 }
0x23bd   :  { %v1689_v24 = vmul.f32 %v2860_v6, %v1688_v21 }
0x23bf   :  { %v1690_v27 = vadd.f32 %v1689_v24, %v1686_v50 }
0x23c1   :  { %3536 = vmatmul.mubr.f32.vlgmr.msra.gmra.mrb[16].mxu0 %v1690_v27 }
0x23c2   :  { %4021 = vmatpush3.bf16.msra.mxu0 %v4592_v54  ;;  %3584 = vmatprep.mubr.msk.f32.mxu0 %vm4272_vm0, %v4810_v48 }
0x23c3   :  { %4022 = vmatprep.subr.bf16.mxu0 %v4270_v3 }
0x23c6   :  { %4024 = vmatpush3.bf16.msra.mxu0 %v4598_v56 }
0x23c7   :  { %4049 = vmatprep.subr.bf16.mxu0 %v4270_v3 }
0x2494   :  { %v1757_v30 = vpop.f32.mrb[16].mxu0 }
0x2495   :  { %v1764_v45 = vsel %vm191_vm1, %v1757_v30, %v1762_v29  ;;  %v3537_v0 = vpop.f32.mrb[17].mxu0  ;;  %v4984_v29 = vld [vmem:[%s5128_s10] ss:$0 sm:$0xff]  ;;  %s2870_s10 = sld [smem:[#allocation2 + $0x6]] }
0x2496   :  { %3555 = vmatmul.mubr.msk.f32.vlgmr.msra.gmra.mrb[16].mxu1 %vm199_vm2, %v1764_v45 }
0x2497   :  { %4009 = vmatpush3.bf16.msra.mxu1 %v4508_v8  ;;  %3573 = vmatprep.mubr.msk.f32.mxu1 %vm4272_vm0, %v4810_v48 }
0x2498   :  { %4010 = vmatprep.subr.bf16.mxu1 %v4270_v3 }
0x249b   :  { %4012 = vmatpush3.bf16.msra.mxu1 %v4514_v10  ;;  %p2066_p10 = scmp.gt.s32.totalorder %s2870_s10, 0 }
0x249c   :  { %4013 = vmatprep.subr.bf16.mxu1 %v4270_v3 }
0x249d   :  { %s2067_s26 = scalar_select %p2066_p10, 1, 0 }
0x249f   :  { %4015 = vmatpush3.bf16.msra.mxu1 %v4524_v13  ;;  %s2068_s27 = scvt.s32.f32 %s2067_s26 }
0x24a0   :  { %4016 = vmatprep.subr.bf16.mxu1 %v4270_v3 }
0x24a1   :  { %s2073_s28 = ssub.f32 1.0, %s2068_s27 }
0x24a3   :  { %4018 = vmatpush3.bf16.msra.mxu1 %v4535_v20 }
0x24a4   :  { %4025 = vmatprep.subr.bf16.mxu1 %v4270_v3 }
0x2569   :  { %v1834_v34 = vpop.f32.mrb[16].mxu1 }
0x256a   :  { %v1835_v37 = vadd.f32 %v4917_v36, %v1834_v34  ;;  %v3556_v38 = vpop.f32.mrb[17].mxu1 }
0x256c   :  { %4203 = vtanh.f32 %v1835_v37  ;;  %v2864_v40 = vmul.f32 -1.442695, %v1835_v37 }
0x256e   :  { %4205 = vpow2.f32 %v2864_v40 }
0x2576   :  { %v4204_v26 = vpop.eup %4203 }
0x2577   :  { %1847 = vrot.lane.b32.xlu0 %v4204_v26, %s4274_s25 }
0x2578   :  { %v4206_v42 = vpop.eup %4205 }
0x2579   :  { %v1841_v49 = vadd.f32 1.0, %v4206_v42 }
0x257b   :  { %4207 = vrcp.f32 %v1841_v49 }
0x2585   :  { %v4208_v44 = vpop.eup %4207 }
0x2586   :  { %v1845_v51 = vmul.f32 %v4208_v44, %v4835_v23 }
0x25e9   :  { %v1848_v46 = vpop.permute.xlu0 %1847 }
0x25ea   :  { %v1850_v33 = vmul.f32 %v4208_v44, %v1848_v46 }
0x25ec   :  { %1852 = vrot.lane.b32.xlu1 %v1850_v33, %s4273_s19 }
0x265e   :  { %v1853_v2 = vpop.permute.xlu1 %1852 }
0x265f   :  { %v4923_v16 = vadd.f32 %v1853_v2, %v1845_v51  ;;  %v2871_v2 = vld [vmem:[%s5120_s2 + $0x28] sm:$0xff] }
0x2661   :  { %4209 = vtanh.f32 %v4923_v16 }
0x266b   :  { %v4210_v41 = vpop.eup %4209 }
0x266c   :  { %1858 = vrot.lane.b32.xlu1 %v4210_v41, %s4274_s25  ;;  %v2071_v41 = vstv %s2068_s27 }
0x2670   :  { %1866 = vrot.lane.b32.xlu1 %v4870_v52, %s4274_s25 }
0x26de   :  { %v1859_v53 = vpop.permute.xlu1 %1858 }
0x26df   :  { %v4929_v55 = vmul.f32 %v4208_v44, %v1859_v53 }
0x26e1   :  { %1863 = vrot.lane.b32.xlu0 %v4929_v55, %s4273_s19 }
0x26e2   :  { %v1867_v57 = vpop.permute.xlu1 %1866 }
0x2753   :  { %v1864_v58 = vpop.permute.xlu0 %1863 }
0x2754   :  { %v1869_v23 = vsel %vm191_vm1, %v1864_v58, %v1867_v57  ;;  %v2074_v57 = vstv %s2073_s28  ;;  %v2072_v58 = vmul.f32 %v2871_v2, %v2071_v41 }
0x2755   :  { %3574 = vmatmul.mubr.msk.f32.vlgmr.msra.gmra.mrb[18].mxu1 %vm199_vm2, %v1869_v23 }
0x2756   :  { %4027 = vmatpush3.bf16.msra.mxu1 %v4348_v4  ;;  %3619 = vmatprep.mubr.msk.f32.mxu1 %vm4272_vm0, %v4810_v48 }
0x2757   :  { %4028 = vmatprep.subr.bf16.mxu1 %v4270_v3 }
0x275a   :  { %4030 = vmatpush3.bf16.msra.mxu1 %v4363_v7 }
0x275b   :  { %4031 = vmatprep.subr.bf16.mxu1 %v4270_v3 }
0x275e   :  { %4033 = vmatpush3.bf16.msra.mxu1 %v4386_v14 }
0x275f   :  { %4034 = vmatprep.subr.bf16.mxu1 %v4270_v3 }
0x2762   :  { %4036 = vmatpush3.bf16.msra.mxu1 %v4411_v22 }
0x2763   :  { %4037 = vmatprep.subr.bf16.mxu1 %v4270_v3 }
0x2766   :  { %4039 = vmatpush3.bf16.msra.mxu1 %v4433_v28 }
0x2767   :  { %4040 = vmatprep.subr.bf16.mxu1 %v4270_v3 }
0x276a   :  { %4042 = vmatpush3.bf16.msra.mxu1 %v4448_v32 }
0x276b   :  { %4043 = vmatprep.subr.bf16.mxu1 %v4270_v3 }
0x276e   :  { %4045 = vmatpush3.bf16.msra.mxu1 %v4460_v35 }
0x276f   :  { %4046 = vmatprep.subr.bf16.mxu1 %v4270_v3 }
0x2772   :  { %4048 = vmatpush3.bf16.msra.mxu1 %v4473_v43 }
0x2773   :  { %4073 = vmatprep.subr.bf16.mxu1 %v4270_v3 }
0x2828   :  { %v1939_v52 = vpop.f32.mrb[18].mxu1 }
0x2829   :  { %v1940_v62 = vadd.f32 %v4956_v60, %v1939_v52  ;;  %v3575_v63 = vpop.f32.mrb[19].mxu1 }
0x282b   :  { %4211 = vtanh.f32 %v1940_v62  ;;  %v2866_v61 = vmul.f32 -1.442695, %v1940_v62 }
0x282d   :  { %4213 = vpow2.f32 %v2866_v61 }
0x2835   :  { %v4212_v1 = vpop.eup %4211 }
0x2836   :  { %1952 = vrot.lane.b32.xlu0 %v4212_v1, %s4274_s25 }
0x2837   :  { %v4214_v9 = vpop.eup %4213 }
0x2838   :  { %v1946_v11 = vadd.f32 1.0, %v4214_v9 }
0x283a   :  { %4215 = vrcp.f32 %v1946_v11 }
0x2844   :  { %v4216_v12 = vpop.eup %4215 }
0x2845   :  { %v1950_v59 = vmul.f32 %v4216_v12, %v4866_v47 }
0x28a8   :  { %v1953_v17 = vpop.permute.xlu0 %1952 }
0x28a9   :  { %v1955_v18 = vmul.f32 %v4216_v12, %v1953_v17 }
0x28ab   :  { %1957 = vrot.lane.b32.xlu1 %v1955_v18, %s4273_s19 }
0x291d   :  { %v1958_v39 = vpop.permute.xlu1 %1957 }
0x291e   :  { %v4962_v21 = vadd.f32 %v1958_v39, %v1950_v59 }
0x2920   :  { %4217 = vtanh.f32 %v4962_v21 }
0x292a   :  { %v4218_v50 = vpop.eup %4217 }
0x292b   :  { %1963 = vrot.lane.b32.xlu0 %v4218_v50, %s4274_s25 }
0x299d   :  { %v1964_v6 = vpop.permute.xlu0 %1963 }
0x299e   :  { %v4966_v24 = vmul.f32 %v4216_v12, %v1964_v6 }
0x29a0   :  { %1968 = vrot.lane.b32.xlu1 %v4966_v24, %s4273_s19 }
0x2a12   :  { %v1969_v27 = vpop.permute.xlu1 %1968 }
0x2a13   :  { %3585 = vmatmul.mubr.msk.f32.vlgmr.msra.gmra.mrb[18].mxu0 %vm191_vm1, %v1969_v27 }
0x2a14   :  { %4051 = vmatpush3.bf16.msra.mxu0 %v4388_v15  ;;  %3638 = vmatprep.mubr.msk.f32.mxu0 %vm4272_vm0, %v4810_v48 }
0x2a15   :  { %4052 = vmatprep.subr.bf16.mxu0 %v4270_v3 }
0x2a18   :  { %4054 = vmatpush3.bf16.msra.mxu0 %v4401_v19 }
0x2a19   :  { %4055 = vmatprep.subr.bf16.mxu0 %v4270_v3 }
0x2a1c   :  { %4057 = vmatpush3.bf16.msra.mxu0 %v4423_v25 }
0x2a1d   :  { %4058 = vmatprep.subr.bf16.mxu0 %v4270_v3 }
0x2a20   :  { %4060 = vmatpush3.bf16.msra.mxu0 %v4444_v31 }
0x2a21   :  { %4061 = vmatprep.subr.bf16.mxu0 %v4270_v3 }
0x2ae6   :  { %v2038_v47 = vpop.f32.mrb[18].mxu0 }
0x2ae7   :  { %v2039_v30 = vadd.f32 %v4984_v29, %v2038_v47  ;;  %v3586_v45 = vpop.f32.mrb[19].mxu0 }
0x2ae9   :  { %2868 = vst [vmem:[%s5129_s11 + $0x28] sm:$0xff] %v2039_v30  ;;  %2044 = vmax.xlane.f32.xlu0 %v2039_v30 }
0x2b76   :  { %v2045_v0 = vpop.xlane.xlu0 %2044 }
0x2b77   :  { %vm2046_vm15 = vcmp.eq.f32.partialorder %v2039_v30, %v2045_v0 }
0x2b78   :  { %v2047_v34 = vsel %vm2046_vm15, %v4628_v5, 128 }
0x2b79   :  { %v2049_v37 = vshra.s32 %v2047_v34, 16  ;;  %v2048_v26 = vand.u32 65535, %v2047_v34 }
0x2b7b   :  { %v2051_v38 = vcvt.s32.f32 %v2049_v37  ;;  %v2050_v42 = vcvt.s32.f32 %v2048_v26 }
0x2b7d   :  { %2052 = vmin.xlane.f32.xlu1 %v2051_v38 }
0x2c0a   :  { %v2053_v40 = vpop.xlane.xlu1 %2052 }
0x2c0b   :  { %vm2054_vm3 = vcmp.eq.f32.partialorder %v2051_v38, %v2053_v40  ;;  %v2059_v44 = vcvt.f32.s32 %v2053_v40 }
0x2c0c   :  { %v2055_v49 = vsel %vm2054_vm3, %v2050_v42, inf }
0x2c0d   :  { %2056 = vmin.xlane.f32.xlu0 %v2055_v49  ;;  %v2060_v33 = vshll.u32 %v2059_v44, 16 }
0x2c23   :  { %2147 = vrot.lane.b32.xlu0 %v4929_v55, %s4274_s25 }
0x2c9a   :  { %v2057_v46 = vpop.xlane.xlu0 %2056 }
0x2c9b   :  { %v2058_v51 = vcvt.f32.s32 %v2057_v46 }
0x2c9d   :  { %v2061_v53 = vadd.s32 %v2060_v33, %v2058_v51 }
0x2c9e   :  { %v2148_v62 = vpop.permute.xlu0 %2147 }
0x2c9f   :  { %vm2062_vm4 = vcmp.eq.s32.totalorder %v4628_v5, %v2061_v53 }
0x2ca0   :  { %v2869_v55 = vsel %vm2062_vm4, 1.0, %v4810_v48 }
0x2ca1   :  { %v2075_v23 = vmul.f32 %v2869_v55, %v2074_v57 }
0x2ca3   :  { %v2076_v52 = vadd.f32 %v2075_v23, %v2072_v58 }
0x2ca5   :  { %3620 = vmatmul.mubr.f32.vlgmr.msra.gmra.mrb[20].mxu1 %v2076_v52 }
0x2ca6   :  { %4075 = vmatpush3.bf16.msra.mxu1 %v4592_v54  ;;  %3668 = vmatprep.mubr.msk.f32.mxu1 %vm4272_vm0, %v4810_v48 }
0x2ca7   :  { %4076 = vmatprep.subr.bf16.mxu1 %v4270_v3 }
0x2caa   :  { %4078 = vmatpush3.bf16.msra.mxu1 %v4598_v56 }
0x2cab   :  { %4103 = vmatprep.subr.bf16.mxu1 %v4270_v3 }
0x2d78   :  { %v2143_v63 = vpop.f32.mrb[20].mxu1 }
0x2d79   :  { %v2150_v1 = vsel %vm191_vm1, %v2143_v63, %v2148_v62  ;;  %v3621_v61 = vpop.f32.mrb[21].mxu1 }
0x2d7a   :  { %3639 = vmatmul.mubr.msk.f32.vlgmr.msra.gmra.mrb[20].mxu0 %vm199_vm2, %v2150_v1  ;;  %v2880_v61 = vld [vmem:[%s5120_s2 + $0x30] sm:$0xff] }
0x2d7b   :  { %4063 = vmatpush3.bf16.msra.mxu0 %v4508_v8  ;;  %3657 = vmatprep.mubr.msk.f32.mxu0 %vm4272_vm0, %v4810_v48 }
0x2d7c   :  { %4064 = vmatprep.subr.bf16.mxu0 %v4270_v3 }
0x2d7f   :  { %4066 = vmatpush3.bf16.msra.mxu0 %v4514_v10 }
0x2d80   :  { %4067 = vmatprep.subr.bf16.mxu0 %v4270_v3 }
0x2d83   :  { %4069 = vmatpush3.bf16.msra.mxu0 %v4524_v13 }
0x2d84   :  { %4070 = vmatprep.subr.bf16.mxu0 %v4270_v3 }
0x2d87   :  { %4072 = vmatpush3.bf16.msra.mxu0 %v4535_v20 }
0x2d88   :  { %4079 = vmatprep.subr.bf16.mxu0 %v4270_v3 }
0x2e4d   :  { %v2220_v9 = vpop.f32.mrb[20].mxu0 }
0x2e4e   :  { %v2221_v11 = vadd.f32 %v4917_v36, %v2220_v9  ;;  %v3640_v12 = vpop.f32.mrb[21].mxu0  ;;  %v2457_v9 = vstv %s2454_s14 }
0x2e4f   :  { %v2460_v12 = vstv %s2459_s15 }
0x2e50   :  { %4219 = vtanh.f32 %v2221_v11  ;;  %v2873_v18 = vmul.f32 -1.442695, %v2221_v11 }
0x2e52   :  { %4221 = vpow2.f32 %v2873_v18 }
0x2e5a   :  { %v4220_v17 = vpop.eup %4219 }
0x2e5b   :  { %2233 = vrot.lane.b32.xlu1 %v4220_v17, %s4274_s25  ;;  %v2458_v17 = vmul.f32 %v2880_v61, %v2457_v9 }
0x2e5c   :  { %v4222_v59 = vpop.eup %4221 }
0x2e5d   :  { %v2227_v39 = vadd.f32 1.0, %v4222_v59 }
0x2e5f   :  { %4223 = vrcp.f32 %v2227_v39 }
0x2e69   :  { %v4224_v50 = vpop.eup %4223 }
0x2e6a   :  { %v2231_v47 = vmul.f32 %v4224_v50, %v4923_v16 }
0x2ecd   :  { %v2234_v6 = vpop.permute.xlu1 %2233 }
0x2ece   :  { %v2236_v27 = vmul.f32 %v4224_v50, %v2234_v6 }
0x2ed0   :  { %2238 = vrot.lane.b32.xlu1 %v2236_v27, %s4273_s19 }
0x2f42   :  { %v2239_v30 = vpop.permute.xlu1 %2238 }
0x2f43   :  { %v5020_v45 = vadd.f32 %v2239_v30, %v2231_v47 }
0x2f45   :  { %4225 = vtanh.f32 %v5020_v45 }
0x2f4f   :  { %v4226_v0 = vpop.eup %4225 }
0x2f50   :  { %2244 = vrot.lane.b32.xlu0 %v4226_v0, %s4274_s25 }
0x2f54   :  { %2252 = vrot.lane.b32.xlu0 %v4966_v24, %s4274_s25 }
0x2fc2   :  { %v2245_v34 = vpop.permute.xlu0 %2244 }
0x2fc3   :  { %v2247_v37 = vmul.f32 %v4224_v50, %v2245_v34 }
0x2fc5   :  { %2249 = vrot.lane.b32.xlu1 %v2247_v37, %s4273_s19 }
0x2fc6   :  { %v2253_v38 = vpop.permute.xlu0 %2252 }
0x3037   :  { %v2250_v26 = vpop.permute.xlu1 %2249 }
0x3038   :  { %v2255_v40 = vsel %vm191_vm1, %v2250_v26, %v2253_v38 }
0x3039   :  { %3658 = vmatmul.mubr.msk.f32.vlgmr.msra.gmra.mrb[22].mxu0 %vm199_vm2, %v2255_v40 }
0x303a   :  { %4081 = vmatpush3.bf16.msra.mxu0 %v4348_v4  ;;  %3703 = vmatprep.mubr.msk.f32.mxu0 %vm4272_vm0, %v4810_v48 }
0x303b   :  { %4082 = vmatprep.subr.bf16.mxu0 %v4270_v3 }
0x303e   :  { %4084 = vmatpush3.bf16.msra.mxu0 %v4363_v7 }
0x303f   :  { %4085 = vmatprep.subr.bf16.mxu0 %v4270_v3 }
0x3042   :  { %4087 = vmatpush3.bf16.msra.mxu0 %v4386_v14 }
0x3043   :  { %4088 = vmatprep.subr.bf16.mxu0 %v4270_v3 }
0x3046   :  { %4090 = vmatpush3.bf16.msra.mxu0 %v4411_v22 }
0x3047   :  { %4091 = vmatprep.subr.bf16.mxu0 %v4270_v3 }
0x304a   :  { %4093 = vmatpush3.bf16.msra.mxu0 %v4433_v28 }
0x304b   :  { %4094 = vmatprep.subr.bf16.mxu0 %v4270_v3 }
0x304e   :  { %4096 = vmatpush3.bf16.msra.mxu0 %v4448_v32 }
0x304f   :  { %4097 = vmatprep.subr.bf16.mxu0 %v4270_v3 }
0x3052   :  { %4099 = vmatpush3.bf16.msra.mxu0 %v4460_v35 }
0x3053   :  { %4100 = vmatprep.subr.bf16.mxu0 %v4270_v3 }
0x3056   :  { %4102 = vmatpush3.bf16.msra.mxu0 %v4473_v43 }
0x3057   :  { %4127 = vmatprep.subr.bf16.mxu0 %v4270_v3 }
0x310c   :  { %v2325_v4 = vpop.f32.mrb[22].mxu0 }
0x310d   :  { %v2326_v7 = vadd.f32 %v4956_v60, %v2325_v4  ;;  %v3659_v14 = vpop.f32.mrb[23].mxu0 }
0x310f   :  { %4227 = vtanh.f32 %v2326_v7  ;;  %v2875_v28 = vmul.f32 -1.442695, %v2326_v7 }
0x3111   :  { %4229 = vpow2.f32 %v2875_v28 }
0x3119   :  { %v4228_v22 = vpop.eup %4227 }
0x311a   :  { %2338 = vrot.lane.b32.xlu1 %v4228_v22, %s4274_s25 }
0x311b   :  { %v4230_v32 = vpop.eup %4229 }
0x311c   :  { %v2332_v16 = vadd.f32 1.0, %v4230_v32 }
0x311e   :  { %4231 = vrcp.f32 %v2332_v16 }
0x3128   :  { %v4232_v35 = vpop.eup %4231 }
0x3129   :  { %v2336_v43 = vmul.f32 %v4232_v35, %v4962_v21 }
0x318c   :  { %v2339_v24 = vpop.permute.xlu1 %2338 }
0x318d   :  { %v2341_v42 = vmul.f32 %v4232_v35, %v2339_v24 }
0x318f   :  { %2343 = vrot.lane.b32.xlu0 %v2341_v42, %s4273_s19 }
0x3201   :  { %v2344_v49 = vpop.permute.xlu0 %2343 }
0x3202   :  { %v5051_v44 = vadd.f32 %v2344_v49, %v2336_v43 }
0x3204   :  { %4233 = vtanh.f32 %v5051_v44 }
0x320e   :  { %v4234_v46 = vpop.eup %4233 }
0x320f   :  { %2349 = vrot.lane.b32.xlu1 %v4234_v46, %s4274_s25 }
0x3281   :  { %v2350_v33 = vpop.permute.xlu1 %2349 }
0x3282   :  { %v5055_v51 = vmul.f32 %v4232_v35, %v2350_v33 }
0x3284   :  { %2354 = vrot.lane.b32.xlu0 %v5055_v51, %s4273_s19 }
0x32f6   :  { %v2355_v2 = vpop.permute.xlu0 %2354 }
0x32f7   :  { %3669 = vmatmul.mubr.msk.f32.vlgmr.msra.gmra.mrb[22].mxu1 %vm191_vm1, %v2355_v2 }
0x32f8   :  { %4105 = vmatpush3.bf16.msra.mxu1 %v4388_v15  ;;  %3722 = vmatprep.mubr.msk.f32.mxu1 %vm4272_vm0, %v4810_v48 }
0x32f9   :  { %4106 = vmatprep.subr.bf16.mxu1 %v4270_v3 }
0x32fc   :  { %4108 = vmatpush3.bf16.msra.mxu1 %v4401_v19 }
0x32fd   :  { %4109 = vmatprep.subr.bf16.mxu1 %v4270_v3 }
0x3300   :  { %4111 = vmatpush3.bf16.msra.mxu1 %v4423_v25 }
0x3301   :  { %4112 = vmatprep.subr.bf16.mxu1 %v4270_v3 }
0x3304   :  { %4114 = vmatpush3.bf16.msra.mxu1 %v4444_v31 }
0x3305   :  { %4115 = vmatprep.subr.bf16.mxu1 %v4270_v3 }
0x33ca   :  { %v2424_v21 = vpop.f32.mrb[22].mxu1 }
0x33cb   :  { %v2425_v15 = vadd.f32 %v4984_v29, %v2424_v21  ;;  %v3670_v41 = vpop.f32.mrb[23].mxu1 }
0x33cd   :  { %2877 = vst [vmem:[%s5129_s11 + $0x30] sm:$0xff] %v2425_v15  ;;  %2430 = vmax.xlane.f32.xlu1 %v2425_v15 }
0x33de   :  { %2533 = vrot.lane.b32.xlu1 %v2247_v37, %s4274_s25 }
0x345a   :  { %v2431_v19 = vpop.xlane.xlu1 %2430 }
0x345b   :  { %vm2432_vm5 = vcmp.eq.f32.partialorder %v2425_v15, %v2431_v19 }
0x345c   :  { %v2433_v25 = vsel %vm2432_vm5, %v4628_v5, 128 }
0x345d   :  { %v2435_v53 = vshra.s32 %v2433_v25, 16  ;;  %v2434_v31 = vand.u32 65535, %v2433_v25 }
0x345e   :  { %v2534_v50 = vpop.permute.xlu1 %2533 }
0x345f   :  { %v2437_v57 = vcvt.s32.f32 %v2435_v53  ;;  %v2436_v55 = vcvt.s32.f32 %v2434_v31 }
0x3461   :  { %2438 = vmin.xlane.f32.xlu0 %v2437_v57 }
0x34ee   :  { %v2439_v58 = vpop.xlane.xlu0 %2438 }
0x34ef   :  { %vm2440_vm6 = vcmp.eq.f32.partialorder %v2437_v57, %v2439_v58  ;;  %v2445_v52 = vcvt.f32.s32 %v2439_v58 }
0x34f0   :  { %v2441_v23 = vsel %vm2440_vm6, %v2436_v55, inf }
0x34f1   :  { %2442 = vmin.xlane.f32.xlu0 %v2441_v23  ;;  %v2446_v63 = vshll.u32 %v2445_v52, 16 }
0x357e   :  { %v2443_v62 = vpop.xlane.xlu0 %2442 }
0x357f   :  { %v2444_v1 = vcvt.f32.s32 %v2443_v62 }
0x3581   :  { %v2447_v11 = vadd.s32 %v2446_v63, %v2444_v1 }
0x3583   :  { %vm2448_vm7 = vcmp.eq.s32.totalorder %v4628_v5, %v2447_v11 }
0x3584   :  { %v2878_v18 = vsel %vm2448_vm7, 1.0, %v4810_v48 }
0x3585   :  { %v2461_v59 = vmul.f32 %v2878_v18, %v2460_v12 }
0x3587   :  { %v2462_v39 = vadd.f32 %v2461_v59, %v2458_v17 }
0x3589   :  { %3704 = vmatmul.mubr.f32.vlgmr.msra.gmra.mrb[24].mxu0 %v2462_v39 }
0x358a   :  { %4129 = vmatpush3.bf16.msra.mxu0 %v4592_v54  ;;  %3752 = vmatprep.mubr.msk.f32.mxu0 %vm4272_vm0, %v4810_v48 }
0x358b   :  { %4130 = vmatprep.subr.bf16.mxu0 %v4270_v3 }
0x358e   :  { %4132 = vmatpush3.bf16.msra.mxu0 %v4598_v56 }
0x365c   :  { %v2529_v6 = vpop.f32.mrb[24].mxu0 }
0x365d   :  { %v2536_v27 = vsel %vm191_vm1, %v2529_v6, %v2534_v50  ;;  %v3705_v5 = vpop.f32.mrb[25].mxu0 }
0x365e   :  { %3723 = vmatmul.mubr.msk.f32.vlgmr.msra.gmra.mrb[24].mxu1 %vm199_vm2, %v2536_v27 }
0x365f   :  { %4117 = vmatpush3.bf16.msra.mxu1 %v4508_v8  ;;  %3741 = vmatprep.mubr.msk.f32.mxu1 %vm4272_vm0, %v4810_v48 }
0x3660   :  { %4118 = vmatprep.subr.bf16.mxu1 %v4270_v3 }
0x3663   :  { %4120 = vmatpush3.bf16.msra.mxu1 %v4514_v10 }
0x3664   :  { %4121 = vmatprep.subr.bf16.mxu1 %v4270_v3 }
0x3667   :  { %4123 = vmatpush3.bf16.msra.mxu1 %v4524_v13 }
0x3668   :  { %4124 = vmatprep.subr.bf16.mxu1 %v4270_v3 }
0x366b   :  { %4126 = vmatpush3.bf16.msra.mxu1 %v4535_v20 }
0x3731   :  { %v2606_v54 = vpop.f32.mrb[24].mxu1 }
0x3732   :  { %v2607_v56 = vadd.f32 %v4917_v36, %v2606_v54  ;;  %v3724_v47 = vpop.f32.mrb[25].mxu1 }
0x3734   :  { %4235 = vtanh.f32 %v2607_v56  ;;  %v2882_v48 = vmul.f32 -1.442695, %v2607_v56 }
0x3736   :  { %4237 = vpow2.f32 %v2882_v48 }
0x373e   :  { %v4236_v8 = vpop.eup %4235 }
0x373f   :  { %2619 = vrot.lane.b32.xlu0 %v4236_v8, %s4274_s25 }
0x3740   :  { %v4238_v30 = vpop.eup %4237 }
0x3741   :  { %v2613_v10 = vadd.f32 1.0, %v4238_v30 }
0x3743   :  { %4239 = vrcp.f32 %v2613_v10 }
0x374d   :  { %v4240_v0 = vpop.eup %4239 }
0x374e   :  { %v2617_v3 = vmul.f32 %v4240_v0, %v5020_v45 }
0x37b1   :  { %v2620_v34 = vpop.permute.xlu0 %2619 }
0x37b2   :  { %v2622_v13 = vmul.f32 %v4240_v0, %v2620_v34 }
0x37b4   :  { %2624 = vrot.lane.b32.xlu1 %v2622_v13, %s4273_s19 }
0x3826   :  { %v2625_v20 = vpop.permute.xlu1 %2624 }
0x3827   :  { %v2627_v37 = vadd.f32 %v2625_v20, %v2617_v3 }
0x3829   :  { %4241 = vtanh.f32 %v2627_v37 }
0x3833   :  { %v4242_v36 = vpop.eup %4241 }
0x3834   :  { %2630 = vrot.lane.b32.xlu1 %v4242_v36, %s4274_s25 }
0x3838   :  { %2638 = vrot.lane.b32.xlu1 %v5055_v51, %s4274_s25 }
0x38a6   :  { %v2631_v38 = vpop.permute.xlu1 %2630 }
0x38a7   :  { %v2633_v26 = vmul.f32 %v4240_v0, %v2631_v38 }
0x38a9   :  { %2635 = vrot.lane.b32.xlu0 %v2633_v26, %s4273_s19 }
0x38aa   :  { %v2639_v40 = vpop.permute.xlu1 %2638 }
0x391b   :  { %v2636_v4 = vpop.permute.xlu0 %2635 }
0x391c   :  { %v2641_v7 = vsel %vm191_vm1, %v2636_v4, %v2639_v40 }
0x391d   :  { %3742 = vmatmul.mubr.msk.f32.vlgmr.msra.gmra.mrb[26].mxu1 %vm199_vm2, %v2641_v7 }
0x39f0   :  { %v2711_v45 = vpop.f32.mrb[26].mxu1 }
0x39f1   :  { %v2712_v14 = vadd.f32 %v4956_v60, %v2711_v45  ;;  %v3743_v22 = vpop.f32.mrb[27].mxu1 }
0x39f3   :  { %4243 = vtanh.f32 %v2712_v14  ;;  %v2884_v32 = vmul.f32 -1.442695, %v2712_v14 }
0x39f5   :  { %4245 = vpow2.f32 %v2884_v32 }
0x39fd   :  { %v4244_v28 = vpop.eup %4243 }
0x39fe   :  { %2724 = vrot.lane.b32.xlu0 %v4244_v28, %s4274_s25 }
0x39ff   :  { %v4246_v16 = vpop.eup %4245 }
0x3a00   :  { %v2718_v35 = vadd.f32 1.0, %v4246_v16 }
0x3a02   :  { %4247 = vrcp.f32 %v2718_v35 }
0x3a0c   :  { %v4248_v24 = vpop.eup %4247 }
0x3a0d   :  { %v2722_v49 = vmul.f32 %v4248_v24, %v5051_v44 }
0x3a70   :  { %v2725_v42 = vpop.permute.xlu0 %2724 }
0x3a71   :  { %v2727_v43 = vmul.f32 %v4248_v24, %v2725_v42 }
0x3a73   :  { %2729 = vrot.lane.b32.xlu1 %v2727_v43, %s4273_s19 }
0x3ae5   :  { %v2730_v46 = vpop.permute.xlu1 %2729 }
0x3ae6   :  { %v2732_v33 = vadd.f32 %v2730_v46, %v2722_v49 }
0x3ae8   :  { %4249 = vtanh.f32 %v2732_v33 }
0x3af2   :  { %v4250_v60 = vpop.eup %4249 }
0x3af3   :  { %2735 = vrot.lane.b32.xlu0 %v4250_v60, %s4274_s25 }
0x3b65   :  { %v2736_v51 = vpop.permute.xlu0 %2735 }
0x3b66   :  { %v2738_v2 = vmul.f32 %v4248_v24, %v2736_v51 }
0x3b68   :  { %2740 = vrot.lane.b32.xlu1 %v2738_v2, %s4273_s19 }
0x3bda   :  { %v2741_v21 = vpop.permute.xlu1 %2740 }
0x3bdb   :  { %3753 = vmatmul.mubr.msk.f32.vlgmr.msra.gmra.mrb[26].mxu0 %vm191_vm1, %v2741_v21 }
0x3cae   :  { %v2810_v15 = vpop.f32.mrb[26].mxu0 }
0x3caf   :  { %v2811_v41 = vadd.f32 %v4984_v29, %v2810_v15  ;;  %v3754_v19 = vpop.f32.mrb[27].mxu0 }
0x3cb1   :  { %2886 = vst [vmem:[%s5129_s11 + $0x38] sm:$0xff] %v2811_v41 }
0x3cb2   :  { %2820 = vsyncpa [#allocation3], 1 }

</bundles_post_ra>
